<compile_context>
chip_gen: v7x
topology: tpu7x:2x2x1
jax: 0.10.0
libtpu: 0.0.40
codegen_flags: <defaults>
</compile_context>

<pallas_src>
import math

import jax
import jax.numpy as jnp
from jax.experimental import pallas as pl
from jax.experimental.pallas import tpu as pltpu

# ---- flow hyper-parameters (synthetic, deterministic init below) -----------
D = 32          # feature dimension of x
D_HALF = D // 2 # coupling split
H = 64          # hidden width of each coupling net
K = 2           # number of coupling layers (alternating which half is updated)

_LOG_2PI = math.log(2.0 * math.pi)


def _flow_logprob_kernel(x_ref, w1_ref, b1_ref, wst_ref, bst_ref, out_ref):
    """Computes log_prob for one batch tile of x.

    x_ref   : (TB, D)             input samples
    w1_ref  : (K, D_HALF, H)      first-layer weights of coupling nets
    b1_ref  : (K, 1, H)           first-layer biases (f32)
    wst_ref : (K, H, 2*D_HALF)    fused scale||shift head weights
    bst_ref : (K, 1, 2*D_HALF)    fused scale||shift head biases (f32)
    out_ref : (1, TB)             log_prob per sample (lane-dense row)
    """
    x = x_ref[...]
    tb = x.shape[0]
    wdt = w1_ref.dtype            # matmul input dtype (f32 or bf16)

    za = x[:, :D_HALF]            # first half
    zb = x[:, D_HALF:]            # second half
    logdet = jnp.zeros((tb, 1), jnp.float32)

    # K is small & static -> unrolled Python loop (each slice index is static).
    for k in range(K):
        if k % 2 == 0:
            cond, trans = za, zb
        else:
            cond, trans = zb, za

        h = jnp.tanh(
            jnp.dot(cond.astype(wdt), w1_ref[k],
                    preferred_element_type=jnp.float32)
            + b1_ref[k])
        # fused scale/shift head: one MXU push, slice the 2*D_HALF output
        st = (jnp.dot(h.astype(wdt), wst_ref[k],
                      preferred_element_type=jnp.float32)
              + bst_ref[k])
        s = jnp.tanh(st[:, :D_HALF])          # bounded log-scale
        t = st[:, D_HALF:]

        new = trans * jnp.exp(s) + t
        logdet = logdet + jnp.sum(s, axis=-1, keepdims=True)

        if k % 2 == 0:
            zb = new
        else:
            za = new

    sq = (jnp.sum(za * za, axis=-1, keepdims=True)
          + jnp.sum(zb * zb, axis=-1, keepdims=True))
    logp = -0.5 * sq - 0.5 * D * _LOG_2PI + logdet          # (TB, 1)
    # present a lane-dense (1, TB) row for an unmasked full-lane store
    out_ref[...] = logp.reshape(1, tb)


def _pick_tb(B):
    """Big batch tile (amortize ~0.35us/grid-step), keep >=2 steps if possible."""
    if B % 256 == 0 and B // 256 >= 2:
        return 256
    if B % 128 == 0 and B // 128 >= 2:
        return 128
    return B  # single full-batch tile (full-dim block is always legal)


def _pack_params(params, use_bf16):
    """Fuse scale/shift heads; optionally store matmul weights as bf16."""
    w1, b1, ws, bs, wt, bt = params
    wst = jnp.concatenate([ws, wt], axis=-1)   # (K, H, 2*D_HALF)
    bst = jnp.concatenate([bs, bt], axis=-1)   # (K, 1, 2*D_HALF)
    wdt = jnp.bfloat16 if use_bf16 else jnp.float32
    return (w1.astype(wdt), b1.astype(jnp.float32),
            wst.astype(wdt), bst.astype(jnp.float32))


def flow_log_prob(x, params, use_bf16=False):
    """FlowWrapper.forward: returns flow.log_prob(x), shape (batch,).

    use_bf16=True stores coupling-net weights (and casts activations) to bf16
    for the MXU (free slot relief on v6e/v7x); keep False on v5e or when
    1e-4-level agreement with the f32 reference is required.
    """
    B = x.shape[0]
    assert x.shape == (B, D)
    TB = _pick_tb(B)
    assert B % TB == 0

    w1, b1, wst, bst = _pack_params(params, use_bf16)

    full3 = lambda i: (0, 0, 0)  # weights: same full block for every grid step

    bytes_per = 4 if not use_bf16 else 2
    cost = pl.CostEstimate(
        flops=2 * B * K * (D_HALF * H + H * 2 * D_HALF),
        transcendentals=B * K * (H + 2 * D_HALF),
        bytes_accessed=(x.size * 4 + B * 4
                        + (w1.size + wst.size) * bytes_per
                        + (b1.size + bst.size) * 4),
    )

    out = pl.pallas_call(
        _flow_logprob_kernel,
        out_shape=jax.ShapeDtypeStruct((1, B), jnp.float32),
        grid_spec=pltpu.PrefetchScalarGridSpec(
            num_scalar_prefetch=0,
            grid=(B // TB,),
            in_specs=[
                pl.BlockSpec((TB, D), lambda i: (i, 0)),           # x tile
                pl.BlockSpec((K, D_HALF, H), full3),               # w1
                pl.BlockSpec((K, 1, H), full3),                    # b1
                pl.BlockSpec((K, H, 2 * D_HALF), full3),           # wst (fused)
                pl.BlockSpec((K, 1, 2 * D_HALF), full3),           # bst (fused)
            ],
            out_specs=pl.BlockSpec((1, TB), lambda i: (0, i)),     # lane-dense
        ),
        compiler_params=pltpu.CompilerParams(
            dimension_semantics=("parallel",)),
        cost_estimate=cost,
    )(x, w1, b1, wst, bst)
    return out.reshape(B)


def flow_log_prob_ref(x, params):
    """Pure-JAX f32 reference for correctness checking."""
    w1, b1, ws, bs, wt, bt = params
    za, zb = x[:, :D_HALF], x[:, D_HALF:]
    logdet = jnp.zeros((x.shape[0],), jnp.float32)
    for k in range(K):
        cond, trans = (za, zb) if k % 2 == 0 else (zb, za)
        h = jnp.tanh(cond @ w1[k] + b1[k])
        s = jnp.tanh(h @ ws[k] + bs[k])
        t = h @ wt[k] + bt[k]
        new = trans * jnp.exp(s) + t
        logdet = logdet + jnp.sum(s, axis=-1)
        if k % 2 == 0:
            zb = new
        else:
            za = new
    sq = jnp.sum(za * za, axis=-1) + jnp.sum(zb * zb, axis=-1)
    return -0.5 * sq - 0.5 * D * _LOG_2PI + logdet


def init_flow_params(key):
    """Deterministic synthetic flow parameters."""
    ks = jax.random.split(key, 6)
    scale = 0.2
    w1 = scale * jax.random.normal(ks[0], (K, D_HALF, H), jnp.float32)
    b1 = scale * jax.random.normal(ks[1], (K, 1, H), jnp.float32)
    ws = scale * jax.random.normal(ks[2], (K, H, D_HALF), jnp.float32)
    bs = scale * jax.random.normal(ks[3], (K, 1, D_HALF), jnp.float32)
    wt = scale * jax.random.normal(ks[4], (K, H, D_HALF), jnp.float32)
    bt = scale * jax.random.normal(ks[5], (K, 1, D_HALF), jnp.float32)
    return (w1, b1, ws, bs, wt, bt)


if __name__ == "__main__":
    key = jax.random.PRNGKey(0)
    k_param, k_x = jax.random.split(key)
    params = init_flow_params(k_param)

    # primary case: B=512 -> TB=256, grid=(2,) exercises the pipelined tiling
    # and keeps >=2 parallel grid steps for v7x's two TensorCores.
    B = 512
    x = jax.random.normal(k_x, (B, D), jnp.float32)
    logp = jax.block_until_ready(flow_log_prob(x, params))
    logp_ref = jax.block_until_ready(flow_log_prob_ref(x, params))
    assert logp.shape == (B,)
    assert jnp.allclose(logp, logp_ref, atol=1e-3, rtol=1e-4), (
        "mismatch vs reference (B=512)")

    # small-batch case: single full-block tile (TB == B == 16).
    Bs = 16
    xs = jax.random.normal(jax.random.PRNGKey(1), (Bs, D), jnp.float32)
    logp_s = jax.block_until_ready(flow_log_prob(xs, params))
    logp_s_ref = jax.block_until_ready(flow_log_prob_ref(xs, params))
    assert logp_s.shape == (Bs,)
    assert jnp.allclose(logp_s, logp_s_ref, atol=1e-3, rtol=1e-4), (
        "mismatch vs reference (B=16)")

    print("KERNEL_OK")
</pallas_src>

<mosaic_0001>
module attributes {stable_mosaic.version = 11 : i64} {
  func.func @_flow_logprob_kernel(%arg0: i32, %arg1: memref<256x32xf32, #tpu.memory_space<vmem>>, %arg2: memref<2x16x64xf32, #tpu.memory_space<vmem>>, %arg3: memref<2x1x64xf32, #tpu.memory_space<vmem>>, %arg4: memref<2x64x32xf32, #tpu.memory_space<vmem>>, %arg5: memref<2x1x32xf32, #tpu.memory_space<vmem>>, %arg6: memref<1x256xf32, #tpu.memory_space<vmem>>) attributes {dimension_semantics = [#tpu.dimension_semantics<parallel>], iteration_bounds = array<i64: 2>, scalar_prefetch = 0 : i64, scratch_operands = 0 : i64, tpu.core_type = #tpu.core_type<tc>, window_params = [{transform_indices = @transform_0, window_bounds = array<i64: 256, 32>}, {pipeline_mode = #tpu.pipeline_mode<synchronous>, transform_indices = @transform_1, window_bounds = array<i64: 2, 16, 64>}, {pipeline_mode = #tpu.pipeline_mode<synchronous>, transform_indices = @transform_2, window_bounds = array<i64: 2, 1, 64>}, {pipeline_mode = #tpu.pipeline_mode<synchronous>, transform_indices = @transform_3, window_bounds = array<i64: 2, 64, 32>}, {pipeline_mode = #tpu.pipeline_mode<synchronous>, transform_indices = @transform_4, window_bounds = array<i64: 2, 1, 32>}, {transform_indices = @transform_5, window_bounds = array<i64: 1, 256>}]} {
    %c0 = arith.constant 0 : index
    %c0_0 = arith.constant 0 : index
    %0 = vector.load %arg1[%c0, %c0_0] : memref<256x32xf32, #tpu.memory_space<vmem>>, vector<256x32xf32>
    %1 = vector.extract_strided_slice %0 {offsets = [0, 0], sizes = [256, 16], strides = [1, 1]} : vector<256x32xf32> to vector<256x16xf32>
    %2 = vector.extract_strided_slice %0 {offsets = [0, 16], sizes = [256, 16], strides = [1, 1]} : vector<256x32xf32> to vector<256x16xf32>
    %cst = arith.constant 0.000000e+00 : f32
    %3 = vector.broadcast %cst : f32 to vector<256x1xf32>
    %c0_1 = arith.constant 0 : index
    %c0_2 = arith.constant 0 : index
    %c0_3 = arith.constant 0 : index
    %4 = vector.load %arg2[%c0_1, %c0_2, %c0_3] : memref<2x16x64xf32, #tpu.memory_space<vmem>>, vector<1x16x64xf32>
    %5 = vector.shape_cast %4 : vector<1x16x64xf32> to vector<16x64xf32>
    %cst_4 = arith.constant dense<0.000000e+00> : vector<256x64xf32>
    %6 = tpu.matmul %1, %5, %cst_4 {dimension_numbers = #tpu.dot_dimension_numbers<[1], [0], [0], [1], [0, 0, 1, 1], [], []>} : vector<256x16xf32>, vector<16x64xf32>, vector<256x64xf32> -> vector<256x64xf32>
    %c0_5 = arith.constant 0 : index
    %c0_6 = arith.constant 0 : index
    %c0_7 = arith.constant 0 : index
    %7 = vector.load %arg3[%c0_5, %c0_6, %c0_7] : memref<2x1x64xf32, #tpu.memory_space<vmem>>, vector<1x1x64xf32>
    %8 = vector.shape_cast %7 : vector<1x1x64xf32> to vector<1x64xf32>
    %9 = vector.broadcast %8 : vector<1x64xf32> to vector<256x64xf32>
    %10 = arith.addf %6, %9 : vector<256x64xf32>
    %11 = math.tanh %10 : vector<256x64xf32>
    %c0_8 = arith.constant 0 : index
    %c0_9 = arith.constant 0 : index
    %c0_10 = arith.constant 0 : index
    %12 = vector.load %arg4[%c0_8, %c0_9, %c0_10] : memref<2x64x32xf32, #tpu.memory_space<vmem>>, vector<1x64x32xf32>
    %13 = vector.shape_cast %12 : vector<1x64x32xf32> to vector<64x32xf32>
    %cst_11 = arith.constant dense<0.000000e+00> : vector<256x32xf32>
    %14 = tpu.matmul %11, %13, %cst_11 {dimension_numbers = #tpu.dot_dimension_numbers<[1], [0], [0], [1], [0, 0, 1, 1], [], []>} : vector<256x64xf32>, vector<64x32xf32>, vector<256x32xf32> -> vector<256x32xf32>
    %c0_12 = arith.constant 0 : index
    %c0_13 = arith.constant 0 : index
    %c0_14 = arith.constant 0 : index
    %15 = vector.load %arg5[%c0_12, %c0_13, %c0_14] : memref<2x1x32xf32, #tpu.memory_space<vmem>>, vector<1x1x32xf32>
    %16 = vector.shape_cast %15 : vector<1x1x32xf32> to vector<1x32xf32>
    %17 = vector.broadcast %16 : vector<1x32xf32> to vector<256x32xf32>
    %18 = arith.addf %14, %17 : vector<256x32xf32>
    %19 = vector.extract_strided_slice %18 {offsets = [0, 0], sizes = [256, 16], strides = [1, 1]} : vector<256x32xf32> to vector<256x16xf32>
    %20 = math.tanh %19 : vector<256x16xf32>
    %21 = vector.extract_strided_slice %18 {offsets = [0, 16], sizes = [256, 16], strides = [1, 1]} : vector<256x32xf32> to vector<256x16xf32>
    %22 = math.exp %20 : vector<256x16xf32>
    %23 = arith.mulf %2, %22 : vector<256x16xf32>
    %24 = arith.addf %23, %21 : vector<256x16xf32>
    %cst_15 = arith.constant dense<0.000000e+00> : vector<256xf32>
    %25 = vector.multi_reduction <add>, %20, %cst_15 [1] : vector<256x16xf32> to vector<256xf32>
    %26 = vector.shape_cast %25 : vector<256xf32> to vector<256x1xf32>
    %27 = arith.addf %3, %26 : vector<256x1xf32>
    %c1 = arith.constant 1 : index
    %c0_16 = arith.constant 0 : index
    %c0_17 = arith.constant 0 : index
    %28 = vector.load %arg2[%c1, %c0_16, %c0_17] : memref<2x16x64xf32, #tpu.memory_space<vmem>>, vector<1x16x64xf32>
    %29 = vector.shape_cast %28 : vector<1x16x64xf32> to vector<16x64xf32>
    %cst_18 = arith.constant dense<0.000000e+00> : vector<256x64xf32>
    %30 = tpu.matmul %24, %29, %cst_18 {dimension_numbers = #tpu.dot_dimension_numbers<[1], [0], [0], [1], [0, 0, 1, 1], [], []>} : vector<256x16xf32>, vector<16x64xf32>, vector<256x64xf32> -> vector<256x64xf32>
    %c1_19 = arith.constant 1 : index
    %c0_20 = arith.constant 0 : index
    %c0_21 = arith.constant 0 : index
    %31 = vector.load %arg3[%c1_19, %c0_20, %c0_21] : memref<2x1x64xf32, #tpu.memory_space<vmem>>, vector<1x1x64xf32>
    %32 = vector.shape_cast %31 : vector<1x1x64xf32> to vector<1x64xf32>
    %33 = vector.broadcast %32 : vector<1x64xf32> to vector<256x64xf32>
    %34 = arith.addf %30, %33 : vector<256x64xf32>
    %35 = math.tanh %34 : vector<256x64xf32>
    %c1_22 = arith.constant 1 : index
    %c0_23 = arith.constant 0 : index
    %c0_24 = arith.constant 0 : index
    %36 = vector.load %arg4[%c1_22, %c0_23, %c0_24] : memref<2x64x32xf32, #tpu.memory_space<vmem>>, vector<1x64x32xf32>
    %37 = vector.shape_cast %36 : vector<1x64x32xf32> to vector<64x32xf32>
    %cst_25 = arith.constant dense<0.000000e+00> : vector<256x32xf32>
    %38 = tpu.matmul %35, %37, %cst_25 {dimension_numbers = #tpu.dot_dimension_numbers<[1], [0], [0], [1], [0, 0, 1, 1], [], []>} : vector<256x64xf32>, vector<64x32xf32>, vector<256x32xf32> -> vector<256x32xf32>
    %c1_26 = arith.constant 1 : index
    %c0_27 = arith.constant 0 : index
    %c0_28 = arith.constant 0 : index
    %39 = vector.load %arg5[%c1_26, %c0_27, %c0_28] : memref<2x1x32xf32, #tpu.memory_space<vmem>>, vector<1x1x32xf32>
    %40 = vector.shape_cast %39 : vector<1x1x32xf32> to vector<1x32xf32>
    %41 = vector.broadcast %40 : vector<1x32xf32> to vector<256x32xf32>
    %42 = arith.addf %38, %41 : vector<256x32xf32>
    %43 = vector.extract_strided_slice %42 {offsets = [0, 0], sizes = [256, 16], strides = [1, 1]} : vector<256x32xf32> to vector<256x16xf32>
    %44 = math.tanh %43 : vector<256x16xf32>
    %45 = vector.extract_strided_slice %42 {offsets = [0, 16], sizes = [256, 16], strides = [1, 1]} : vector<256x32xf32> to vector<256x16xf32>
    %46 = math.exp %44 : vector<256x16xf32>
    %47 = arith.mulf %1, %46 : vector<256x16xf32>
    %48 = arith.addf %47, %45 : vector<256x16xf32>
    %cst_29 = arith.constant dense<0.000000e+00> : vector<256xf32>
    %49 = vector.multi_reduction <add>, %44, %cst_29 [1] : vector<256x16xf32> to vector<256xf32>
    %50 = vector.shape_cast %49 : vector<256xf32> to vector<256x1xf32>
    %51 = arith.addf %27, %50 : vector<256x1xf32>
    %52 = arith.mulf %48, %48 : vector<256x16xf32>
    %cst_30 = arith.constant dense<0.000000e+00> : vector<256xf32>
    %53 = vector.multi_reduction <add>, %52, %cst_30 [1] : vector<256x16xf32> to vector<256xf32>
    %54 = vector.shape_cast %53 : vector<256xf32> to vector<256x1xf32>
    %55 = arith.mulf %24, %24 : vector<256x16xf32>
    %cst_31 = arith.constant dense<0.000000e+00> : vector<256xf32>
    %56 = vector.multi_reduction <add>, %55, %cst_31 [1] : vector<256x16xf32> to vector<256xf32>
    %57 = vector.shape_cast %56 : vector<256xf32> to vector<256x1xf32>
    %58 = arith.addf %54, %57 : vector<256x1xf32>
    %cst_32 = arith.constant -5.000000e-01 : f32
    %59 = vector.broadcast %cst_32 : f32 to vector<256x1xf32>
    %60 = arith.mulf %59, %58 : vector<256x1xf32>
    %cst_33 = arith.constant 29.4060326 : f32
    %61 = vector.broadcast %cst_33 : f32 to vector<256x1xf32>
    %62 = arith.subf %60, %61 : vector<256x1xf32>
    %63 = arith.addf %62, %51 : vector<256x1xf32>
    %64 = vector.shape_cast %63 : vector<256x1xf32> to vector<1x256xf32>
    %c0_34 = arith.constant 0 : index
    %c0_35 = arith.constant 0 : index
    %65 = vector.load %arg6[%c0_34, %c0_35] : memref<1x256xf32, #tpu.memory_space<vmem>>, vector<1x256xf32>
    tpu.vector_store %arg6[%c0_34, %c0_35], %64 {strides = array<i32>} : memref<1x256xf32, #tpu.memory_space<vmem>>, vector<1x256xf32>,
    return
  }
  func.func @transform_0(%arg0: i32) -> (i32, i32) {
    %c0_i32 = arith.constant 0 : i32
    %c0_i32_0 = arith.constant 0 : i32
    return %arg0, %c0_i32 : i32, i32
  }
  func.func @transform_1(%arg0: i32) -> (i32, i32, i32) {
    %c0_i32 = arith.constant 0 : i32
    %c0_i32_0 = arith.constant 0 : i32
    %c0_i32_1 = arith.constant 0 : i32
    %c0_i32_2 = arith.constant 0 : i32
    return %c0_i32, %c0_i32_0, %c0_i32_1 : i32, i32, i32
  }
  func.func @transform_2(%arg0: i32) -> (i32, i32, i32) {
    %c0_i32 = arith.constant 0 : i32
    %c0_i32_0 = arith.constant 0 : i32
    %c0_i32_1 = arith.constant 0 : i32
    %c0_i32_2 = arith.constant 0 : i32
    return %c0_i32, %c0_i32_0, %c0_i32_1 : i32, i32, i32
  }
  func.func @transform_3(%arg0: i32) -> (i32, i32, i32) {
    %c0_i32 = arith.constant 0 : i32
    %c0_i32_0 = arith.constant 0 : i32
    %c0_i32_1 = arith.constant 0 : i32
    %c0_i32_2 = arith.constant 0 : i32
    return %c0_i32, %c0_i32_0, %c0_i32_1 : i32, i32, i32
  }
  func.func @transform_4(%arg0: i32) -> (i32, i32, i32) {
    %c0_i32 = arith.constant 0 : i32
    %c0_i32_0 = arith.constant 0 : i32
    %c0_i32_1 = arith.constant 0 : i32
    %c0_i32_2 = arith.constant 0 : i32
    return %c0_i32, %c0_i32_0, %c0_i32_1 : i32, i32, i32
  }
  func.func @transform_5(%arg0: i32) -> (i32, i32) {
    %c0_i32 = arith.constant 0 : i32
    %c0_i32_0 = arith.constant 0 : i32
    return %c0_i32, %arg0 : i32, i32
  }
}

</mosaic_0001>

<bundles_post_ra>
// kernel: tpu_custom_call.1
= control target key start
LH: loop header
LB: loop body
LE: loop exit
PB: predicated region body
PF: predicated region fallthrough
CT: control target
= control target key end

     0   :  { %10 = vsyncpa [#allocation3], 0  ;;  %s9725_s0 = inlined_call_operand.vmem [shape: f32[512,32], index: 0, kind: input, shape index: {}]   ;;  %s9726_s1 = inlined_call_operand.vmem [shape: f32[2,16,64], index: 1, kind: input, shape index: {}]   ;;  %s9727_s2 = inlined_call_operand.vmem [shape: f32[2,1,64], index: 2, kind: input, shape index: {}]   ;;  %s9728_s3 = inlined_call_operand.vmem [shape: f32[2,64,32], index: 3, kind: input, shape index: {}]   ;;  %s9729_s4 = inlined_call_operand.vmem [shape: f32[2,1,32], index: 4, kind: input, shape index: {}]   ;;  %s9730_s5 = inlined_call_operand.hbm [shape: f32[1,512], index: 5, kind: output, shape index: {}]  }
   0x1   :  { %12 = vsyncpa [#allocation3 + $0x1], 0  ;;  %s7282_s18 = smov 0   ;;  %s7284_s19 = smov 0  }
   0x2   :  { %s7286_s20 = smov 0   ;;  %s7288_s21 = smov 0  }
   0x3 LB: > { %s6072_s22 = sadd.s32 4294967295, %s7245_s21   ;;  %s6073_s23 = sadd.s32 4294967294, %s7245_s21   ;;  %s7245_s21 = sphi %s7288_s21, %s9884_s21   ;;  %s7241_s20 = sphi %s7286_s20, %s9883_s20   ;;  %s7237_s19 = sphi %s7284_s19, %s9882_s19   ;;  %s7233_s18 = sphi %s7282_s18, %s9881_s18  }
   0x4   : > { %s7305_s24 = sadd.s32 1, %s7245_s21   ;;  %s135_s25 = sadd.s32 1, %s7241_s20 }
   0x5   : > { %s132_s26 = ssub.s32 %s7245_s21, %s7305_s24  ;;  %p145_p0 = scmp.ne.s32.totalorder %s7241_s20, %s7237_s19 }
   0x6   : > { %p133_p1 = scmp.eq.s32.totalorder %s132_s26, 0  ;;  %p146_p2 = scmp.eq.s32.totalorder %s6072_s22, 1 }
   0x7   : > { %p151_p3 = scmp.ne.s32.totalorder %s7237_s19, %s7233_s18  ;;  %p152_p4 = scmp.eq.s32.totalorder %s6073_s23, 1 }
   0x8   : > { %s7315_s27 = scalar_select %p133_p1, %s7241_s20, %s135_s25  }
   0x9   : > { %p7317_p5 = por %p146_p2, %p145_p0  ;;  %p7321_p6 = por %p152_p4, %p151_p3 }
   0xa   : > { %p6076_p7 = scmp.ge.s32.totalorder %s7245_s21, 1  ;;  %p191_p8 = scmp.lt.s32.totalorder %s7245_s21, 3 }
   0xc   : > { %p192_p9 = pnand %p6076_p7, %p191_p8 }
   0xe   : > { %195 = sbr.rel (%p192_p9) target bundleno = 2910 (0xb5e), region = 40 }
  0x15   : > { %v258_v0 = vld [vmem:[%s9726_s1] sm:$0xff]  ;;  %v259_v1 = vld [vmem:[%s9726_s1 + $0x8] sm:$0xff]  ;;  %s7333_s9 = sshll.u32 %s6072_s22, 5  ;;  %v623_v5 = vld [vmem:[%s9728_s3 + $0x10] sm:$0xff]  ;;  %vm267_vm0 = vcmask 130048   ;;  %vm636_vm1 = vcmask 523264  }
  0x16   : > { %v621_v2 = vld [vmem:[%s9728_s3] sm:$0xff]  ;;  %v6642_v3 = vpack.c.bf16 %v259_v1, %v258_v0  ;;  %p220_p10 = scmp.lt.s32.totalorder %s7333_s9, 63  ;;  %v622_v4 = vld [vmem:[%s9728_s3 + $0x8] sm:$0xff]  ;;  %v624_v6 = vld [vmem:[%s9728_s3 + $0x18] sm:$0xff]  ;;  %s7248_s8 = smov 112   ;;  %vm5799_vm2 = vcmask 130112  }
  0x17   : > { %v6646_v7 = vpack.c.bf16 %v622_v4, %v621_v2  ;;  %v6650_v8 = vpack.c.bf16 %v624_v6, %v623_v5  ;;  %v625_v9 = vld [vmem:[%s9728_s3 + $0x20] sm:$0xff]  ;;  %v626_v10 = vld [vmem:[%s9728_s3 + $0x28] sm:$0xff]  ;;  %v627_v40 = vld [vmem:[%s9728_s3 + $0x30] sm:$0xff]  ;;  %vm5806_vm3 = vcmask 195712   ;;  %vm5813_vm4 = vcmask 261312   ;;  %s9681_s25 = scalar_lea.hbm %s9730_s5, %s7333_s9  ;;  %s7251_s7 = smov [#allocation2]  }
  0x18   : > { %6643 = vmatprep.subr.bf16.mxu0 %v6642_v3  ;;  %s221_s22 = scalar_select %p220_p10, %s7333_s9, 63  ;;  %v6654_v14 = vpack.c.bf16 %v626_v10, %v625_v9  ;;  %v628_v41 = vld [vmem:[%s9728_s3 + $0x38] sm:$0xff]  ;;  %v7433_v47 = vld [vmem:[%s9727_s2] ss:$0 sm:$0xff]  ;;  %vm5820_vm5 = vcmask 326912   ;;  %vm5827_vm6 = vcmask 392512  }
  0x19   : > { %6645 = vmatpush3.bf16.msra.mxu0 %v6642_v3  ;;  %6682 = vmatprep.subr.bf16.mxu1 %v6646_v7  ;;  %v6658_v42 = vpack.c.bf16 %v628_v41, %v627_v40  ;;  %vm5834_vm7 = vcmask 458112   ;;  %vm5841_vm8 = vcmask 523712   ;;  %vm5848_vm9 = vcmask 589312   ;;  %s7187_s10 = sshll.u32 %s7251_s7, 4  ;;  %s7188_s10 = int_to_ptr.vmem [resolvable:$false] %s7187_s10 }
  0x1a   : > { %s6079_s23 = sshll.u32 %s221_s22, 3  ;;  %6647 = vmatprep.subr.bf16.mxu0 %v6646_v7  ;;  %6686 = vmatpush3.bf16.msra.mxu1 %v6646_v7  ;;  %vm5855_vm10 = vcmask 654912   ;;  %vm5862_vm11 = vcmask 720512   ;;  %vm5869_vm12 = vcmask 786112   ;;  %vm5876_vm13 = vcmask 851712   ;;  %s7189_s11 = scalar_lea.vmem %s7188_s10, 64 }
  0x1b   : > { %s7352_s30 = scalar_lea.vmem %s9725_s0, %s6079_s23  ;;  %6683 = vmatprep.subr.bf16.mxu1 %v6650_v8  ;;  %s7247_s23 = smov 16   ;;  %vm5883_vm14 = vcmask 917312   ;;  %vm5890_vm15 = vcmask 982912  }
  0x1c   : > { %v226_v11 = vld [vmem:[%s7352_s30] sm:$0xff]  ;;  %v227_v12 = vld [vmem:[%s7352_s30 + $0x8] sm:$0xff]  ;;  %v228_v13 = vld [vmem:[%s7352_s30 + $0x10] sm:$0xff] }
  0x1d   : > { %6414 = vmatprep.mubr.msk.f32.mxu0 %vm267_vm0, %v226_v11  ;;  %v229_v15 = vld [vmem:[%s7352_s30 + $0x18] sm:$0xff]  ;;  %v230_v16 = vld [vmem:[%s7352_s30 + $0x20] sm:$0xff]  ;;  %v231_v17 = vld [vmem:[%s7352_s30 + $0x28] sm:$0xff] }
  0x1e   : > { %6415 = vmatmul.mubr.msk.f32.vlgmr.msra.gmra.mrb[0].mxu0 %vm267_vm0, %v227_v12  ;;  %6687 = vmatpush3.bf16.msra.mxu1 %v6650_v8  ;;  %v232_v18 = vld [vmem:[%s7352_s30 + $0x30] sm:$0xff]  ;;  %v233_v19 = vld [vmem:[%s7352_s30 + $0x38] sm:$0xff]  ;;  %v234_v20 = vld [vmem:[%s7352_s30 + $0x40] sm:$0xff] }
  0x1f   : > { %6417 = vmatprep.mubr.msk.f32.mxu0 %vm267_vm0, %v228_v13  ;;  %6649 = vmatpush3.bf16.msra.mxu0 %v6646_v7  ;;  %v235_v21 = vld [vmem:[%s7352_s30 + $0x48] sm:$0xff]  ;;  %v236_v22 = vld [vmem:[%s7352_s30 + $0x50] sm:$0xff]  ;;  %v237_v23 = vld [vmem:[%s7352_s30 + $0x58] sm:$0xff] }
  0x20   : > { %6651 = vmatprep.subr.bf16.mxu0 %v6650_v8  ;;  %6684 = vmatprep.subr.bf16.mxu1 %v6654_v14  ;;  %v238_v24 = vld [vmem:[%s7352_s30 + $0x60] sm:$0xff]  ;;  %v239_v25 = vld [vmem:[%s7352_s30 + $0x68] sm:$0xff]  ;;  %v240_v26 = vld [vmem:[%s7352_s30 + $0x70] sm:$0xff] }
  0x21   : > { %v241_v27 = vld [vmem:[%s7352_s30 + $0x78] sm:$0xff]  ;;  %v242_v28 = vld [vmem:[%s7352_s30 + $0x80] sm:$0xff]  ;;  %v243_v29 = vld [vmem:[%s7352_s30 + $0x88] sm:$0xff] }
  0x22   : > { %6418 = vmatmul.mubr.msk.f32.gmra.mrb[2].mxu0 %vm267_vm0, %v229_v15  ;;  %6688 = vmatpush3.bf16.msra.mxu1 %v6654_v14  ;;  %v244_v30 = vld [vmem:[%s7352_s30 + $0x90] sm:$0xff]  ;;  %v245_v31 = vld [vmem:[%s7352_s30 + $0x98] sm:$0xff]  ;;  %v246_v32 = vld [vmem:[%s7352_s30 + $0xa0] sm:$0xff] }
  0x23   : > { %6420 = vmatprep.mubr.msk.f32.mxu0 %vm267_vm0, %v230_v16  ;;  %6653 = vmatpush3.bf16.msra.mxu0 %v6650_v8  ;;  %v247_v33 = vld [vmem:[%s7352_s30 + $0xa8] sm:$0xff]  ;;  %v248_v34 = vld [vmem:[%s7352_s30 + $0xb0] sm:$0xff]  ;;  %v249_v35 = vld [vmem:[%s7352_s30 + $0xb8] sm:$0xff] }
  0x24   : > { %6655 = vmatprep.subr.bf16.mxu0 %v6654_v14  ;;  %v250_v36 = vld [vmem:[%s7352_s30 + $0xc0] sm:$0xff]  ;;  %v251_v37 = vld [vmem:[%s7352_s30 + $0xc8] sm:$0xff]  ;;  %v252_v38 = vld [vmem:[%s7352_s30 + $0xd0] sm:$0xff]  ;;  %6685 = vmatprep.subr.bf16.mxu1 %v6658_v42 }
  0x25   : > { %v253_v39 = vld [vmem:[%s7352_s30 + $0xd8] sm:$0xff]  ;;  %v254_v43 = vld [vmem:[%s7352_s30 + $0xe0] sm:$0xff]  ;;  %v255_v44 = vld [vmem:[%s7352_s30 + $0xe8] sm:$0xff] }
  0x26   : > { %6421 = vmatmul.mubr.msk.f32.gmra.mrb[4].mxu0 %vm267_vm0, %v231_v17  ;;  %6689 = vmatpush3.bf16.msra.mxu1 %v6658_v42  ;;  %v256_v45 = vld [vmem:[%s7352_s30 + $0xf0] sm:$0xff]  ;;  %v257_v46 = vld [vmem:[%s7352_s30 + $0xf8] sm:$0xff] }
  0x27   : > { %6423 = vmatprep.mubr.msk.f32.mxu0 %vm267_vm0, %v232_v18  ;;  %6657 = vmatpush3.bf16.msra.mxu0 %v6654_v14 }
  0x28   : > { %6659 = vmatprep.subr.bf16.mxu0 %v6658_v42 }
  0x2a   : > { %6424 = vmatmul.mubr.msk.f32.gmra.mrb[6].mxu0 %vm267_vm0, %v233_v19 }
  0x2b   : > { %6426 = vmatprep.mubr.msk.f32.mxu0 %vm267_vm0, %v234_v20  ;;  %6661 = vmatpush3.bf16.msra.mxu0 %v6658_v42 }
  0x2e   : > { %6427 = vmatmul.mubr.msk.f32.gmra.mrb[8].mxu0 %vm267_vm0, %v235_v21 }
  0x2f   : > { %6429 = vmatprep.mubr.msk.f32.mxu0 %vm267_vm0, %v236_v22 }
  0x32   : > { %6430 = vmatmul.mubr.msk.f32.gmra.mrb[10].mxu0 %vm267_vm0, %v237_v23 }
  0x33   : > { %6432 = vmatprep.mubr.msk.f32.mxu0 %vm267_vm0, %v238_v24 }
  0x36   : > { %6433 = vmatmul.mubr.msk.f32.gmra.mrb[12].mxu0 %vm267_vm0, %v239_v25 }
  0x37   : > { %6435 = vmatprep.mubr.msk.f32.mxu0 %vm267_vm0, %v240_v26 }
  0x3a   : > { %6436 = vmatmul.mubr.msk.f32.gmra.mrb[14].mxu0 %vm267_vm0, %v241_v27 }
  0x3b   : > { %6438 = vmatprep.mubr.msk.f32.mxu0 %vm267_vm0, %v242_v28 }
  0x3e   : > { %6439 = vmatmul.mubr.msk.f32.gmra.mrb[16].mxu0 %vm267_vm0, %v243_v29 }
  0x3f   : > { %6441 = vmatprep.mubr.msk.f32.mxu0 %vm267_vm0, %v244_v30 }
  0x42   : > { %6442 = vmatmul.mubr.msk.f32.gmra.mrb[18].mxu0 %vm267_vm0, %v245_v31 }
  0x43   : > { %6444 = vmatprep.mubr.msk.f32.mxu0 %vm267_vm0, %v246_v32 }
  0x46   : > { %6445 = vmatmul.mubr.msk.f32.gmra.mrb[20].mxu0 %vm267_vm0, %v247_v33 }
  0x47   : > { %6447 = vmatprep.mubr.msk.f32.mxu0 %vm267_vm0, %v248_v34 }
  0x4a   : > { %6448 = vmatmul.mubr.msk.f32.gmra.mrb[22].mxu0 %vm267_vm0, %v249_v35 }
  0x4b   : > { %6450 = vmatprep.mubr.msk.f32.mxu0 %vm267_vm0, %v250_v36 }
  0x4e   : > { %6451 = vmatmul.mubr.msk.f32.gmra.mrb[24].mxu0 %vm267_vm0, %v251_v37 }
  0x4f   : > { %6453 = vmatprep.mubr.msk.f32.mxu0 %vm267_vm0, %v252_v38 }
  0x52   : > { %6454 = vmatmul.mubr.msk.f32.gmra.mrb[26].mxu0 %vm267_vm0, %v253_v39 }
  0x53   : > { %6456 = vmatprep.mubr.msk.f32.mxu0 %vm267_vm0, %v254_v43 }
  0x56   : > { %6457 = vmatmul.mubr.msk.f32.gmra.mrb[28].mxu0 %vm267_vm0, %v255_v44 }
  0x57   : > { %6459 = vmatprep.mubr.msk.f32.mxu0 %vm267_vm0, %v256_v45 }
  0x5a   : > { %6460 = vmatmul.mubr.msk.f32.gmra.mrb[30].mxu0 %vm267_vm0, %v257_v46 }
  0xf1   : > { %v6416_v48 = vpop.f32.mrb[0].mxu0 }
  0xf2   : > { %v436_v49 = vadd.f32 %v6416_v48, %v7433_v47  ;;  %v430_v50 = vpop.f32.mrb[1].mxu0 }
  0xf3   : > { %v431_v51 = vadd.f32 %v7433_v47, %v430_v50 }
  0xf5   : > { %6735 = vtanh.f32 %v431_v51  ;;  %v6419_v52 = vpop.f32.mrb[2].mxu0 }
  0xf6   : > { %6737 = vtanh.f32 %v436_v49  ;;  %v446_v53 = vadd.f32 %v6419_v52, %v7433_v47  ;;  %v440_v54 = vpop.f32.mrb[3].mxu0 }
  0xf7   : > { %v441_v55 = vadd.f32 %v7433_v47, %v440_v54 }
  0xf9   : > { %6739 = vtanh.f32 %v441_v55  ;;  %v6422_v56 = vpop.f32.mrb[4].mxu0 }
  0xfa   : > { %6741 = vtanh.f32 %v446_v53  ;;  %v456_v57 = vadd.f32 %v6422_v56, %v7433_v47  ;;  %v450_v58 = vpop.f32.mrb[5].mxu0 }
  0xfb   : > { %v451_v59 = vadd.f32 %v7433_v47, %v450_v58 }
  0xfd   : > { %6743 = vtanh.f32 %v451_v59  ;;  %v6425_v60 = vpop.f32.mrb[6].mxu0 }
  0xfe   : > { %6745 = vtanh.f32 %v456_v57  ;;  %v466_v61 = vadd.f32 %v6425_v60, %v7433_v47  ;;  %v460_v62 = vpop.f32.mrb[7].mxu0 }
  0xff   : > { %v6736_v63 = vpop.eup %6735  ;;  %v461_v0 = vadd.f32 %v7433_v47, %v460_v62 }
 0x100   : > { %v6738_v1 = vpop.eup %6737  ;;  %6478 = vmatprep.mubr.msk.f32.mxu0 %vm636_vm1, %v6736_v63 }
 0x101   : > { %6747 = vtanh.f32 %v461_v0  ;;  %6479 = vmatmul.mubr.msk.f32.vlgmr.msra.gmra.mrb[32].mxu0 %vm636_vm1, %v6738_v1  ;;  %v6428_v2 = vpop.f32.mrb[8].mxu0 }
 0x102   : > { %6749 = vtanh.f32 %v466_v61  ;;  %v476_v3 = vadd.f32 %v6428_v2, %v7433_v47  ;;  %v470_v4 = vpop.f32.mrb[9].mxu0 }
 0x103   : > { %v6740_v5 = vpop.eup %6739  ;;  %v471_v6 = vadd.f32 %v7433_v47, %v470_v4 }
 0x104   : > { %v6742_v7 = vpop.eup %6741  ;;  %6481 = vmatprep.mubr.msk.f32.mxu1 %vm636_vm1, %v6740_v5  ;;  %6751 = vtanh.f32 %v476_v3 }
 0x105   : > { %6482 = vmatmul.mubr.msk.f32.vlgmr.msra.gmra.mrb[0].mxu1 %vm636_vm1, %v6742_v7  ;;  %6753 = vtanh.f32 %v471_v6  ;;  %v6431_v8 = vpop.f32.mrb[10].mxu0 }
 0x106   : > { %v486_v9 = vadd.f32 %v6431_v8, %v7433_v47  ;;  %v480_v10 = vpop.f32.mrb[11].mxu0 }
 0x107   : > { %v6744_v11 = vpop.eup %6743  ;;  %v481_v12 = vadd.f32 %v7433_v47, %v480_v10 }
 0x108   : > { %v6746_v13 = vpop.eup %6745  ;;  %6484 = vmatprep.mubr.msk.f32.mxu1 %vm636_vm1, %v6744_v11  ;;  %6755 = vtanh.f32 %v486_v9 }
 0x109   : > { %6485 = vmatmul.mubr.msk.f32.gmra.mrb[2].mxu1 %vm636_vm1, %v6746_v13  ;;  %6757 = vtanh.f32 %v481_v12  ;;  %v6434_v14 = vpop.f32.mrb[12].mxu0 }
 0x10a   : > { %v496_v15 = vadd.f32 %v6434_v14, %v7433_v47  ;;  %v490_v16 = vpop.f32.mrb[13].mxu0 }
 0x10b   : > { %v6748_v17 = vpop.eup %6747  ;;  %v491_v18 = vadd.f32 %v7433_v47, %v490_v16  ;;  %v7502_v16 = vld [vmem:[%s9729_s4] ss:$0 sm:$0xff] }
 0x10c   : > { %v6750_v19 = vpop.eup %6749  ;;  %6487 = vmatprep.mubr.msk.f32.mxu1 %vm636_vm1, %v6748_v17  ;;  %6759 = vtanh.f32 %v496_v15 }
 0x10d   : > { %6488 = vmatmul.mubr.msk.f32.gmra.mrb[4].mxu1 %vm636_vm1, %v6750_v19  ;;  %6761 = vtanh.f32 %v491_v18  ;;  %v6437_v20 = vpop.f32.mrb[14].mxu0 }
 0x10e   : > { %v6752_v21 = vpop.eup %6751  ;;  %v506_v22 = vadd.f32 %v6437_v20, %v7433_v47  ;;  %v500_v23 = vpop.f32.mrb[15].mxu0 }
 0x10f   : > { %v6754_v24 = vpop.eup %6753  ;;  %v501_v25 = vadd.f32 %v7433_v47, %v500_v23 }
 0x110   : > { %6490 = vmatprep.mubr.msk.f32.mxu1 %vm636_vm1, %v6754_v24  ;;  %6763 = vtanh.f32 %v506_v22 }
 0x111   : > { %6491 = vmatmul.mubr.msk.f32.gmra.mrb[6].mxu1 %vm636_vm1, %v6752_v21  ;;  %6765 = vtanh.f32 %v501_v25  ;;  %v6440_v26 = vpop.f32.mrb[16].mxu0 }
 0x112   : > { %v6756_v27 = vpop.eup %6755  ;;  %v516_v28 = vadd.f32 %v6440_v26, %v7433_v47  ;;  %v510_v29 = vpop.f32.mrb[17].mxu0 }
 0x113   : > { %v6758_v30 = vpop.eup %6757  ;;  %v511_v31 = vadd.f32 %v7433_v47, %v510_v29 }
 0x114   : > { %6493 = vmatprep.mubr.msk.f32.mxu1 %vm636_vm1, %v6758_v30  ;;  %6767 = vtanh.f32 %v516_v28 }
 0x115   : > { %6494 = vmatmul.mubr.msk.f32.gmra.mrb[8].mxu1 %vm636_vm1, %v6756_v27  ;;  %6769 = vtanh.f32 %v511_v31  ;;  %v6443_v32 = vpop.f32.mrb[18].mxu0 }
 0x116   : > { %v6760_v33 = vpop.eup %6759  ;;  %v526_v34 = vadd.f32 %v6443_v32, %v7433_v47  ;;  %v520_v35 = vpop.f32.mrb[19].mxu0 }
 0x117   : > { %v6762_v36 = vpop.eup %6761  ;;  %v521_v37 = vadd.f32 %v7433_v47, %v520_v35 }
 0x118   : > { %6496 = vmatprep.mubr.msk.f32.mxu1 %vm636_vm1, %v6762_v36  ;;  %6771 = vtanh.f32 %v526_v34 }
 0x119   : > { %6497 = vmatmul.mubr.msk.f32.gmra.mrb[10].mxu1 %vm636_vm1, %v6760_v33  ;;  %6773 = vtanh.f32 %v521_v37  ;;  %v6446_v38 = vpop.f32.mrb[20].mxu0 }
 0x11a   : > { %v6764_v39 = vpop.eup %6763  ;;  %v536_v40 = vadd.f32 %v6446_v38, %v7433_v47  ;;  %v530_v41 = vpop.f32.mrb[21].mxu0 }
 0x11b   : > { %v6766_v42 = vpop.eup %6765  ;;  %v531_v43 = vadd.f32 %v7433_v47, %v530_v41 }
 0x11c   : > { %6775 = vtanh.f32 %v536_v40  ;;  %6499 = vmatprep.mubr.msk.f32.mxu1 %vm636_vm1, %v6766_v42 }
 0x11d   : > { %6777 = vtanh.f32 %v531_v43  ;;  %v6449_v44 = vpop.f32.mrb[22].mxu0  ;;  %6500 = vmatmul.mubr.msk.f32.gmra.mrb[12].mxu1 %vm636_vm1, %v6764_v39 }
 0x11e   : > { %v6768_v45 = vpop.eup %6767  ;;  %v546_v46 = vadd.f32 %v6449_v44, %v7433_v47  ;;  %v540_v48 = vpop.f32.mrb[23].mxu0 }
 0x11f   : > { %v6770_v49 = vpop.eup %6769  ;;  %v541_v50 = vadd.f32 %v7433_v47, %v540_v48 }
 0x120   : > { %6779 = vtanh.f32 %v546_v46  ;;  %6502 = vmatprep.mubr.msk.f32.mxu1 %vm636_vm1, %v6770_v49 }
 0x121   : > { %6781 = vtanh.f32 %v541_v50  ;;  %6503 = vmatmul.mubr.msk.f32.gmra.mrb[14].mxu1 %vm636_vm1, %v6768_v45  ;;  %v6452_v57 = vpop.f32.mrb[24].mxu0 }
 0x122   : > { %v6772_v51 = vpop.eup %6771  ;;  %v556_v58 = vadd.f32 %v6452_v57, %v7433_v47  ;;  %v550_v59 = vpop.f32.mrb[25].mxu0 }
 0x123   : > { %v6774_v52 = vpop.eup %6773  ;;  %v551_v60 = vadd.f32 %v7433_v47, %v550_v59 }
 0x124   : > { %6505 = vmatprep.mubr.msk.f32.mxu1 %vm636_vm1, %v6774_v52  ;;  %6783 = vtanh.f32 %v556_v58 }
 0x125   : > { %6506 = vmatmul.mubr.msk.f32.gmra.mrb[16].mxu1 %vm636_vm1, %v6772_v51  ;;  %6785 = vtanh.f32 %v551_v60  ;;  %v6455_v61 = vpop.f32.mrb[26].mxu0 }
 0x126   : > { %v6776_v53 = vpop.eup %6775  ;;  %v566_v62 = vadd.f32 %v6455_v61, %v7433_v47  ;;  %v560_v63 = vpop.f32.mrb[27].mxu0 }
 0x127   : > { %v6778_v54 = vpop.eup %6777  ;;  %v561_v0 = vadd.f32 %v7433_v47, %v560_v63 }
 0x128   : > { %6508 = vmatprep.mubr.msk.f32.mxu1 %vm636_vm1, %v6778_v54  ;;  %6787 = vtanh.f32 %v566_v62 }
 0x129   : > { %6509 = vmatmul.mubr.msk.f32.gmra.mrb[18].mxu1 %vm636_vm1, %v6776_v53  ;;  %6789 = vtanh.f32 %v561_v0  ;;  %v6458_v1 = vpop.f32.mrb[28].mxu0 }
 0x12a   : > { %v6780_v55 = vpop.eup %6779  ;;  %v576_v2 = vadd.f32 %v6458_v1, %v7433_v47  ;;  %v570_v3 = vpop.f32.mrb[29].mxu0 }
 0x12b   : > { %v6782_v56 = vpop.eup %6781  ;;  %v571_v4 = vadd.f32 %v7433_v47, %v570_v3 }
 0x12c   : > { %6511 = vmatprep.mubr.msk.f32.mxu1 %vm636_vm1, %v6782_v56  ;;  %6791 = vtanh.f32 %v576_v2 }
 0x12d   : > { %6512 = vmatmul.mubr.msk.f32.gmra.mrb[20].mxu1 %vm636_vm1, %v6780_v55  ;;  %6793 = vtanh.f32 %v571_v4  ;;  %v6461_v6 = vpop.f32.mrb[30].mxu0 }
 0x12e   : > { %v6784_v5 = vpop.eup %6783  ;;  %v586_v8 = vadd.f32 %v6461_v6, %v7433_v47  ;;  %v580_v9 = vpop.f32.mrb[31].mxu0 }
 0x12f   : > { %v6786_v7 = vpop.eup %6785  ;;  %v581_v10 = vadd.f32 %v7433_v47, %v580_v9 }
 0x130   : > { %6514 = vmatprep.mubr.msk.f32.mxu1 %vm636_vm1, %v6786_v7  ;;  %6795 = vtanh.f32 %v586_v8 }
 0x131   : > { %6515 = vmatmul.mubr.msk.f32.gmra.mrb[22].mxu1 %vm636_vm1, %v6784_v5  ;;  %6797 = vtanh.f32 %v581_v10 }
 0x132   : > { %v6788_v11 = vpop.eup %6787 }
 0x133   : > { %v6790_v12 = vpop.eup %6789 }
 0x134   : > { %6517 = vmatprep.mubr.msk.f32.mxu1 %vm636_vm1, %v6790_v12 }
 0x135   : > { %6518 = vmatmul.mubr.msk.f32.gmra.mrb[24].mxu1 %vm636_vm1, %v6788_v11 }
 0x136   : > { %v6792_v13 = vpop.eup %6791 }
 0x137   : > { %v6794_v14 = vpop.eup %6793 }
 0x138   : > { %6520 = vmatprep.mubr.msk.f32.mxu1 %vm636_vm1, %v6794_v14 }
 0x139   : > { %6521 = vmatmul.mubr.msk.f32.gmra.mrb[26].mxu1 %vm636_vm1, %v6792_v13 }
 0x13a   : > { %v6796_v15 = vpop.eup %6795 }
 0x13b   : > { %v6798_v47 = vpop.eup %6797 }
 0x13c   : > { %6523 = vmatprep.mubr.msk.f32.mxu1 %vm636_vm1, %v6798_v47 }
 0x13d   : > { %6524 = vmatmul.mubr.msk.f32.gmra.mrb[28].mxu1 %vm636_vm1, %v6796_v15 }
 0x1d4   : > { %v6480_v17 = vpop.f32.mrb[32].mxu0 }
 0x1d5   : > { %v7505_v18 = vadd.f32 %v6480_v17, %v7502_v16  ;;  %v799_v19 = vpop.f32.mrb[33].mxu0 }
 0x1d6   : > { %v7508_v20 = vadd.f32 %v7502_v16, %v799_v19 }
 0x1d7   : > { %6799 = vtanh.f32 %v7505_v18 }
 0x1d8   : > { %6801 = vtanh.f32 %v7508_v20  ;;  %v6483_v21 = vpop.f32.mrb[0].mxu1 }
 0x1d9   : > { %v7513_v22 = vadd.f32 %v6483_v21, %v7502_v16  ;;  %v809_v23 = vpop.f32.mrb[1].mxu1 }
 0x1da   : > { %v7516_v24 = vadd.f32 %v7502_v16, %v809_v23 }
 0x1db   : > { %6803 = vtanh.f32 %v7513_v22 }
 0x1dc   : > { %v6486_v25 = vpop.f32.mrb[2].mxu1  ;;  %6805 = vtanh.f32 %v7516_v24 }
 0x1dd   : > { %v819_v26 = vpop.f32.mrb[3].mxu1  ;;  %v7521_v27 = vadd.f32 %v6486_v25, %v7502_v16 }
 0x1de   : > { %v7524_v28 = vadd.f32 %v7502_v16, %v819_v26 }
 0x1e0   : > { %6807 = vtanh.f32 %v7524_v28  ;;  %v6489_v29 = vpop.f32.mrb[4].mxu1 }
 0x1e1   : > { %v6800_v30 = vpop.eup %6799  ;;  %v829_v31 = vpop.f32.mrb[5].mxu1  ;;  %6809 = vtanh.f32 %v7521_v27  ;;  %v7564_v60 = vadd.f32 %v6489_v29, %v7502_v16 }
 0x1e2   : > { %v7527_v32 = vpop.eup %6801  ;;  %v7531_v33 = vadd.f32 %v7502_v16, %v829_v31  ;;  %v1249_v34 = vsel %vm267_vm0, %v6800_v30, 0.0  ;;  %v992_v52 = vmul.f32 1.442695, %v6800_v30 }
 0x1e3   : > { %1250 = vadd.xlane.f32.xlu1 %v1249_v34  ;;  %v1246_v35 = vsel %vm267_vm0, %v7527_v32, 0.0  ;;  %v990_v14 = vmul.f32 1.442695, %v7527_v32 }
 0x1e4   : > { %1247 = vadd.xlane.f32.xlu0 %v1246_v35  ;;  %v7536_v36 = vpop.f32.mrb[6].mxu1  ;;  %6811 = vtanh.f32 %v7531_v33 }
 0x1e5   : > { %v6804_v37 = vpop.eup %6803  ;;  %v839_v38 = vpop.f32.mrb[7].mxu1  ;;  %v7615_v29 = vadd.f32 %v7536_v36, %v7502_v16 }
 0x1e6   : > { %v1255_v39 = vsel %vm267_vm0, %v6804_v37, 0.0  ;;  %v6806_v40 = vpop.eup %6805  ;;  %v996_v51 = vmul.f32 1.442695, %v6804_v37  ;;  %v7576_v1 = vadd.f32 %v7502_v16, %v839_v38 }
 0x1e7   : > { %v1252_v45 = vsel %vm267_vm0, %v6806_v40, 0.0  ;;  %v994_v53 = vmul.f32 1.442695, %v6806_v40 }
 0x1e8   : > { %1256 = vadd.xlane.f32.xlu0 %v1255_v39  ;;  %v7540_v41 = vpop.f32.mrb[8].mxu1  ;;  %6813 = vpow2.f32 %v996_v51 }
 0x1e9   : > { %v7542_v42 = vpop.f32.mrb[9].mxu1  ;;  %6815 = vpow2.f32 %v992_v52  ;;  %v7620_v30 = vadd.f32 %v7540_v41, %v7502_v16 }
 0x1ea   : > { %v7544_v43 = vpop.eup %6807  ;;  %6817 = vpow2.f32 %v994_v53  ;;  %v7624_v31 = vadd.f32 %v7502_v16, %v7542_v42 }
 0x1eb   : > { %v1258_v44 = vsel %vm267_vm0, %v7544_v43, 0.0  ;;  %v6810_v46 = vpop.eup %6809  ;;  %6819 = vtanh.f32 %v7564_v60  ;;  %v998_v40 = vmul.f32 1.442695, %v7544_v43 }
 0x1ec   : > { %1259 = vadd.xlane.f32.xlu1 %v1258_v44  ;;  %1253 = vadd.xlane.f32.xlu0 %v1252_v45  ;;  %v1261_v48 = vsel %vm267_vm0, %v6810_v46, 0.0  ;;  %v7554_v54 = vpop.f32.mrb[10].mxu1  ;;  %6821 = vtanh.f32 %v7576_v1  ;;  %v1000_v47 = vmul.f32 1.442695, %v6810_v46 }
 0x1ed   : > { %v7556_v55 = vpop.f32.mrb[11].mxu1  ;;  %6823 = vpow2.f32 %v990_v14  ;;  %v7636_v44 = vadd.f32 %v7554_v54, %v7502_v16 }
 0x1ee   : > { %v7550_v49 = vpop.eup %6811  ;;  %6825 = vpow2.f32 %v1000_v47  ;;  %v7640_v45 = vadd.f32 %v7502_v16, %v7556_v55 }
 0x1ef   : > { %v1264_v50 = vsel %vm267_vm0, %v7550_v49, 0.0  ;;  %6827 = vtanh.f32 %v7615_v29  ;;  %v1002_v52 = vmul.f32 1.442695, %v7550_v49 }
 0x1f0   : > { %1262 = vadd.xlane.f32.xlu0 %v1261_v48  ;;  %1265 = vadd.xlane.f32.xlu1 %v1264_v50  ;;  %v7561_v59 = vpop.f32.mrb[12].mxu1  ;;  %6829 = vtanh.f32 %v7620_v30 }
 0x1f1   : > { %v7566_v61 = vpop.f32.mrb[13].mxu1  ;;  %6831 = vtanh.f32 %v7624_v31  ;;  %v7651_v55 = vadd.f32 %v7561_v59, %v7502_v16 }
 0x1f2   : > { %v6814_v56 = vpop.eup %6813 }
 0x1f3   : > { %v6816_v57 = vpop.eup %6815 }
 0x1f4   : > { %v6818_v58 = vpop.eup %6817  ;;  %v7568_v62 = vpop.f32.mrb[14].mxu1 }
 0x1f5   : > { %v7571_v63 = vpop.f32.mrb[15].mxu1  ;;  %v6820_v7 = vpop.eup %6819  ;;  %v7666_v14 = vadd.f32 %v7568_v62, %v7502_v16 }
 0x1f6   : > { %v1267_v8 = vsel %vm267_vm0, %v6820_v7, 0.0  ;;  %v7590_v9 = vpop.eup %6821  ;;  %v1004_v39 = vmul.f32 1.442695, %v6820_v7  ;;  %v7670_v47 = vadd.f32 %v7502_v16, %v7571_v63 }
 0x1f7   : > { %v1270_v12 = vsel %vm267_vm0, %v7590_v9, 0.0  ;;  %v6824_v25 = vpop.eup %6823  ;;  %v1006_v59 = vmul.f32 1.442695, %v7590_v9 }
 0x1f8   : > { %v7573_v0 = vpop.f32.mrb[16].mxu1  ;;  %v6826_v26 = vpop.eup %6825  ;;  %6833 = vpow2.f32 %v1004_v39 }
 0x1f9   : > { %v7578_v2 = vpop.f32.mrb[17].mxu1  ;;  %v6828_v32 = vpop.eup %6827  ;;  %6835 = vpow2.f32 %v998_v40 }
 0x1fa   : > { %v1273_v34 = vsel %vm267_vm0, %v6828_v32, 0.0  ;;  %v6830_v35 = vpop.eup %6829  ;;  %6837 = vtanh.f32 %v7636_v44  ;;  %v1008_v51 = vmul.f32 1.442695, %v6828_v32 }
 0x1fb   : > { %v6832_v36 = vpop.eup %6831  ;;  %v1279_v37 = vsel %vm267_vm0, %v6830_v35, 0.0  ;;  %6839 = vtanh.f32 %v7640_v45 }
 0x1fc   : > { %v7580_v3 = vpop.f32.mrb[18].mxu1  ;;  %v1276_v38 = vsel %vm267_vm0, %v6832_v36, 0.0  ;;  %6841 = vpow2.f32 %v1008_v51 }
 0x1fd   : > { %v7582_v4 = vpop.f32.mrb[19].mxu1  ;;  %6843 = vpow2.f32 %v1002_v52 }
 0x1fe   : > { %6845 = vtanh.f32 %v7651_v55 }
 0x200   : > { %v7584_v5 = vpop.f32.mrb[20].mxu1 }
 0x201   : > { %1092 = vrot.lane.b32.xlu1 %v6814_v56, %s7247_s23  ;;  %v7587_v6 = vpop.f32.mrb[21].mxu1  ;;  %v7655_v56 = vadd.f32 %v7502_v16, %v7566_v61 }
 0x202   : > { %v6834_v41 = vpop.eup %6833 }
 0x203   : > { %v6836_v42 = vpop.eup %6835  ;;  %6847 = vtanh.f32 %v7655_v56 }
 0x204   : > { %v7592_v10 = vpop.f32.mrb[22].mxu1  ;;  %v6838_v43 = vpop.eup %6837 }
 0x205   : > { %1090 = vrot.lane.b32.xlu1 %v6818_v58, %s7247_s23  ;;  %v7594_v11 = vpop.f32.mrb[23].mxu1  ;;  %v6840_v46 = vpop.eup %6839  ;;  %v1285_v48 = vsel %vm267_vm0, %v6838_v43, 0.0 }
 0x206   : > { %1088 = vrot.lane.b32.xlu0 %v6816_v57, %s7247_s23  ;;  %v1282_v50 = vsel %vm267_vm0, %v6840_v46, 0.0  ;;  %v6842_v53 = vpop.eup %6841 }
 0x207   : > { %v6844_v54 = vpop.eup %6843 }
 0x208   : > { %v7598_v13 = vpop.f32.mrb[24].mxu1  ;;  %v6846_v49 = vpop.eup %6845 }
 0x209   : > { %v7601_v15 = vpop.f32.mrb[25].mxu1  ;;  %v1291_v58 = vsel %vm267_vm0, %v6846_v49, 0.0 }
 0x20c   : > { %v7603_v17 = vpop.f32.mrb[26].mxu1 }
 0x20d   : > { %v7605_v19 = vpop.f32.mrb[27].mxu1  ;;  %v6848_v57 = vpop.eup %6847 }
 0x20e   : > { %v1288_v7 = vsel %vm267_vm0, %v6848_v57, 0.0 }
 0x210   : > { %v7607_v21 = vpop.f32.mrb[28].mxu1 }
 0x211   : > { %v7609_v23 = vpop.f32.mrb[29].mxu1 }
 0x225   : > { %1268 = vadd.xlane.f32.xlu0 %v1267_v8  ;;  %v1012_v8 = vmul.f32 1.442695, %v6830_v35  ;;  %v1010_v35 = vmul.f32 1.442695, %v6832_v36 }
 0x227   : > { %6849 = vpow2.f32 %v1012_v8 }
 0x228   : > { %6851 = vpow2.f32 %v1006_v59 }
 0x229   : > { %1271 = vadd.xlane.f32.xlu1 %v1270_v12  ;;  %6853 = vtanh.f32 %v7666_v14 }
 0x22a   : > { %6855 = vtanh.f32 %v7670_v47 }
 0x231   : > { %v6850_v12 = vpop.eup %6849 }
 0x232   : > { %v6852_v61 = vpop.eup %6851 }
 0x233   : > { %v6854_v9 = vpop.eup %6853 }
 0x23a   : > { %1096 = vrot.lane.b32.xlu1 %v6826_v26, %s7247_s23  ;;  %v1297_v26 = vsel %vm267_vm0, %v6854_v9, 0.0 }
 0x23b   : > { %1086 = vrot.lane.b32.xlu0 %v6824_v25, %s7247_s23  ;;  %v6856_v25 = vpop.eup %6855 }
 0x23c   : > { %v1294_v32 = vsel %vm267_vm0, %v6856_v25, 0.0 }
 0x25a   : > { %1274 = vadd.xlane.f32.xlu0 %v1273_v34  ;;  %v1016_v34 = vmul.f32 1.442695, %v6838_v43  ;;  %v1014_v43 = vmul.f32 1.442695, %v6840_v46 }
 0x25c   : > { %6857 = vpow2.f32 %v1016_v34 }
 0x25d   : > { %6859 = vpow2.f32 %v1010_v35 }
 0x25e   : > { %1280 = vadd.xlane.f32.xlu0 %v1279_v37  ;;  %1277 = vadd.xlane.f32.xlu1 %v1276_v38  ;;  %v7680_v37 = vadd.f32 %v7573_v0, %v7502_v16  ;;  %v7684_v38 = vadd.f32 %v7502_v16, %v7578_v2 }
 0x260   : > { %6861 = vtanh.f32 %v7680_v37 }
 0x261   : > { %6863 = vtanh.f32 %v7684_v38 }
 0x266   : > { %v6858_v62 = vpop.eup %6857 }
 0x267   : > { %v6860_v63 = vpop.eup %6859 }
 0x26a   : > { %v6862_v36 = vpop.eup %6861 }
 0x26b   : > { %v6864_v39 = vpop.eup %6863  ;;  %v1303_v40 = vsel %vm267_vm0, %v6862_v36, 0.0 }
 0x26f   : > { %1100 = vrot.lane.b32.xlu1 %v6834_v41, %s7247_s23  ;;  %v1300_v41 = vsel %vm267_vm0, %v6864_v39, 0.0 }
 0x274   : > { %1094 = vrot.lane.b32.xlu0 %v6836_v42, %s7247_s23  ;;  %v1020_v42 = vmul.f32 1.442695, %v6846_v49  ;;  %v1018_v49 = vmul.f32 1.442695, %v6848_v57 }
 0x276   : > { %6865 = vpow2.f32 %v1020_v42 }
 0x277   : > { %6867 = vpow2.f32 %v1014_v43 }
 0x280   : > { %v6866_v0 = vpop.eup %6865 }
 0x281   : > { %v6868_v2 = vpop.eup %6867 }
 0x293   : > { %1286 = vadd.xlane.f32.xlu0 %v1285_v48  ;;  %1283 = vadd.xlane.f32.xlu1 %v1282_v50  ;;  %v7694_v48 = vadd.f32 %v7580_v3, %v7502_v16  ;;  %v7698_v50 = vadd.f32 %v7502_v16, %v7582_v4 }
 0x295   : > { %6869 = vtanh.f32 %v7694_v48 }
 0x296   : > { %6871 = vtanh.f32 %v7698_v50 }
 0x29f   : > { %v6870_v46 = vpop.eup %6869 }
 0x2a0   : > { %v6872_v51 = vpop.eup %6871  ;;  %v1309_v52 = vsel %vm267_vm0, %v6870_v46, 0.0 }
 0x2a4   : > { %1104 = vrot.lane.b32.xlu1 %v6842_v53, %s7247_s23  ;;  %v1306_v53 = vsel %vm267_vm0, %v6872_v51, 0.0 }
 0x2a9   : > { %1098 = vrot.lane.b32.xlu0 %v6844_v54, %s7247_s23  ;;  %v1024_v54 = vmul.f32 1.442695, %v6854_v9  ;;  %v1022_v9 = vmul.f32 1.442695, %v6856_v25 }
 0x2ab   : > { %6873 = vpow2.f32 %v1024_v54 }
 0x2ac   : > { %6875 = vpow2.f32 %v1018_v49 }
 0x2b5   : > { %v6874_v3 = vpop.eup %6873 }
 0x2b6   : > { %v6876_v4 = vpop.eup %6875 }
 0x2c8   : > { %1292 = vadd.xlane.f32.xlu0 %v1291_v58  ;;  %1289 = vadd.xlane.f32.xlu1 %v1288_v7  ;;  %v7708_v58 = vadd.f32 %v7584_v5, %v7502_v16  ;;  %v7712_v7 = vadd.f32 %v7502_v16, %v7587_v6 }
 0x2ca   : > { %6877 = vtanh.f32 %v7708_v58 }
 0x2cb   : > { %6879 = vtanh.f32 %v7712_v7 }
 0x2d4   : > { %v6878_v57 = vpop.eup %6877 }
 0x2d5   : > { %v6880_v8 = vpop.eup %6879  ;;  %v1315_v59 = vsel %vm267_vm0, %v6878_v57, 0.0 }
 0x2d9   : > { %1108 = vrot.lane.b32.xlu1 %v6850_v12, %s7247_s23  ;;  %v1312_v12 = vsel %vm267_vm0, %v6880_v8, 0.0 }
 0x2de   : > { %1102 = vrot.lane.b32.xlu0 %v6852_v61, %s7247_s23  ;;  %v1028_v61 = vmul.f32 1.442695, %v6862_v36 }
 0x2e0   : > { %6881 = vpow2.f32 %v1028_v61  ;;  %v7771_v61 = vadd.f32 %v7607_v21, %v7502_v16 }
 0x2e1   : > { %6883 = vpow2.f32 %v1022_v9  ;;  %v7775_v9 = vadd.f32 %v7502_v16, %v7609_v23 }
 0x2ea   : > { %v6882_v5 = vpop.eup %6881 }
 0x2eb   : > { %v6884_v6 = vpop.eup %6883 }
 0x2fd   : > { %1298 = vadd.xlane.f32.xlu0 %v1297_v26  ;;  %1295 = vadd.xlane.f32.xlu1 %v1294_v32  ;;  %v7722_v26 = vadd.f32 %v7592_v10, %v7502_v16  ;;  %v7726_v32 = vadd.f32 %v7502_v16, %v7594_v11  ;;  %v1032_v10 = vmul.f32 1.442695, %v6870_v46  ;;  %v1030_v46 = vmul.f32 1.442695, %v6872_v51 }
 0x2ff   : > { %6885 = vtanh.f32 %v7722_v26 }
 0x300   : > { %6887 = vtanh.f32 %v7726_v32 }
 0x301   : > { %6889 = vpow2.f32 %v1032_v10 }
 0x309   : > { %v6886_v25 = vpop.eup %6885 }
 0x30a   : > { %v7730_v34 = vpop.eup %6887  ;;  %v1321_v35 = vsel %vm267_vm0, %v6886_v25, 0.0 }
 0x30b   : > { %v6890_v11 = vpop.eup %6889 }
 0x30e   : > { %1112 = vrot.lane.b32.xlu1 %v6858_v62, %s7247_s23  ;;  %v1318_v62 = vsel %vm267_vm0, %v7730_v34, 0.0 }
 0x313   : > { %1106 = vrot.lane.b32.xlu0 %v6860_v63, %s7247_s23  ;;  %v1026_v63 = vmul.f32 1.442695, %v6864_v39 }
 0x315   : > { %6891 = vpow2.f32 %v1026_v63 }
 0x31f   : > { %v6892_v36 = vpop.eup %6891 }
 0x332   : > { %1304 = vadd.xlane.f32.xlu0 %v1303_v40  ;;  %1301 = vadd.xlane.f32.xlu1 %v1300_v41  ;;  %v7739_v40 = vadd.f32 %v7598_v13, %v7502_v16  ;;  %v7743_v41 = vadd.f32 %v7502_v16, %v7601_v15 }
 0x334   : > { %6893 = vtanh.f32 %v7739_v40 }
 0x335   : > { %6895 = vtanh.f32 %v7743_v41 }
 0x33e   : > { %v6894_v39 = vpop.eup %6893 }
 0x33f   : > { %v6896_v42 = vpop.eup %6895  ;;  %v1327_v43 = vsel %vm267_vm0, %v6894_v39, 0.0 }
 0x343   : > { %1116 = vrot.lane.b32.xlu1 %v6866_v0, %s7247_s23  ;;  %v1324_v0 = vsel %vm267_vm0, %v6896_v42, 0.0 }
 0x348   : > { %1110 = vrot.lane.b32.xlu0 %v6868_v2, %s7247_s23  ;;  %v1036_v2 = vmul.f32 1.442695, %v6878_v57  ;;  %v1034_v57 = vmul.f32 1.442695, %v6880_v8 }
 0x34a   : > { %6897 = vpow2.f32 %v1036_v2 }
 0x34b   : > { %6899 = vpow2.f32 %v1030_v46  ;;  %v1042_v46 = vmul.f32 1.442695, %v6896_v42 }
 0x354   : > { %v6898_v13 = vpop.eup %6897 }
 0x355   : > { %v6900_v15 = vpop.eup %6899 }
 0x367   : > { %1310 = vadd.xlane.f32.xlu0 %v1309_v52  ;;  %1307 = vadd.xlane.f32.xlu1 %v1306_v53  ;;  %v7753_v52 = vadd.f32 %v7603_v17, %v7502_v16  ;;  %v7757_v53 = vadd.f32 %v7502_v16, %v7605_v19 }
 0x369   : > { %6901 = vtanh.f32 %v7753_v52 }
 0x36a   : > { %6903 = vtanh.f32 %v7757_v53 }
 0x373   : > { %v6902_v51 = vpop.eup %6901 }
 0x374   : > { %v6904_v54 = vpop.eup %6903  ;;  %v1333_v49 = vsel %vm267_vm0, %v6902_v51, 0.0  ;;  %v1048_v2 = vmul.f32 1.442695, %v6902_v51 }
 0x378   : > { %1120 = vrot.lane.b32.xlu1 %v6874_v3, %s7247_s23  ;;  %v1330_v3 = vsel %vm267_vm0, %v6904_v54, 0.0 }
 0x37d   : > { %1114 = vrot.lane.b32.xlu0 %v6876_v4, %s7247_s23  ;;  %v1040_v4 = vmul.f32 1.442695, %v6886_v25 }
 0x37f   : > { %6905 = vpow2.f32 %v1040_v4 }
 0x380   : > { %6907 = vpow2.f32 %v1034_v57 }
 0x381   : > { %6909 = vtanh.f32 %v7771_v61 }
 0x382   : > { %6911 = vtanh.f32 %v7775_v9 }
 0x389   : > { %v6906_v17 = vpop.eup %6905 }
 0x38a   : > { %v6908_v19 = vpop.eup %6907 }
 0x39c   : > { %1316 = vadd.xlane.f32.xlu0 %v1315_v59  ;;  %1313 = vadd.xlane.f32.xlu1 %v1312_v12  ;;  %v7765_v59 = vpop.xlane.xlu0 %1247 }
 0x3a0   : > { %v7767_v12 = vpop.xlane.xlu0 %1256 }
 0x3a4   : > { %v7777_v8 = vpop.xlane.xlu0 %1253 }
 0x3ad   : > { %1124 = vrot.lane.b32.xlu1 %v6882_v5, %s7247_s23  ;;  %v7781_v5 = vpop.xlane.xlu1 %1250 }
 0x3b1   : > { %v7785_v25 = vpop.xlane.xlu1 %1259 }
 0x3b2   : > { %1118 = vrot.lane.b32.xlu0 %v6884_v6, %s7247_s23  ;;  %v7783_v6 = vpop.xlane.xlu0 %1262  ;;  %9741 = vst [vmem:[#allocation6_spill] sm:$0xff] %v7785_v25  ;;  %v7153_v25 = vld [vmem:[%s7352_s30 + $0x20] sm:$0xff] }
 0x3b3   : > { %9740 = vst [vmem:[#allocation5_spill] sm:$0xff] %v7783_v6 }
 0x3b5   : > { %v7788_v63 = vpop.xlane.xlu1 %1265 }
 0x3b6   : > { %9742 = vst [vmem:[#allocation7_spill] sm:$0xff] %v7788_v63 }
 0x3d1   : > { %1322 = vadd.xlane.f32.xlu0 %v1321_v35  ;;  %1319 = vadd.xlane.f32.xlu1 %v1318_v62  ;;  %v6910_v35 = vpop.eup %6909  ;;  %v1089_v62 = vpop.permute.xlu0 %1088 }
 0x3d2   : > { %v6912_v21 = vpop.eup %6911  ;;  %v1339_v10 = vsel %vm267_vm0, %v6910_v35, 0.0 }
 0x3d3   : > { %v1336_v23 = vsel %vm267_vm0, %v6912_v21, 0.0  ;;  %v1050_v57 = vmul.f32 1.442695, %v6912_v21 }
 0x3d5   : > { %v7790_v16 = vpop.xlane.xlu0 %1268 }
 0x3d6   : > { %9743 = vst [vmem:[#allocation8_spill] sm:$0xff] %v7790_v16 }
 0x3e2   : > { %1128 = vrot.lane.b32.xlu1 %v6890_v11, %s7247_s23  ;;  %v1044_v11 = vmul.f32 1.442695, %v6894_v39 }
 0x3e4   : > { %6913 = vpow2.f32 %v1044_v11 }
 0x3e7   : > { %1122 = vrot.lane.b32.xlu0 %v6892_v36, %s7247_s23  ;;  %v1093_v36 = vpop.permute.xlu1 %1092 }
 0x406   : > { %1328 = vadd.xlane.f32.xlu0 %v1327_v43  ;;  %1325 = vadd.xlane.f32.xlu1 %v1324_v0  ;;  %v1038_v43 = vmul.f32 1.442695, %v7730_v34  ;;  %v1087_v0 = vpop.permute.xlu0 %1086  ;;  %v6914_v34 = vpop.eup %6913 }
 0x408   : > { %6915 = vpow2.f32 %v1038_v43 }
 0x409   : > { %6917 = vpow2.f32 %v1048_v2 }
 0x40a   : > { %6919 = vpow2.f32 %v1042_v46 }
 0x412   : > { %v6916_v42 = vpop.eup %6915 }
 0x413   : > { %v6918_v51 = vpop.eup %6917 }
 0x417   : > { %1132 = vrot.lane.b32.xlu1 %v6898_v13, %s7247_s23  ;;  %v7794_v13 = vpop.xlane.xlu0 %1274 }
 0x418   : > { %9744 = vst [vmem:[#allocation9_spill] sm:$0xff] %v7794_v13 }
 0x41b   : > { %v7798_v39 = vpop.xlane.xlu0 %1280 }
 0x41c   : > { %1126 = vrot.lane.b32.xlu0 %v6900_v15, %s7247_s23  ;;  %v1091_v15 = vpop.permute.xlu1 %1090  ;;  %9746 = vst [vmem:[#allocation11_spill] sm:$0xff] %v7798_v39 }
 0x420   : > { %v7796_v4 = vpop.xlane.xlu1 %1271 }
 0x421   : > { %9745 = vst [vmem:[#allocation10_spill] sm:$0xff] %v7796_v4 }
 0x43b   : > { %1334 = vadd.xlane.f32.xlu0 %v1333_v49  ;;  %1331 = vadd.xlane.f32.xlu1 %v1330_v3  ;;  %v1052_v49 = vmul.f32 1.442695, %v6910_v35  ;;  %v1046_v3 = vmul.f32 1.442695, %v6904_v54  ;;  %v6920_v54 = vpop.eup %6919  ;;  %v7119_v35 = vld [vmem:[%s7352_s30 + $0x8] sm:$0xff] }
 0x43d   : > { %6921 = vpow2.f32 %v1052_v49 }
 0x43e   : > { %6923 = vpow2.f32 %v1046_v3 }
 0x43f   : > { %6925 = vpow2.f32 %v1050_v57 }
 0x447   : > { %v6922_v43 = vpop.eup %6921 }
 0x448   : > { %v6924_v46 = vpop.eup %6923 }
 0x44c   : > { %1136 = vrot.lane.b32.xlu1 %v6906_v17, %s7247_s23  ;;  %v1097_v17 = vpop.permute.xlu1 %1096 }
 0x450   : > { %v7805_v2 = vpop.xlane.xlu1 %1277 }
 0x451   : > { %1130 = vrot.lane.b32.xlu0 %v6908_v19, %s7247_s23  ;;  %v1095_v19 = vpop.permute.xlu0 %1094  ;;  %9747 = vst [vmem:[#allocation12_spill] sm:$0xff] %v7805_v2 }
 0x454   : > { %v1101_v57 = vpop.permute.xlu1 %1100 }
 0x455   : > { %v7808_v21 = vpop.xlane.xlu0 %1286 }
 0x456   : > { %9748 = vst [vmem:[#allocation13_spill] sm:$0xff] %v7808_v21 }
 0x470   : > { %1340 = vadd.xlane.f32.xlu0 %v1339_v10  ;;  %1337 = vadd.xlane.f32.xlu1 %v1336_v23  ;;  %v1183_v10 = vmul.f32 %v7119_v35, %v1089_v62  ;;  %v7120_v23 = vld [vmem:[%s7352_s30] sm:$0xff]  ;;  %v6146_v62 = vld [vmem:[%s9726_s1 + $0x10] sm:$0xff]  ;;  %v7824_v35 = vpop.xlane.xlu1 %1283 }
 0x471   : > { %v1182_v11 = vmul.f32 %v7120_v23, %v1087_v0  ;;  %v6147_v0 = vld [vmem:[%s9726_s1 + $0x18] sm:$0xff]  ;;  %9749 = vst [vmem:[#allocation14_spill] sm:$0xff] %v7824_v35  ;;  %v7122_v23 = vld [vmem:[%s7352_s30 + $0x10] sm:$0xff] }
 0x472   : > { %v1215_v49 = vadd.f32 %v1183_v10, %v7505_v18  ;;  %v7121_v18 = vld [vmem:[%s7352_s30 + $0x18] sm:$0xff] }
 0x473   : > { %v1214_v3 = vadd.f32 %v1182_v11, %v7508_v20  ;;  %v1099_v20 = vpop.permute.xlu0 %1098  ;;  %v1184_v11 = vmul.f32 %v7122_v23, %v1091_v15  ;;  %v7124_v15 = vld [vmem:[%s7352_s30 + $0x28] sm:$0xff] }
 0x481   : > { %1140 = vrot.lane.b32.xlu1 %v6914_v34, %s7247_s23  ;;  %v6662_v34 = vpack.c.bf16 %v6147_v0, %v6146_v62  ;;  %v1105_v0 = vpop.permute.xlu1 %1104 }
 0x483   : > { %6663 = vmatprep.subr.bf16.mxu0 %v6662_v34 }
 0x484   : > { %6665 = vmatpush3.bf16.msra.mxu0 %v6662_v34 }
 0x485   : > { %1144 = vrot.lane.b32.xlu1 %v6918_v51, %s7247_s23  ;;  %v1185_v51 = vmul.f32 %v7121_v18, %v1093_v36  ;;  %v2685_v36 = vmul.f32 %v1215_v49, %v1215_v49  ;;  %v1187_v18 = vmul.f32 %v7124_v15, %v1097_v17 }
 0x486   : > { %1134 = vrot.lane.b32.xlu0 %v6916_v42, %s7247_s23  ;;  %v6926_v42 = vpop.eup %6925 }
 0x487   : > { %v1217_v10 = vadd.f32 %v1185_v51, %v7513_v22  ;;  %v7123_v22 = vld [vmem:[%s7352_s30 + $0x20] sm:$0xff] }
 0x489   : > { %1148 = vrot.lane.b32.xlu1 %v6922_v43, %s7247_s23  ;;  %v7828_v43 = vpop.xlane.xlu0 %1292  ;;  %v2687_v62 = vmul.f32 %v1217_v10, %v1217_v10 }
 0x48a   : > { %1138 = vrot.lane.b32.xlu0 %v6920_v54, %s7247_s23  ;;  %v2684_v54 = vmul.f32 %v1214_v3, %v1214_v3  ;;  %9750 = vst [vmem:[#allocation15_spill] sm:$0xff] %v7828_v43 }
 0x48d   : > { %1419 = vrot.lane.b32.xlu1 %v1215_v49, %s7248_s8  ;;  %v1103_v34 = vpop.permute.xlu0 %1102 }
 0x48e   : > { %1142 = vrot.lane.b32.xlu0 %v6924_v46, %s7247_s23  ;;  %v1216_v46 = vadd.f32 %v1184_v11, %v7516_v24  ;;  %v7126_v11 = vld [vmem:[%s7352_s30 + $0x38] sm:$0xff] }
 0x490   : > { %v2686_v51 = vmul.f32 %v1216_v46, %v1216_v46 }
 0x491   : > { %2748 = vrot.lane.b32.xlu1 %v2684_v54, %s7248_s8  ;;  %v7840_v49 = vpop.xlane.xlu0 %1298  ;;  %v1219_v54 = vadd.f32 %v1187_v18, %v7521_v27  ;;  %v7128_v18 = vld [vmem:[%s7352_s30 + $0x48] sm:$0xff] }
 0x492   : > { %1146 = vrot.lane.b32.xlu0 %v6926_v42, %s7247_s23  ;;  %v1186_v42 = vmul.f32 %v7123_v22, %v1095_v19  ;;  %9752 = vst [vmem:[#allocation17_spill] sm:$0xff] %v7840_v49  ;;  %v7125_v19 = vld [vmem:[%s7352_s30 + $0x30] sm:$0xff] }
 0x493   : > { %v1188_v17 = vmul.f32 %v7125_v19, %v1099_v20  ;;  %v7127_v20 = vld [vmem:[%s7352_s30 + $0x40] sm:$0xff] }
 0x494   : > { %v1218_v24 = vadd.f32 %v1186_v42, %v7524_v28 }
 0x495   : > { %1423 = vrot.lane.b32.xlu1 %v1217_v10, %s7248_s8  ;;  %v1220_v27 = vadd.f32 %v1188_v17, %v7531_v33 }
 0x496   : > { %1417 = vrot.lane.b32.xlu0 %v1214_v3, %s7248_s8  ;;  %v7837_v3 = vpop.xlane.xlu1 %1289  ;;  %v2688_v23 = vmul.f32 %v1218_v24, %v1218_v24 }
 0x497   : > { %9751 = vst [vmem:[#allocation16_spill] sm:$0xff] %v7837_v3  ;;  %v2690_v15 = vmul.f32 %v1220_v27, %v1220_v27 }
 0x499   : > { %2754 = vrot.lane.b32.xlu1 %v2687_v62, %s7248_s8  ;;  %v2689_v62 = vmul.f32 %v1219_v54, %v1219_v54 }
 0x49a   : > { %2750 = vrot.lane.b32.xlu0 %v2685_v36, %s7248_s8  ;;  %v1109_v10 = vpop.permute.xlu1 %1108  ;;  %v1189_v36 = vmul.f32 %v7126_v11, %v1101_v57  ;;  %v1190_v57 = vmul.f32 %v7127_v20, %v1103_v34 }
 0x49c   : > { %v1221_v22 = vadd.f32 %v1189_v36, %v7564_v60  ;;  %v1222_v60 = vadd.f32 %v1190_v57, %v7576_v1  ;;  %v7130_v36 = vld [vmem:[%s7352_s30 + $0x58] sm:$0xff] }
 0x49d   : > { %2752 = vrot.lane.b32.xlu1 %v2686_v51, %s7248_s8  ;;  %v1191_v51 = vmul.f32 %v7128_v18, %v1105_v0  ;;  %v7129_v0 = vld [vmem:[%s7352_s30 + $0x50] sm:$0xff]  ;;  %v7132_v18 = vld [vmem:[%s7352_s30 + $0x68] sm:$0xff] }
 0x49e   : > { %1421 = vrot.lane.b32.xlu0 %v1216_v46, %s7248_s8  ;;  %v1107_v46 = vpop.permute.xlu0 %1106  ;;  %v7852_v28 = vpop.xlane.xlu1 %1295  ;;  %v2692_v11 = vmul.f32 %v1222_v60, %v1222_v60 }
 0x49f   : > { %9753 = vst [vmem:[#allocation18_spill] sm:$0xff] %v7852_v28  ;;  %v1223_v19 = vadd.f32 %v1191_v51, %v7615_v29 }
 0x4a1   : > { %1427 = vrot.lane.b32.xlu1 %v1219_v54, %s7248_s8 }
 0x4a2   : > { %1425 = vrot.lane.b32.xlu0 %v1218_v24, %s7248_s8  ;;  %v7855_v42 = vpop.xlane.xlu0 %1304  ;;  %v2691_v24 = vmul.f32 %v1221_v22, %v1221_v22  ;;  %v1113_v54 = vpop.permute.xlu1 %1112 }
 0x4a3   : > { %9754 = vst [vmem:[#allocation19_spill] sm:$0xff] %v7855_v42  ;;  %v1195_v51 = vmul.f32 %v7132_v18, %v1113_v54 }
 0x4a5   : > { %2758 = vrot.lane.b32.xlu1 %v2689_v62, %s7248_s8  ;;  %v1193_v62 = vmul.f32 %v7130_v36, %v1109_v10 }
 0x4a6   : > { %2756 = vrot.lane.b32.xlu0 %v2688_v23, %s7248_s8  ;;  %v1111_v33 = vpop.permute.xlu0 %1110  ;;  %v7865_v17 = vpop.xlane.xlu1 %1301  ;;  %v1192_v23 = vmul.f32 %v7129_v0, %v1107_v46  ;;  %v7131_v46 = vld [vmem:[%s7352_s30 + $0x60] sm:$0xff]  ;;  %v7133_v0 = vld [vmem:[%s7352_s30 + $0x70] sm:$0xff] }
 0x4a7   : > { %9755 = vst [vmem:[#allocation20_spill] sm:$0xff] %v7865_v17  ;;  %v1194_v57 = vmul.f32 %v7131_v46, %v1111_v33 }
 0x4a8   : > { %v1224_v1 = vadd.f32 %v1192_v23, %v7624_v31 }
 0x4a9   : > { %1431 = vrot.lane.b32.xlu1 %v1221_v22, %s7248_s8  ;;  %v1225_v22 = vadd.f32 %v1193_v62, %v7620_v30  ;;  %v1226_v30 = vadd.f32 %v1194_v57, %v7640_v45  ;;  %v7136_v57 = vld [vmem:[%s7352_s30 + $0x88] sm:$0xff] }
 0x4aa   : > { %1429 = vrot.lane.b32.xlu0 %v1220_v27, %s7248_s8  ;;  %v7868_v34 = vpop.xlane.xlu0 %1310  ;;  %v2693_v27 = vmul.f32 %v1223_v19, %v1223_v19  ;;  %v1117_v29 = vpop.permute.xlu1 %1116  ;;  %v2694_v10 = vmul.f32 %v1224_v1, %v1224_v1 }
 0x4ab   : > { %9756 = vst [vmem:[#allocation21_spill] sm:$0xff] %v7868_v34  ;;  %v2695_v31 = vmul.f32 %v1225_v22, %v1225_v22  ;;  %v2696_v23 = vmul.f32 %v1226_v30, %v1226_v30 }
 0x4ad   : > { %2762 = vrot.lane.b32.xlu1 %v2691_v24, %s7248_s8 }
 0x4ae   : > { %2760 = vrot.lane.b32.xlu0 %v2690_v15, %s7248_s8  ;;  %v1115_v20 = vpop.permute.xlu0 %1114  ;;  %v7880_v15 = vpop.xlane.xlu1 %1307 }
 0x4af   : > { %9757 = vst [vmem:[#allocation22_spill] sm:$0xff] %v7880_v15  ;;  %v1196_v54 = vmul.f32 %v7133_v0, %v1115_v20  ;;  %v7135_v20 = vld [vmem:[%s7352_s30 + $0x80] sm:$0xff] }
 0x4b1   : > { %1435 = vrot.lane.b32.xlu1 %v1223_v19, %s7248_s8 }
 0x4b2   : > { %1433 = vrot.lane.b32.xlu0 %v1222_v60, %s7248_s8  ;;  %v7883_v24 = vpop.xlane.xlu0 %1316  ;;  %v1227_v60 = vadd.f32 %v1195_v51, %v7636_v44  ;;  %v1121_v19 = vpop.permute.xlu1 %1120  ;;  %v1228_v44 = vadd.f32 %v1196_v54, %v7655_v56  ;;  %v7138_v54 = vld [vmem:[%s7352_s30 + $0x98] sm:$0xff] }
 0x4b3   : > { %9758 = vst [vmem:[#allocation23_spill] sm:$0xff] %v7883_v24 }
 0x4b4   : > { %v2697_v62 = vmul.f32 %v1227_v60, %v1227_v60  ;;  %v2698_v46 = vmul.f32 %v1228_v44, %v1228_v44 }
 0x4b5   : > { %2766 = vrot.lane.b32.xlu1 %v2693_v27, %s7248_s8 }
 0x4b6   : > { %2764 = vrot.lane.b32.xlu0 %v2692_v11, %s7248_s8  ;;  %v1119_v33 = vpop.permute.xlu0 %1118  ;;  %v7134_v11 = vld [vmem:[%s7352_s30 + $0x78] sm:$0xff]  ;;  %v7893_v27 = vpop.xlane.xlu1 %1313 }
 0x4b7   : > { %v1197_v36 = vmul.f32 %v7134_v11, %v1117_v29  ;;  %9759 = vst [vmem:[#allocation24_spill] sm:$0xff] %v7893_v27  ;;  %v1198_v29 = vmul.f32 %v7135_v20, %v1119_v33 }
 0x4b9   : > { %1439 = vrot.lane.b32.xlu1 %v1225_v22, %s7248_s8 }
 0x4ba   : > { %1437 = vrot.lane.b32.xlu0 %v1224_v1, %s7248_s8  ;;  %v7896_v45 = vpop.xlane.xlu0 %1322  ;;  %v1229_v1 = vadd.f32 %v1197_v36, %v7651_v55  ;;  %v1125_v22 = vpop.permute.xlu1 %1124  ;;  %v1230_v55 = vadd.f32 %v1198_v29, %v7670_v47 }
 0x4bb   : > { %9760 = vst [vmem:[#allocation25_spill] sm:$0xff] %v7896_v45 }
 0x4bc   : > { %v2699_v51 = vmul.f32 %v1229_v1, %v1229_v1 }
 0x4bd   : > { %2770 = vrot.lane.b32.xlu1 %v2695_v31, %s7248_s8 }
 0x4be   : > { %2768 = vrot.lane.b32.xlu0 %v2694_v10, %s7248_s8  ;;  %v1199_v10 = vmul.f32 %v7136_v57, %v1121_v19  ;;  %v1123_v18 = vpop.permute.xlu0 %1122  ;;  %v7908_v56 = vpop.xlane.xlu1 %1319  ;;  %v7137_v19 = vld [vmem:[%s7352_s30 + $0x90] sm:$0xff] }
 0x4bf   : > { %9761 = vst [vmem:[#allocation26_spill] sm:$0xff] %v7908_v56  ;;  %v1200_v33 = vmul.f32 %v7137_v19, %v1123_v18 }
 0x4c0   : > { %v1231_v31 = vadd.f32 %v1199_v10, %v7666_v14 }
 0x4c1   : > { %1443 = vrot.lane.b32.xlu1 %v1227_v60, %s7248_s8  ;;  %v2700_v60 = vmul.f32 %v1230_v55, %v1230_v55  ;;  %v1232_v14 = vadd.f32 %v1200_v33, %v7684_v38  ;;  %v7142_v33 = vld [vmem:[%s7352_s30 + $0xb8] sm:$0xff] }
 0x4c2   : > { %1441 = vrot.lane.b32.xlu0 %v1226_v30, %s7248_s8  ;;  %v7911_v30 = vpop.xlane.xlu0 %1328  ;;  %v2701_v0 = vmul.f32 %v1231_v31, %v1231_v31  ;;  %v1129_v11 = vpop.permute.xlu1 %1128 }
 0x4c3   : > { %9762 = vst [vmem:[#allocation27_spill] sm:$0xff] %v7911_v30 }
 0x4c5   : > { %2774 = vrot.lane.b32.xlu1 %v2697_v62, %s7248_s8 }
 0x4c6   : > { %2772 = vrot.lane.b32.xlu0 %v2696_v23, %s7248_s8  ;;  %v1201_v23 = vmul.f32 %v7138_v54, %v1125_v22  ;;  %v1127_v47 = vpop.permute.xlu0 %1126  ;;  %v7921_v62 = vpop.xlane.xlu1 %1325  ;;  %v7139_v22 = vld [vmem:[%s7352_s30 + $0xa0] sm:$0xff] }
 0x4c7   : > { %9763 = vst [vmem:[#allocation28_spill] sm:$0xff] %v7921_v62  ;;  %v1202_v20 = vmul.f32 %v7139_v22, %v1127_v47  ;;  %v7143_v47 = vld [vmem:[%s7352_s30 + $0xc8] sm:$0xff] }
 0x4c8   : > { %v1233_v36 = vadd.f32 %v1201_v23, %v7680_v37 }
 0x4c9   : > { %1447 = vrot.lane.b32.xlu1 %v1229_v1, %s7248_s8  ;;  %v2702_v1 = vmul.f32 %v1232_v14, %v1232_v14  ;;  %v1234_v38 = vadd.f32 %v1202_v20, %v7698_v50  ;;  %v7144_v20 = vld [vmem:[%s7352_s30 + $0xc0] sm:$0xff] }
 0x4ca   : > { %1445 = vrot.lane.b32.xlu0 %v1228_v44, %s7248_s8  ;;  %v7924_v44 = vpop.xlane.xlu0 %1334  ;;  %v2703_v29 = vmul.f32 %v1233_v36, %v1233_v36  ;;  %v1133_v37 = vpop.permute.xlu1 %1132 }
 0x4cb   : > { %9764 = vst [vmem:[#allocation29_spill] sm:$0xff] %v7924_v44 }
 0x4cd   : > { %2778 = vrot.lane.b32.xlu1 %v2699_v51, %s7248_s8  ;;  %v2704_v51 = vmul.f32 %v1234_v38, %v1234_v38 }
 0x4ce   : > { %2776 = vrot.lane.b32.xlu0 %v2698_v46, %s7248_s8  ;;  %v7140_v46 = vld [vmem:[%s7352_s30 + $0xa8] sm:$0xff]  ;;  %v1131_v18 = vpop.permute.xlu0 %1130 }
 0x4cf   : > { %v1203_v57 = vmul.f32 %v7140_v46, %v1129_v11 }
 0x4d1   : > { %1451 = vrot.lane.b32.xlu1 %v1231_v31, %s7248_s8  ;;  %v1235_v10 = vadd.f32 %v1203_v57, %v7694_v48  ;;  %v7141_v31 = vld [vmem:[%s7352_s30 + $0xb0] sm:$0xff]  ;;  %v7145_v57 = vld [vmem:[%s7352_s30 + $0xd8] sm:$0xff] }
 0x4d2   : > { %1449 = vrot.lane.b32.xlu0 %v1230_v55, %s7248_s8  ;;  %v7935_v55 = vpop.xlane.xlu1 %1331 }
 0x4d3   : > { %9765 = vst [vmem:[#allocation30_spill] sm:$0xff] %v7935_v55  ;;  %v2705_v19 = vmul.f32 %v1235_v10, %v1235_v10 }
 0x4d5   : > { %2782 = vrot.lane.b32.xlu1 %v2701_v0, %s7248_s8  ;;  %v1205_v0 = vmul.f32 %v7142_v33, %v1133_v37 }
 0x4d6   : > { %2780 = vrot.lane.b32.xlu0 %v2700_v60, %s7248_s8  ;;  %v1204_v60 = vmul.f32 %v7141_v31, %v1131_v18  ;;  %v1137_v54 = vpop.permute.xlu1 %1136  ;;  %v7146_v31 = vld [vmem:[%s7352_s30 + $0xd0] sm:$0xff] }
 0x4d7   : > { %v1237_v50 = vadd.f32 %v1205_v0, %v7708_v58  ;;  %v7147_v0 = vld [vmem:[%s7352_s30 + $0xe8] sm:$0xff] }
 0x4d8   : > { %v1236_v48 = vadd.f32 %v1204_v60, %v7712_v7 }
 0x4d9   : > { %1455 = vrot.lane.b32.xlu1 %v1233_v36, %s7248_s8  ;;  %v2707_v11 = vmul.f32 %v1237_v50, %v1237_v50 }
 0x4da   : > { %1453 = vrot.lane.b32.xlu0 %v1232_v14, %s7248_s8  ;;  %v2706_v23 = vmul.f32 %v1236_v48, %v1236_v48  ;;  %v1207_v14 = vmul.f32 %v7143_v47, %v1137_v54  ;;  %v7148_v47 = vld [vmem:[%s7352_s30 + $0xe0] sm:$0xff] }
 0x4dc   : > { %v1239_v36 = vadd.f32 %v1207_v14, %v7722_v26 }
 0x4dd   : > { %2786 = vrot.lane.b32.xlu1 %v2703_v29, %s7248_s8 }
 0x4de   : > { %2784 = vrot.lane.b32.xlu0 %v2702_v1, %s7248_s8  ;;  %v2709_v58 = vmul.f32 %v1239_v36, %v1239_v36 }
 0x4e1   : > { %1459 = vrot.lane.b32.xlu1 %v1235_v10, %s7248_s8 }
 0x4e2   : > { %1457 = vrot.lane.b32.xlu0 %v1234_v38, %s7248_s8 }
 0x4e5   : > { %2790 = vrot.lane.b32.xlu1 %v2705_v19, %s7248_s8 }
 0x4e6   : > { %2788 = vrot.lane.b32.xlu0 %v2704_v51, %s7248_s8 }
 0x4e9   : > { %1463 = vrot.lane.b32.xlu1 %v1237_v50, %s7248_s8 }
 0x4ea   : > { %1461 = vrot.lane.b32.xlu0 %v1236_v48, %s7248_s8 }
 0x4ed   : > { %2794 = vrot.lane.b32.xlu1 %v2707_v11, %s7248_s8 }
 0x4ee   : > { %2792 = vrot.lane.b32.xlu0 %v2706_v23, %s7248_s8 }
 0x4f1   : > { %1467 = vrot.lane.b32.xlu1 %v1239_v36, %s7248_s8 }
 0x4f5   : > { %2798 = vrot.lane.b32.xlu1 %v2709_v58, %s7248_s8 }
 0x4fd   : > { %v7951_v7 = vpop.xlane.xlu0 %1340  ;;  %v7953_v1 = vpop.xlane.xlu1 %1337 }
 0x4fe   : > { %9766 = vst [vmem:[#allocation31_spill] sm:$0xff] %v7951_v7  ;;  %9767 = vst [vmem:[#allocation32_spill] sm:$0xff] %v7953_v1 }
 0x501   : > { %v1135_v22 = vpop.permute.xlu0 %1134  ;;  %v1141_v46 = vpop.permute.xlu1 %1140 }
 0x502   : > { %v1206_v29 = vmul.f32 %v7144_v20, %v1135_v22  ;;  %v1209_v37 = vmul.f32 %v7145_v57, %v1141_v46  ;;  %v7149_v22 = vld [vmem:[%s7352_s30 + $0xf8] sm:$0xff]  ;;  %v6182_v57 = vld [vmem:[%s9728_s3 + $0x40] sm:$0xff] }
 0x504   : > { %v1238_v38 = vadd.f32 %v1206_v29, %v7726_v32  ;;  %v1241_v10 = vadd.f32 %v1209_v37, %v7739_v40  ;;  %v6183_v37 = vld [vmem:[%s9728_s3 + $0x48] sm:$0xff] }
 0x505   : > { %v1139_v26 = vpop.permute.xlu0 %1138  ;;  %v1145_v18 = vpop.permute.xlu1 %1144 }
 0x506   : > { %1465 = vrot.lane.b32.xlu0 %v1238_v38, %s7248_s8  ;;  %v2708_v51 = vmul.f32 %v1238_v38, %v1238_v38  ;;  %v1208_v60 = vmul.f32 %v7146_v31, %v1139_v26  ;;  %1471 = vrot.lane.b32.xlu1 %v1241_v10, %s7248_s8  ;;  %v2711_v33 = vmul.f32 %v1241_v10, %v1241_v10 }
 0x507   : > { %v1211_v48 = vmul.f32 %v7147_v0, %v1145_v18  ;;  %v6666_v26 = vpack.c.bf16 %v6183_v37, %v6182_v57  ;;  %v7150_v18 = vld [vmem:[%s7352_s30 + $0xf0] sm:$0xff] }
 0x508   : > { %v1240_v50 = vadd.f32 %v1208_v60, %v7743_v41 }
 0x509   : > { %v1143_v19 = vpop.permute.xlu0 %1142  ;;  %v1149_v32 = vpop.permute.xlu1 %1148  ;;  %v1243_v54 = vadd.f32 %v1211_v48, %v7753_v52  ;;  %6667 = vmatprep.subr.bf16.mxu1 %v6666_v26 }
 0x50a   : > { %2796 = vrot.lane.b32.xlu0 %v2708_v51, %s7248_s8  ;;  %2802 = vrot.lane.b32.xlu1 %v2711_v33, %s7248_s8  ;;  %v2710_v11 = vmul.f32 %v1240_v50, %v1240_v50  ;;  %v1210_v14 = vmul.f32 %v7148_v47, %v1143_v19  ;;  %v1213_v20 = vmul.f32 %v7149_v22, %v1149_v32 }
 0x50b   : > { %v2713_v58 = vmul.f32 %v1243_v54, %v1243_v54  ;;  %6669 = vmatpush3.bf16.msra.mxu1 %v6666_v26 }
 0x50c   : > { %v1242_v52 = vadd.f32 %v1210_v14, %v7757_v53  ;;  %v1245_v46 = vadd.f32 %v1213_v20, %v7771_v61 }
 0x50d   : > { %v1147_v40 = vpop.permute.xlu0 %1146  ;;  %v1420_v23 = vpop.permute.xlu1 %1419 }
 0x50e   : > { %1469 = vrot.lane.b32.xlu0 %v1240_v50, %s7248_s8  ;;  %1475 = vrot.lane.b32.xlu1 %v1243_v54, %s7248_s8  ;;  %v2712_v10 = vmul.f32 %v1242_v52, %v1242_v52  ;;  %v1212_v53 = vmul.f32 %v7150_v18, %v1147_v40  ;;  %v2715_v61 = vmul.f32 %v1245_v46, %v1245_v46 }
 0x510   : > { %v1244_v60 = vadd.f32 %v1212_v53, %v7775_v9 }
 0x511   : > { %v1418_v36 = vpop.permute.xlu0 %1417  ;;  %v2749_v41 = vpop.permute.xlu1 %2748 }
 0x512   : > { %2800 = vrot.lane.b32.xlu0 %v2710_v11, %s7248_s8  ;;  %6530 = vmatprep.mubr.msk.f32.mxu0 %vm267_vm0, %v1418_v36  ;;  %v2714_v0 = vmul.f32 %v1244_v60, %v1244_v60  ;;  %v2844_v37 = vsel %vm267_vm0, %v2749_v41, 0.0 }
 0x513   : > { %6531 = vmatmul.mubr.msk.f32.vlgmr.msra.gmra.mrb[34].mxu0 %vm267_vm0, %v1420_v23  ;;  %2806 = vrot.lane.b32.xlu1 %v2713_v58, %s7248_s8 }
 0x515   : > { %v2751_v29 = vpop.permute.xlu0 %2750  ;;  %v1424_v38 = vpop.permute.xlu1 %1423 }
 0x516   : > { %1473 = vrot.lane.b32.xlu0 %v1242_v52, %s7248_s8  ;;  %v2847_v57 = vsel %vm267_vm0, %v2751_v29, 0.0 }
 0x517   : > { %1479 = vrot.lane.b32.xlu1 %v1245_v46, %s7248_s8 }
 0x519   : > { %v1422_v51 = vpop.permute.xlu0 %1421  ;;  %v2755_v31 = vpop.permute.xlu1 %2754 }
 0x51a   : > { %2804 = vrot.lane.b32.xlu0 %v2712_v10, %s7248_s8  ;;  %6533 = vmatprep.mubr.msk.f32.mxu0 %vm267_vm0, %v1422_v51  ;;  %v2853_v18 = vsel %vm267_vm0, %v2755_v31, 0.0 }
 0x51b   : > { %6534 = vmatmul.mubr.msk.f32.gmra.mrb[36].mxu0 %vm267_vm0, %v1424_v38  ;;  %2810 = vrot.lane.b32.xlu1 %v2715_v61, %s7248_s8 }
 0x51d   : > { %v1426_v19 = vpop.permute.xlu0 %1425  ;;  %v2753_v33 = vpop.permute.xlu1 %2752 }
 0x51e   : > { %1477 = vrot.lane.b32.xlu0 %v1244_v60, %s7248_s8  ;;  %6536 = vmatprep.mubr.msk.f32.mxu0 %vm267_vm0, %v1426_v19  ;;  %v2850_v41 = vsel %vm267_vm0, %v2753_v33, 0.0 }
 0x521   : > { %v2757_v48 = vpop.permute.xlu0 %2756  ;;  %v1428_v32 = vpop.permute.xlu1 %1427 }
 0x522   : > { %2808 = vrot.lane.b32.xlu0 %v2714_v0, %s7248_s8  ;;  %6537 = vmatmul.mubr.msk.f32.gmra.mrb[38].mxu0 %vm267_vm0, %v1428_v32  ;;  %v2856_v10 = vsel %vm267_vm0, %v2757_v48, 0.0 }
 0x525   : > { %v1430_v50 = vpop.permute.xlu0 %1429  ;;  %v2759_v40 = vpop.permute.xlu1 %2758 }
 0x526   : > { %6539 = vmatprep.mubr.msk.f32.mxu0 %vm267_vm0, %v1430_v50  ;;  %v2859_v31 = vsel %vm267_vm0, %v2759_v40, 0.0  ;;  %v6185_v40 = vld [vmem:[%s9728_s3 + $0x58] sm:$0xff] }
 0x529   : > { %v2761_v9 = vpop.permute.xlu0 %2760  ;;  %v1432_v54 = vpop.permute.xlu1 %1431 }
 0x52a   : > { %6540 = vmatmul.mubr.msk.f32.gmra.mrb[40].mxu0 %vm267_vm0, %v1432_v54  ;;  %v2862_v29 = vsel %vm267_vm0, %v2761_v9, 0.0  ;;  %v6184_v9 = vld [vmem:[%s9728_s3 + $0x50] sm:$0xff] }
 0x52d   : > { %v1434_v23 = vpop.permute.xlu0 %1433  ;;  %v2763_v11 = vpop.permute.xlu1 %2762 }
 0x52e   : > { %6542 = vmatprep.mubr.msk.f32.mxu0 %vm267_vm0, %v1434_v23  ;;  %v2865_v33 = vsel %vm267_vm0, %v2763_v11, 0.0 }
 0x531   : > { %v2765_v47 = vpop.permute.xlu0 %2764  ;;  %v1436_v14 = vpop.permute.xlu1 %1435 }
 0x532   : > { %6543 = vmatmul.mubr.msk.f32.gmra.mrb[42].mxu0 %vm267_vm0, %v1436_v14  ;;  %v2868_v19 = vsel %vm267_vm0, %v2765_v47, 0.0  ;;  %v6670_v47 = vpack.c.bf16 %v6185_v40, %v6184_v9 }
 0x534   : > { %6671 = vmatprep.subr.bf16.mxu1 %v6670_v47 }
 0x535   : > { %v1438_v36 = vpop.permute.xlu0 %1437  ;;  %v2767_v58 = vpop.permute.xlu1 %2766  ;;  %6673 = vmatpush3.bf16.msra.mxu1 %v6670_v47 }
 0x536   : > { %6545 = vmatprep.mubr.msk.f32.mxu0 %vm267_vm0, %v1438_v36  ;;  %v2871_v14 = vsel %vm267_vm0, %v2767_v58, 0.0 }
 0x539   : > { %v2769_v22 = vpop.permute.xlu0 %2768  ;;  %v1440_v20 = vpop.permute.xlu1 %1439 }
 0x53a   : > { %6546 = vmatmul.mubr.msk.f32.gmra.mrb[44].mxu0 %vm267_vm0, %v1440_v20  ;;  %v2874_v32 = vsel %vm267_vm0, %v2769_v22, 0.0 }
 0x53d   : > { %v1442_v52 = vpop.permute.xlu0 %1441  ;;  %v2771_v46 = vpop.permute.xlu1 %2770 }
 0x53e   : > { %6548 = vmatprep.mubr.msk.f32.mxu0 %vm267_vm0, %v1442_v52  ;;  %v2877_v20 = vsel %vm267_vm0, %v2771_v46, 0.0 }
 0x53f   : > { %2848 = vadd.xlane.f32.xlu1 %v2847_v57 }
 0x541   : > { %2845 = vadd.xlane.f32.xlu0 %v2844_v37  ;;  %v2773_v38 = vpop.permute.xlu0 %2772  ;;  %v1444_v26 = vpop.permute.xlu1 %1443 }
 0x542   : > { %6549 = vmatmul.mubr.msk.f32.gmra.mrb[46].mxu0 %vm267_vm0, %v1444_v26  ;;  %v2880_v23 = vsel %vm267_vm0, %v2773_v38, 0.0 }
 0x543   : > { %2857 = vadd.xlane.f32.xlu1 %v2856_v10 }
 0x545   : > { %2854 = vadd.xlane.f32.xlu0 %v2853_v18  ;;  %v1446_v53 = vpop.permute.xlu0 %1445  ;;  %v2775_v51 = vpop.permute.xlu1 %2774 }
 0x546   : > { %6551 = vmatprep.mubr.msk.f32.mxu0 %vm267_vm0, %v1446_v53  ;;  %v2883_v58 = vsel %vm267_vm0, %v2775_v51, 0.0  ;;  %v6186_v53 = vld [vmem:[%s9728_s3 + $0x60] sm:$0xff]  ;;  %v6187_v51 = vld [vmem:[%s9728_s3 + $0x68] sm:$0xff] }
 0x547   : > { %2863 = vadd.xlane.f32.xlu1 %v2862_v29  ;;  %v6674_v29 = vpack.c.bf16 %v6187_v51, %v6186_v53 }
 0x549   : > { %2851 = vadd.xlane.f32.xlu0 %v2850_v41  ;;  %v2777_v61 = vpop.permute.xlu0 %2776  ;;  %v1448_v60 = vpop.permute.xlu1 %1447  ;;  %6675 = vmatprep.subr.bf16.mxu1 %v6674_v29 }
 0x54a   : > { %6552 = vmatmul.mubr.msk.f32.gmra.mrb[48].mxu0 %vm267_vm0, %v1448_v60  ;;  %v2886_v37 = vsel %vm267_vm0, %v2777_v61, 0.0  ;;  %6677 = vmatpush3.bf16.msra.mxu1 %v6674_v29 }
 0x54b   : > { %2869 = vadd.xlane.f32.xlu1 %v2868_v19 }
 0x54d   : > { %2860 = vadd.xlane.f32.xlu0 %v2859_v31  ;;  %v1450_v0 = vpop.permute.xlu0 %1449  ;;  %v2779_v48 = vpop.permute.xlu1 %2778 }
 0x54e   : > { %6554 = vmatprep.mubr.msk.f32.mxu0 %vm267_vm0, %v1450_v0  ;;  %v2889_v22 = vsel %vm267_vm0, %v2779_v48, 0.0 }
 0x54f   : > { %2875 = vadd.xlane.f32.xlu1 %v2874_v32 }
 0x551   : > { %2866 = vadd.xlane.f32.xlu0 %v2865_v33  ;;  %v2781_v50 = vpop.permute.xlu0 %2780  ;;  %v1452_v54 = vpop.permute.xlu1 %1451 }
 0x552   : > { %6555 = vmatmul.mubr.msk.f32.gmra.mrb[50].mxu0 %vm267_vm0, %v1452_v54  ;;  %v2892_v46 = vsel %vm267_vm0, %v2781_v50, 0.0  ;;  %v6188_v54 = vld [vmem:[%s9728_s3 + $0x70] sm:$0xff] }
 0x553   : > { %2881 = vadd.xlane.f32.xlu1 %v2880_v23  ;;  %v6189_v23 = vld [vmem:[%s9728_s3 + $0x78] sm:$0xff] }
 0x554   : > { %v6678_v47 = vpack.c.bf16 %v6189_v23, %v6188_v54 }
 0x555   : > { %2872 = vadd.xlane.f32.xlu0 %v2871_v14  ;;  %v1454_v11 = vpop.permute.xlu0 %1453  ;;  %v2783_v36 = vpop.permute.xlu1 %2782 }
 0x556   : > { %6557 = vmatprep.mubr.msk.f32.mxu0 %vm267_vm0, %v1454_v11  ;;  %v2895_v10 = vsel %vm267_vm0, %v2783_v36, 0.0  ;;  %6679 = vmatprep.subr.bf16.mxu1 %v6678_v47 }
 0x557   : > { %2890 = vadd.xlane.f32.xlu1 %v2889_v22  ;;  %6681 = vmatpush3.bf16.msra.mxu1 %v6678_v47 }
 0x559   : > { %2878 = vadd.xlane.f32.xlu0 %v2877_v20  ;;  %v2785_v52 = vpop.permute.xlu0 %2784  ;;  %v1456_v57 = vpop.permute.xlu1 %1455 }
 0x55a   : > { %6558 = vmatmul.mubr.msk.f32.gmra.mrb[52].mxu0 %vm267_vm0, %v1456_v57  ;;  %v2898_v60 = vsel %vm267_vm0, %v2785_v52, 0.0 }
 0x55b   : > { %2887 = vadd.xlane.f32.xlu1 %v2886_v37 }
 0x55d   : > { %2884 = vadd.xlane.f32.xlu0 %v2883_v58  ;;  %v1458_v38 = vpop.permute.xlu0 %1457  ;;  %v2787_v26 = vpop.permute.xlu1 %2786 }
 0x55e   : > { %6560 = vmatprep.mubr.msk.f32.mxu0 %vm267_vm0, %v1458_v38  ;;  %v2901_v61 = vsel %vm267_vm0, %v2787_v26, 0.0 }
 0x55f   : > { %2896 = vadd.xlane.f32.xlu1 %v2895_v10 }
 0x561   : > { %2893 = vadd.xlane.f32.xlu0 %v2892_v46  ;;  %v2789_v18 = vpop.permute.xlu0 %2788  ;;  %v1460_v41 = vpop.permute.xlu1 %1459 }
 0x562   : > { %6561 = vmatmul.mubr.msk.f32.gmra.mrb[54].mxu0 %vm267_vm0, %v1460_v41  ;;  %v2904_v48 = vsel %vm267_vm0, %v2789_v18, 0.0 }
 0x563   : > { %2902 = vadd.xlane.f32.xlu1 %v2901_v61 }
 0x565   : > { %2899 = vadd.xlane.f32.xlu0 %v2898_v60  ;;  %v1462_v19 = vpop.permute.xlu0 %1461  ;;  %v2791_v31 = vpop.permute.xlu1 %2790 }
 0x566   : > { %6563 = vmatprep.mubr.msk.f32.mxu0 %vm267_vm0, %v1462_v19  ;;  %v2907_v0 = vsel %vm267_vm0, %v2791_v31, 0.0 }
 0x567   : > { %2908 = vadd.xlane.f32.xlu1 %v2907_v0  ;;  %v8073_v0 = vld [vmem:[%s9727_s2 + $0x1] ss:$0 sm:$0xff] }
 0x569   : > { %2905 = vadd.xlane.f32.xlu0 %v2904_v48  ;;  %v2793_v32 = vpop.permute.xlu0 %2792  ;;  %v1464_v33 = vpop.permute.xlu1 %1463 }
 0x56a   : > { %6564 = vmatmul.mubr.msk.f32.gmra.mrb[56].mxu0 %vm267_vm0, %v1464_v33  ;;  %v2910_v50 = vsel %vm267_vm0, %v2793_v32, 0.0 }
 0x56d   : > { %2911 = vadd.xlane.f32.xlu0 %v2910_v50  ;;  %v2795_v9 = vpop.permute.xlu1 %2794 }
 0x56e   : > { %v2913_v40 = vsel %vm267_vm0, %v2795_v9, 0.0 }
 0x56f   : > { %2914 = vadd.xlane.f32.xlu1 %v2913_v40 }
 0x571   : > { %v1468_v14 = vpop.permute.xlu1 %1467 }
 0x575   : > { %v2799_v11 = vpop.permute.xlu1 %2798 }
 0x576   : > { %v2919_v36 = vsel %vm267_vm0, %v2799_v11, 0.0 }
 0x577   : > { %2920 = vadd.xlane.f32.xlu1 %v2919_v36 }
 0x578   : > { %v1466_v22 = vpop.permute.xlu0 %1465 }
 0x579   : > { %6566 = vmatprep.mubr.msk.f32.mxu0 %vm267_vm0, %v1466_v22  ;;  %v1472_v20 = vpop.permute.xlu1 %1471 }
 0x57a   : > { %6567 = vmatmul.mubr.msk.f32.gmra.mrb[58].mxu0 %vm267_vm0, %v1468_v14 }
 0x57c   : > { %v2797_v52 = vpop.permute.xlu0 %2796 }
 0x57d   : > { %v2916_v57 = vsel %vm267_vm0, %v2797_v52, 0.0  ;;  %v2803_v37 = vpop.permute.xlu1 %2802 }
 0x57e   : > { %2917 = vadd.xlane.f32.xlu0 %v2916_v57  ;;  %v2925_v58 = vsel %vm267_vm0, %v2803_v37, 0.0 }
 0x57f   : > { %2926 = vadd.xlane.f32.xlu1 %v2925_v58 }
 0x580   : > { %v1470_v38 = vpop.permute.xlu0 %1469 }
 0x581   : > { %6569 = vmatprep.mubr.msk.f32.mxu0 %vm267_vm0, %v1470_v38  ;;  %v1476_v26 = vpop.permute.xlu1 %1475 }
 0x582   : > { %6570 = vmatmul.mubr.msk.f32.gmra.mrb[60].mxu0 %vm267_vm0, %v1472_v20 }
 0x584   : > { %v2801_v10 = vpop.permute.xlu0 %2800 }
 0x585   : > { %v2922_v46 = vsel %vm267_vm0, %v2801_v10, 0.0  ;;  %v2807_v18 = vpop.permute.xlu1 %2806 }
 0x586   : > { %2923 = vadd.xlane.f32.xlu0 %v2922_v46  ;;  %v2931_v53 = vsel %vm267_vm0, %v2807_v18, 0.0 }
 0x587   : > { %2932 = vadd.xlane.f32.xlu1 %v2931_v53 }
 0x588   : > { %v1474_v51 = vpop.permute.xlu0 %1473 }
 0x589   : > { %6572 = vmatprep.mubr.msk.f32.mxu0 %vm267_vm0, %v1474_v51  ;;  %v1480_v60 = vpop.permute.xlu1 %1479 }
 0x58a   : > { %6573 = vmatmul.mubr.msk.f32.gmra.mrb[62].mxu0 %vm267_vm0, %v1476_v26 }
 0x58c   : > { %v2805_v29 = vpop.permute.xlu0 %2804 }
 0x58d   : > { %v2928_v41 = vsel %vm267_vm0, %v2805_v29, 0.0 }
 0x58e   : > { %2929 = vadd.xlane.f32.xlu0 %v2928_v41 }
 0x590   : > { %v1478_v61 = vpop.permute.xlu0 %1477 }
 0x591   : > { %6575 = vmatprep.mubr.msk.f32.mxu0 %vm267_vm0, %v1478_v61 }
 0x592   : > { %6576 = vmatmul.mubr.msk.f32.gmra.mrb[64].mxu0 %vm267_vm0, %v1480_v60 }
 0x594   : > { %v2809_v19 = vpop.permute.xlu0 %2808 }
 0x595   : > { %v2934_v31 = vsel %vm267_vm0, %v2809_v19, 0.0 }
 0x596   : > { %2935 = vadd.xlane.f32.xlu0 %v2934_v31 }
 0x5e6   : > { %v6532_v48 = vpop.f32.mrb[34].mxu0 }
 0x5e7   : > { %v1617_v32 = vadd.f32 %v6532_v48, %v8073_v0  ;;  %v1611_v33 = vpop.f32.mrb[35].mxu0 }
 0x5e8   : > { %v1612_v50 = vadd.f32 %v8073_v0, %v1611_v33 }
 0x5ea   : > { %6927 = vtanh.f32 %v1612_v50 }
 0x5eb   : > { %6929 = vtanh.f32 %v1617_v32 }
 0x5ee   : > { %v6535_v9 = vpop.f32.mrb[36].mxu0 }
 0x5ef   : > { %v1627_v40 = vadd.f32 %v6535_v9, %v8073_v0  ;;  %v1621_v54 = vpop.f32.mrb[37].mxu0 }
 0x5f0   : > { %v1622_v23 = vadd.f32 %v8073_v0, %v1621_v54 }
 0x5f2   : > { %6931 = vtanh.f32 %v1622_v23 }
 0x5f3   : > { %6933 = vtanh.f32 %v1627_v40 }
 0x5f4   : > { %v6928_v47 = vpop.eup %6927 }
 0x5f5   : > { %v6930_v14 = vpop.eup %6929  ;;  %6594 = vmatprep.mubr.msk.f32.mxu1 %vm636_vm1, %v6928_v47  ;;  %v6538_v11 = vpop.f32.mrb[38].mxu0 }
 0x5f6   : > { %6595 = vmatmul.mubr.msk.f32.vlgmr.msra.gmra.mrb[30].mxu1 %vm636_vm1, %v6930_v14  ;;  %v1637_v36 = vadd.f32 %v6538_v11, %v8073_v0  ;;  %v1631_v22 = vpop.f32.mrb[39].mxu0 }
 0x5f7   : > { %v1632_v20 = vadd.f32 %v8073_v0, %v1631_v22 }
 0x5f9   : > { %6935 = vtanh.f32 %v1632_v20 }
 0x5fa   : > { %6937 = vtanh.f32 %v1637_v36 }
 0x5fc   : > { %v6932_v52 = vpop.eup %6931 }
 0x5fd   : > { %v6934_v57 = vpop.eup %6933  ;;  %6597 = vmatprep.mubr.msk.f32.mxu1 %vm636_vm1, %v6932_v52  ;;  %v6541_v37 = vpop.f32.mrb[40].mxu0 }
 0x5fe   : > { %6598 = vmatmul.mubr.msk.f32.gmra.mrb[32].mxu1 %vm636_vm1, %v6934_v57  ;;  %v1647_v58 = vadd.f32 %v6541_v37, %v8073_v0  ;;  %v1641_v38 = vpop.f32.mrb[41].mxu0 }
 0x5ff   : > { %v1642_v26 = vadd.f32 %v8073_v0, %v1641_v38 }
 0x601   : > { %6939 = vtanh.f32 %v1642_v26 }
 0x602   : > { %6941 = vtanh.f32 %v1647_v58 }
 0x603   : > { %v6936_v10 = vpop.eup %6935 }
 0x604   : > { %v6938_v46 = vpop.eup %6937  ;;  %6600 = vmatprep.mubr.msk.f32.mxu1 %vm636_vm1, %v6936_v10 }
 0x605   : > { %v6544_v18 = vpop.f32.mrb[42].mxu0  ;;  %6601 = vmatmul.mubr.msk.f32.gmra.mrb[34].mxu1 %vm636_vm1, %v6938_v46 }
 0x606   : > { %v1657_v53 = vadd.f32 %v6544_v18, %v8073_v0  ;;  %v1651_v51 = vpop.f32.mrb[43].mxu0 }
 0x607   : > { %v1652_v29 = vadd.f32 %v8073_v0, %v1651_v51 }
 0x609   : > { %6943 = vtanh.f32 %v1652_v29 }
 0x60a   : > { %6945 = vtanh.f32 %v1657_v53 }
 0x60b   : > { %v6940_v41 = vpop.eup %6939 }
 0x60c   : > { %v6942_v61 = vpop.eup %6941  ;;  %6603 = vmatprep.mubr.msk.f32.mxu1 %vm636_vm1, %v6940_v41 }
 0x60d   : > { %v6547_v60 = vpop.f32.mrb[44].mxu0  ;;  %6604 = vmatmul.mubr.msk.f32.gmra.mrb[36].mxu1 %vm636_vm1, %v6942_v61 }
 0x60e   : > { %v1667_v19 = vadd.f32 %v6547_v60, %v8073_v0  ;;  %v1661_v31 = vpop.f32.mrb[45].mxu0 }
 0x60f   : > { %v1662_v48 = vadd.f32 %v8073_v0, %v1661_v31 }
 0x611   : > { %6947 = vtanh.f32 %v1662_v48 }
 0x612   : > { %6949 = vtanh.f32 %v1667_v19 }
 0x613   : > { %v6944_v32 = vpop.eup %6943 }
 0x614   : > { %v6946_v33 = vpop.eup %6945  ;;  %6606 = vmatprep.mubr.msk.f32.mxu1 %vm636_vm1, %v6944_v32 }
 0x615   : > { %v6550_v50 = vpop.f32.mrb[46].mxu0  ;;  %6607 = vmatmul.mubr.msk.f32.gmra.mrb[38].mxu1 %vm636_vm1, %v6946_v33 }
 0x616   : > { %v1677_v9 = vadd.f32 %v6550_v50, %v8073_v0  ;;  %v1671_v40 = vpop.f32.mrb[47].mxu0 }
 0x617   : > { %v1672_v54 = vadd.f32 %v8073_v0, %v1671_v40 }
 0x619   : > { %6951 = vtanh.f32 %v1672_v54 }
 0x61a   : > { %6953 = vtanh.f32 %v1677_v9 }
 0x61b   : > { %v6948_v23 = vpop.eup %6947 }
 0x61c   : > { %v6950_v47 = vpop.eup %6949  ;;  %6609 = vmatprep.mubr.msk.f32.mxu1 %vm636_vm1, %v6948_v23 }
 0x61d   : > { %v6553_v14 = vpop.f32.mrb[48].mxu0  ;;  %6610 = vmatmul.mubr.msk.f32.gmra.mrb[40].mxu1 %vm636_vm1, %v6950_v47 }
 0x61e   : > { %v1687_v11 = vadd.f32 %v6553_v14, %v8073_v0  ;;  %v1681_v36 = vpop.f32.mrb[49].mxu0 }
 0x61f   : > { %v1682_v22 = vadd.f32 %v8073_v0, %v1681_v36 }
 0x621   : > { %6955 = vtanh.f32 %v1682_v22 }
 0x622   : > { %6957 = vtanh.f32 %v1687_v11 }
 0x623   : > { %v6952_v20 = vpop.eup %6951 }
 0x624   : > { %v6954_v52 = vpop.eup %6953  ;;  %6612 = vmatprep.mubr.msk.f32.mxu1 %vm636_vm1, %v6952_v20 }
 0x625   : > { %v6556_v57 = vpop.f32.mrb[50].mxu0  ;;  %6613 = vmatmul.mubr.msk.f32.gmra.mrb[42].mxu1 %vm636_vm1, %v6954_v52 }
 0x626   : > { %v1697_v37 = vadd.f32 %v6556_v57, %v8073_v0  ;;  %v1691_v58 = vpop.f32.mrb[51].mxu0 }
 0x627   : > { %v1692_v38 = vadd.f32 %v8073_v0, %v1691_v58 }
 0x629   : > { %6959 = vtanh.f32 %v1692_v38 }
 0x62a   : > { %6961 = vtanh.f32 %v1697_v37 }
 0x62b   : > { %v6956_v26 = vpop.eup %6955 }
 0x62c   : > { %v6958_v10 = vpop.eup %6957  ;;  %6615 = vmatprep.mubr.msk.f32.mxu1 %vm636_vm1, %v6956_v26 }
 0x62d   : > { %v6559_v46 = vpop.f32.mrb[52].mxu0  ;;  %6616 = vmatmul.mubr.msk.f32.gmra.mrb[44].mxu1 %vm636_vm1, %v6958_v10 }
 0x62e   : > { %v1707_v18 = vadd.f32 %v6559_v46, %v8073_v0  ;;  %v1701_v53 = vpop.f32.mrb[53].mxu0 }
 0x62f   : > { %v1702_v51 = vadd.f32 %v8073_v0, %v1701_v53 }
 0x631   : > { %6963 = vtanh.f32 %v1702_v51 }
 0x632   : > { %6965 = vtanh.f32 %v1707_v18 }
 0x633   : > { %v6960_v29 = vpop.eup %6959 }
 0x634   : > { %v6962_v41 = vpop.eup %6961  ;;  %6618 = vmatprep.mubr.msk.f32.mxu1 %vm636_vm1, %v6960_v29 }
 0x635   : > { %v6562_v61 = vpop.f32.mrb[54].mxu0  ;;  %6619 = vmatmul.mubr.msk.f32.gmra.mrb[46].mxu1 %vm636_vm1, %v6962_v41 }
 0x636   : > { %v1717_v60 = vadd.f32 %v6562_v61, %v8073_v0  ;;  %v1711_v19 = vpop.f32.mrb[55].mxu0 }
 0x637   : > { %v1712_v31 = vadd.f32 %v8073_v0, %v1711_v19 }
 0x639   : > { %6967 = vtanh.f32 %v1712_v31 }
 0x63a   : > { %6969 = vtanh.f32 %v1717_v60 }
 0x63b   : > { %v6964_v48 = vpop.eup %6963 }
 0x63c   : > { %v6966_v32 = vpop.eup %6965  ;;  %6621 = vmatprep.mubr.msk.f32.mxu1 %vm636_vm1, %v6964_v48 }
 0x63d   : > { %v6565_v33 = vpop.f32.mrb[56].mxu0  ;;  %6622 = vmatmul.mubr.msk.f32.gmra.mrb[48].mxu1 %vm636_vm1, %v6966_v32 }
 0x63e   : > { %v1727_v50 = vadd.f32 %v6565_v33, %v8073_v0  ;;  %v1721_v9 = vpop.f32.mrb[57].mxu0 }
 0x63f   : > { %v1722_v40 = vadd.f32 %v8073_v0, %v1721_v9 }
 0x641   : > { %6971 = vtanh.f32 %v1722_v40 }
 0x642   : > { %6973 = vtanh.f32 %v1727_v50  ;;  %v8142_v50 = vld [vmem:[%s9729_s4 + $0x1] ss:$0 sm:$0xff] }
 0x643   : > { %v6968_v54 = vpop.eup %6967 }
 0x644   : > { %v6970_v23 = vpop.eup %6969  ;;  %6624 = vmatprep.mubr.msk.f32.mxu1 %vm636_vm1, %v6968_v54 }
 0x645   : > { %6625 = vmatmul.mubr.msk.f32.gmra.mrb[50].mxu1 %vm636_vm1, %v6970_v23 }
 0x64b   : > { %v6972_v47 = vpop.eup %6971 }
 0x64c   : > { %v6974_v11 = vpop.eup %6973  ;;  %6627 = vmatprep.mubr.msk.f32.mxu1 %vm636_vm1, %v6972_v47 }
 0x64d   : > { %v6568_v14 = vpop.f32.mrb[58].mxu0  ;;  %6628 = vmatmul.mubr.msk.f32.gmra.mrb[52].mxu1 %vm636_vm1, %v6974_v11 }
 0x64e   : > { %v1737_v36 = vadd.f32 %v6568_v14, %v8073_v0  ;;  %v1731_v22 = vpop.f32.mrb[59].mxu0 }
 0x64f   : > { %v1732_v20 = vadd.f32 %v8073_v0, %v1731_v22 }
 0x651   : > { %6975 = vtanh.f32 %v1732_v20 }
 0x652   : > { %6977 = vtanh.f32 %v1737_v36 }
 0x655   : > { %v6571_v52 = vpop.f32.mrb[60].mxu0 }
 0x656   : > { %v1747_v57 = vadd.f32 %v6571_v52, %v8073_v0  ;;  %v1741_v37 = vpop.f32.mrb[61].mxu0 }
 0x657   : > { %v1742_v58 = vadd.f32 %v8073_v0, %v1741_v37 }
 0x659   : > { %6979 = vtanh.f32 %v1742_v58 }
 0x65a   : > { %6981 = vtanh.f32 %v1747_v57 }
 0x65b   : > { %v6976_v38 = vpop.eup %6975 }
 0x65c   : > { %v6978_v26 = vpop.eup %6977  ;;  %6630 = vmatprep.mubr.msk.f32.mxu1 %vm636_vm1, %v6976_v38 }
 0x65d   : > { %v6574_v10 = vpop.f32.mrb[62].mxu0  ;;  %6631 = vmatmul.mubr.msk.f32.gmra.mrb[54].mxu1 %vm636_vm1, %v6978_v26 }
 0x65e   : > { %v1757_v46 = vadd.f32 %v6574_v10, %v8073_v0  ;;  %v1751_v18 = vpop.f32.mrb[63].mxu0 }
 0x65f   : > { %v1752_v53 = vadd.f32 %v8073_v0, %v1751_v18 }
 0x661   : > { %6983 = vtanh.f32 %v1752_v53 }
 0x662   : > { %6985 = vtanh.f32 %v1757_v46 }
 0x663   : > { %v6980_v51 = vpop.eup %6979 }
 0x664   : > { %v6982_v29 = vpop.eup %6981  ;;  %6633 = vmatprep.mubr.msk.f32.mxu1 %vm636_vm1, %v6980_v51 }
 0x665   : > { %v6577_v41 = vpop.f32.mrb[64].mxu0  ;;  %6634 = vmatmul.mubr.msk.f32.gmra.mrb[56].mxu1 %vm636_vm1, %v6982_v29 }
 0x666   : > { %v1767_v61 = vadd.f32 %v6577_v41, %v8073_v0  ;;  %v1761_v60 = vpop.f32.mrb[65].mxu0 }
 0x667   : > { %v1762_v19 = vadd.f32 %v8073_v0, %v1761_v60 }
 0x669   : > { %6987 = vtanh.f32 %v1762_v19 }
 0x66a   : > { %6989 = vtanh.f32 %v1767_v61 }
 0x66b   : > { %v6984_v31 = vpop.eup %6983 }
 0x66c   : > { %v6986_v48 = vpop.eup %6985  ;;  %6636 = vmatprep.mubr.msk.f32.mxu1 %vm636_vm1, %v6984_v31 }
 0x66d   : > { %6637 = vmatmul.mubr.msk.f32.gmra.mrb[58].mxu1 %vm636_vm1, %v6986_v48 }
 0x673   : > { %v6988_v32 = vpop.eup %6987 }
 0x674   : > { %v6990_v33 = vpop.eup %6989  ;;  %6639 = vmatprep.mubr.msk.f32.mxu1 %vm636_vm1, %v6988_v32 }
 0x675   : > { %6640 = vmatmul.mubr.msk.f32.gmra.mrb[60].mxu1 %vm636_vm1, %v6990_v33 }
 0x6c9   : > { %v6596_v0 = vpop.f32.mrb[30].mxu1 }
 0x6ca   : > { %v1987_v9 = vadd.f32 %v6596_v0, %v8142_v50  ;;  %v1981_v40 = vpop.f32.mrb[31].mxu1 }
 0x6cb   : > { %v1982_v54 = vadd.f32 %v8142_v50, %v1981_v40 }
 0x6cc   : > { %2302 = vrot.lane.b32.xlu0 %v1987_v9, %s7248_s8 }
 0x6cd   : > { %2300 = vrot.lane.b32.xlu1 %v1982_v54, %s7248_s8  ;;  %6991 = vtanh.f32 %v1982_v54 }
 0x6ce   : > { %6993 = vtanh.f32 %v1987_v9 }
 0x6d1   : > { %v6599_v23 = vpop.f32.mrb[32].mxu1 }
 0x6d2   : > { %v1997_v47 = vadd.f32 %v6599_v23, %v8142_v50  ;;  %v1991_v14 = vpop.f32.mrb[33].mxu1 }
 0x6d3   : > { %v1992_v11 = vadd.f32 %v8142_v50, %v1991_v14 }
 0x6d4   : > { %2306 = vrot.lane.b32.xlu1 %v1997_v47, %s7248_s8  ;;  %6995 = vtanh.f32 %v1997_v47 }
 0x6d5   : > { %6997 = vtanh.f32 %v1992_v11 }
 0x6d7   : > { %v8160_v29 = vpop.eup %6991 }
 0x6d8   : > { %2304 = vrot.lane.b32.xlu1 %v1992_v11, %s7248_s8  ;;  %v6602_v36 = vpop.f32.mrb[34].mxu1  ;;  %v8164_v60 = vpop.eup %6993  ;;  %v2428_v19 = vsel %vm267_vm0, %v8160_v29, 0.0 }
 0x6d9   : > { %v2007_v22 = vadd.f32 %v6602_v36, %v8142_v50  ;;  %v2001_v20 = vpop.f32.mrb[35].mxu1  ;;  %v2431_v48 = vsel %vm267_vm0, %v8164_v60, 0.0 }
 0x6da   : > { %v2002_v52 = vadd.f32 %v8142_v50, %v2001_v20 }
 0x6db   : > { %6999 = vtanh.f32 %v2007_v22 }
 0x6dc   : > { %2310 = vrot.lane.b32.xlu1 %v2007_v22, %s7248_s8  ;;  %2308 = vrot.lane.b32.xlu0 %v2002_v52, %s7248_s8  ;;  %7001 = vtanh.f32 %v2002_v52 }
 0x6de   : > { %v8168_v31 = vpop.eup %6995 }
 0x6df   : > { %v2437_v32 = vsel %vm267_vm0, %v8168_v31, 0.0 }
 0x6e0   : > { %v6605_v57 = vpop.f32.mrb[36].mxu1 }
 0x6e1   : > { %v2017_v37 = vadd.f32 %v6605_v57, %v8142_v50  ;;  %v2011_v58 = vpop.f32.mrb[37].mxu1 }
 0x6e2   : > { %v2012_v38 = vadd.f32 %v8142_v50, %v2011_v58 }
 0x6e3   : > { %2314 = vrot.lane.b32.xlu1 %v2017_v37, %s7248_s8  ;;  %7003 = vtanh.f32 %v2017_v37 }
 0x6e4   : > { %2312 = vrot.lane.b32.xlu0 %v2012_v38, %s7248_s8  ;;  %7005 = vtanh.f32 %v2012_v38 }
 0x6e8   : > { %v6608_v26 = vpop.f32.mrb[38].mxu1 }
 0x6e9   : > { %v2021_v10 = vpop.f32.mrb[39].mxu1  ;;  %v2027_v54 = vadd.f32 %v6608_v26, %v8142_v50 }
 0x6ea   : > { %v2022_v36 = vadd.f32 %v8142_v50, %v2021_v10  ;;  %v8202_v10 = vpop.eup %6997 }
 0x6eb   : > { %7007 = vtanh.f32 %v2027_v54 }
 0x6ec   : > { %7009 = vtanh.f32 %v2022_v36 }
 0x6f0   : > { %v6611_v46 = vpop.f32.mrb[40].mxu1 }
 0x6f1   : > { %v2031_v18 = vpop.f32.mrb[41].mxu1  ;;  %v2037_v14 = vadd.f32 %v6611_v46, %v8142_v50 }
 0x6f3   : > { %7011 = vtanh.f32 %v2037_v14 }
 0x6f8   : > { %v6614_v53 = vpop.f32.mrb[42].mxu1 }
 0x6f9   : > { %v2041_v51 = vpop.f32.mrb[43].mxu1  ;;  %v2047_v55 = vadd.f32 %v6614_v53, %v8142_v50 }
 0x700   : > { %v6617_v41 = vpop.f32.mrb[44].mxu1 }
 0x701   : > { %v8162_v61 = vpop.f32.mrb[45].mxu1  ;;  %v2057_v53 = vadd.f32 %v6617_v41, %v8142_v50 }
 0x703   : > { %2429 = vadd.xlane.f32.xlu0 %v2428_v19 }
 0x707   : > { %2432 = vadd.xlane.f32.xlu1 %v2431_v48  ;;  %2438 = vadd.xlane.f32.xlu0 %v2437_v32  ;;  %v8204_v48 = vpop.eup %6999  ;;  %v2434_v32 = vsel %vm267_vm0, %v8202_v10, 0.0 }
 0x708   : > { %v6620_v33 = vpop.f32.mrb[46].mxu1  ;;  %v8208_v7 = vpop.eup %7001  ;;  %v2443_v52 = vsel %vm267_vm0, %v8204_v48, 0.0 }
 0x709   : > { %v8174_v0 = vpop.f32.mrb[47].mxu1  ;;  %v2440_v22 = vsel %vm267_vm0, %v8208_v7, 0.0  ;;  %v8226_v62 = vpop.eup %7003  ;;  %v2067_v41 = vadd.f32 %v6620_v33, %v8142_v50 }
 0x70a   : > { %v8228_v45 = vpop.eup %7005 }
 0x70b   : > { %v8238_v37 = vpop.eup %7007 }
 0x70c   : > { %v8240_v38 = vpop.eup %7009 }
 0x70d   : > { %v2452_v56 = vsel %vm267_vm0, %v8240_v38, 0.0  ;;  %v2188_v4 = vmul.f32 1.442695, %v8240_v38  ;;  %v7152_v38 = vld [vmem:[%s7352_s30 + $0x10] sm:$0xff] }
 0x710   : > { %v8176_v9 = vpop.f32.mrb[48].mxu1 }
 0x711   : > { %v8178_v40 = vpop.f32.mrb[49].mxu1  ;;  %v2077_v33 = vadd.f32 %v8176_v9, %v8142_v50 }
 0x718   : > { %2318 = vrot.lane.b32.xlu1 %v2027_v54, %s7248_s8  ;;  %v8182_v23 = vpop.f32.mrb[50].mxu1  ;;  %v8251_v54 = vpop.eup %7011 }
 0x719   : > { %v8184_v47 = vpop.f32.mrb[51].mxu1  ;;  %v2087_v9 = vadd.f32 %v8182_v23, %v8142_v50 }
 0x71c   : > { %2322 = vrot.lane.b32.xlu1 %v2037_v14, %s7248_s8 }
 0x71d   : > { %2316 = vrot.lane.b32.xlu0 %v2022_v36, %s7248_s8 }
 0x720   : > { %v8190_v20 = vpop.f32.mrb[52].mxu1 }
 0x721   : > { %v8192_v57 = vpop.f32.mrb[53].mxu1  ;;  %v2097_v23 = vadd.f32 %v8190_v20, %v8142_v50 }
 0x730   : > { %v8194_v58 = vpop.f32.mrb[54].mxu1 }
 0x731   : > { %v8196_v26 = vpop.f32.mrb[55].mxu1  ;;  %v8303_v20 = vadd.f32 %v8194_v58, %v8142_v50 }
 0x738   : > { %v8198_v19 = vpop.f32.mrb[56].mxu1 }
 0x739   : > { %v8200_v46 = vpop.f32.mrb[57].mxu1 }
 0x73c   : > { %2435 = vadd.xlane.f32.xlu0 %v2434_v32  ;;  %v2032_v32 = vadd.f32 %v8142_v50, %v2031_v18  ;;  %v2042_v18 = vadd.f32 %v8142_v50, %v2041_v51  ;;  %v2052_v51 = vadd.f32 %v8142_v50, %v8162_v61  ;;  %v2062_v61 = vadd.f32 %v8142_v50, %v8174_v0 }
 0x73e   : > { %7013 = vtanh.f32 %v2032_v32 }
 0x73f   : > { %7015 = vtanh.f32 %v2047_v55 }
 0x740   : > { %v8210_v11 = vpop.f32.mrb[58].mxu1  ;;  %2441 = vadd.xlane.f32.xlu1 %v2440_v22  ;;  %2444 = vadd.xlane.f32.xlu0 %v2443_v52  ;;  %v2446_v22 = vsel %vm267_vm0, %v8228_v45, 0.0  ;;  %v2449_v52 = vsel %vm267_vm0, %v8226_v62, 0.0  ;;  %7017 = vtanh.f32 %v2042_v18 }
 0x741   : > { %v8216_v44 = vpop.f32.mrb[59].mxu1  ;;  %7019 = vtanh.f32 %v2057_v53 }
 0x742   : > { %7021 = vtanh.f32 %v2052_v51 }
 0x743   : > { %7023 = vtanh.f32 %v2067_v41 }
 0x744   : > { %7025 = vtanh.f32 %v2062_v61 }
 0x745   : > { %7027 = vtanh.f32 %v2077_v33 }
 0x748   : > { %v8218_v30 = vpop.f32.mrb[60].mxu1  ;;  %v8253_v36 = vpop.eup %7013 }
 0x749   : > { %v8220_v1 = vpop.f32.mrb[61].mxu1  ;;  %v8265_v14 = vpop.eup %7015 }
 0x74a   : > { %v8462_v39 = vadd.f32 %v8142_v50, %v8220_v1 }
 0x751   : > { %2326 = vrot.lane.b32.xlu1 %v2047_v55, %s7248_s8  ;;  %v2072_v55 = vadd.f32 %v8142_v50, %v8178_v40  ;;  %v2082_v40 = vadd.f32 %v8142_v50, %v8184_v47  ;;  %v2092_v47 = vadd.f32 %v8142_v50, %v8192_v57  ;;  %v8324_v57 = vadd.f32 %v8198_v19, %v8142_v50 }
 0x753   : > { %7029 = vtanh.f32 %v2072_v55 }
 0x754   : > { %7031 = vtanh.f32 %v2087_v9 }
 0x755   : > { %7033 = vtanh.f32 %v2082_v40 }
 0x756   : > { %2320 = vrot.lane.b32.xlu0 %v2032_v32, %s7248_s8  ;;  %v8267_v32 = vpop.eup %7017  ;;  %7035 = vtanh.f32 %v2097_v23 }
 0x757   : > { %v8279_v0 = vpop.eup %7019  ;;  %7037 = vtanh.f32 %v2092_v47 }
 0x758   : > { %7039 = vtanh.f32 %v8303_v20 }
 0x775   : > { %2447 = vadd.xlane.f32.xlu1 %v2446_v22  ;;  %2450 = vadd.xlane.f32.xlu0 %v2449_v52  ;;  %v2455_v22 = vsel %vm267_vm0, %v8238_v37, 0.0  ;;  %v2458_v52 = vsel %vm267_vm0, %v8253_v36, 0.0 }
 0x786   : > { %2330 = vrot.lane.b32.xlu1 %v2057_v53, %s7248_s8 }
 0x78b   : > { %2324 = vrot.lane.b32.xlu0 %v2042_v18, %s7248_s8  ;;  %v8281_v18 = vpop.eup %7021 }
 0x78c   : > { %v8293_v53 = vpop.eup %7023 }
 0x7aa   : > { %2453 = vadd.xlane.f32.xlu1 %v2452_v56  ;;  %2456 = vadd.xlane.f32.xlu0 %v2455_v22  ;;  %v2461_v56 = vsel %vm267_vm0, %v8251_v54, 0.0  ;;  %v2464_v22 = vsel %vm267_vm0, %v8267_v32, 0.0 }
 0x7bb   : > { %2334 = vrot.lane.b32.xlu1 %v2067_v41, %s7248_s8 }
 0x7c0   : > { %2328 = vrot.lane.b32.xlu0 %v2052_v51, %s7248_s8  ;;  %v8295_v51 = vpop.eup %7025 }
 0x7c1   : > { %v8310_v41 = vpop.eup %7027 }
 0x7c2   : > { %v2485_v58 = vsel %vm267_vm0, %v8310_v41, 0.0 }
 0x7df   : > { %2459 = vadd.xlane.f32.xlu1 %v2458_v52  ;;  %2462 = vadd.xlane.f32.xlu0 %v2461_v56  ;;  %v2467_v52 = vsel %vm267_vm0, %v8265_v14, 0.0  ;;  %v2470_v56 = vsel %vm267_vm0, %v8281_v18, 0.0 }
 0x7f0   : > { %2338 = vrot.lane.b32.xlu1 %v2077_v33, %s7248_s8  ;;  %v8330_v33 = vadd.f32 %v8142_v50, %v8196_v26 }
 0x7f2   : > { %7041 = vtanh.f32 %v8330_v33 }
 0x7f5   : > { %2332 = vrot.lane.b32.xlu0 %v2062_v61, %s7248_s8  ;;  %v8312_v61 = vpop.eup %7029 }
 0x7f6   : > { %v8344_v24 = vpop.eup %7031 }
 0x7f7   : > { %v8346_v27 = vpop.eup %7033 }
 0x7f8   : > { %v2488_v34 = vsel %vm267_vm0, %v8346_v27, 0.0 }
 0x814   : > { %2465 = vadd.xlane.f32.xlu1 %v2464_v22  ;;  %2468 = vadd.xlane.f32.xlu0 %v2467_v52  ;;  %v2473_v22 = vsel %vm267_vm0, %v8279_v0, 0.0  ;;  %v2476_v52 = vsel %vm267_vm0, %v8295_v51, 0.0 }
 0x825   : > { %2342 = vrot.lane.b32.xlu1 %v2087_v9, %s7248_s8 }
 0x82a   : > { %2336 = vrot.lane.b32.xlu0 %v2072_v55, %s7248_s8 }
 0x849   : > { %2471 = vadd.xlane.f32.xlu1 %v2470_v56  ;;  %2474 = vadd.xlane.f32.xlu0 %v2473_v22  ;;  %v2479_v56 = vsel %vm267_vm0, %v8293_v53, 0.0  ;;  %v2482_v22 = vsel %vm267_vm0, %v8312_v61, 0.0 }
 0x85a   : > { %2346 = vrot.lane.b32.xlu1 %v2097_v23, %s7248_s8 }
 0x85f   : > { %2340 = vrot.lane.b32.xlu0 %v2082_v40, %s7248_s8 }
 0x87e   : > { %2477 = vadd.xlane.f32.xlu1 %v2476_v52  ;;  %2480 = vadd.xlane.f32.xlu0 %v2479_v56  ;;  %v8318_v52 = vpop.xlane.xlu0 %2845 }
 0x87f   : > { %9768 = vst [vmem:[#allocation33_spill] sm:$0xff] %v8318_v52 }
 0x882   : > { %v8320_v56 = vpop.xlane.xlu0 %2854 }
 0x883   : > { %9769 = vst [vmem:[#allocation34_spill] sm:$0xff] %v8320_v56 }
 0x886   : > { %v8332_v55 = vpop.xlane.xlu0 %2851 }
 0x887   : > { %9770 = vst [vmem:[#allocation35_spill] sm:$0xff] %v8332_v55  ;;  %v8350_v55 = vpop.permute.xlu1 %2810 }
 0x88b   : > { %v8356_v9 = vpop.xlane.xlu1 %2848 }
 0x88c   : > { %9776 = vst [vmem:[#allocation41_spill] sm:$0xff] %v8356_v9 }
 0x88f   : > { %2350 = vrot.lane.b32.xlu1 %v8303_v20, %s7248_s8 }
 0x894   : > { %2344 = vrot.lane.b32.xlu0 %v2092_v47, %s7248_s8 }
 0x8b3   : > { %2483 = vadd.xlane.f32.xlu1 %v2482_v22  ;;  %2486 = vadd.xlane.f32.xlu0 %v2485_v58  ;;  %v8336_v22 = vpop.xlane.xlu0 %2860 }
 0x8b4   : > { %9771 = vst [vmem:[#allocation36_spill] sm:$0xff] %v8336_v22 }
 0x8b7   : > { %v8338_v58 = vpop.xlane.xlu0 %2866 }
 0x8b8   : > { %9772 = vst [vmem:[#allocation37_spill] sm:$0xff] %v8338_v58  ;;  %v2491_v58 = vsel %vm267_vm0, %v8344_v24, 0.0 }
 0x8bb   : > { %v8340_v56 = vpop.xlane.xlu0 %2872 }
 0x8bc   : > { %9773 = vst [vmem:[#allocation38_spill] sm:$0xff] %v8340_v56 }
 0x8bf   : > { %v8342_v19 = vpop.xlane.xlu0 %2878 }
 0x8c0   : > { %9774 = vst [vmem:[#allocation39_spill] sm:$0xff] %v8342_v19  ;;  %v8360_v19 = vpop.xlane.xlu1 %2857 }
 0x8c1   : > { %9778 = vst [vmem:[#allocation43_spill] sm:$0xff] %v8360_v19 }
 0x8c3   : > { %v8348_v26 = vpop.xlane.xlu0 %2884 }
 0x8c4   : > { %2354 = vrot.lane.b32.xlu1 %v8324_v57, %s7248_s8  ;;  %9775 = vst [vmem:[#allocation40_spill] sm:$0xff] %v8348_v26  ;;  %v8364_v22 = vpop.xlane.xlu1 %2863  ;;  %v8368_v26 = vadd.f32 %v8210_v11, %v8142_v50 }
 0x8c5   : > { %9780 = vst [vmem:[#allocation45_spill] sm:$0xff] %v8364_v22 }
 0x8c7   : > { %v8358_v40 = vpop.xlane.xlu0 %2893 }
 0x8c8   : > { %9777 = vst [vmem:[#allocation42_spill] sm:$0xff] %v8358_v40 }
 0x8c9   : > { %2348 = vrot.lane.b32.xlu0 %v8330_v33, %s7248_s8 }
 0x8cb   : > { %v8362_v56 = vpop.xlane.xlu0 %2899 }
 0x8cc   : > { %9779 = vst [vmem:[#allocation44_spill] sm:$0xff] %v8362_v56 }
 0x8cf   : > { %v8370_v15 = vpop.xlane.xlu0 %2905 }
 0x8d0   : > { %9781 = vst [vmem:[#allocation46_spill] sm:$0xff] %v8370_v15 }
 0x8d3   : > { %v8378_v9 = vpop.xlane.xlu0 %2911 }
 0x8d4   : > { %9783 = vst [vmem:[#allocation48_spill] sm:$0xff] %v8378_v9 }
 0x8d7   : > { %v8381_v56 = vpop.xlane.xlu0 %2917 }
 0x8d8   : > { %9784 = vst [vmem:[#allocation49_spill] sm:$0xff] %v8381_v56  ;;  %v8401_v56 = vpop.eup %7035 }
 0x8d9   : > { %v2497_v47 = vsel %vm267_vm0, %v8401_v56, 0.0 }
 0x8db   : > { %v8385_v11 = vpop.xlane.xlu0 %2923 }
 0x8dc   : > { %9786 = vst [vmem:[#allocation51_spill] sm:$0xff] %v8385_v11 }
 0x8df   : > { %v8389_v15 = vpop.xlane.xlu0 %2929 }
 0x8e0   : > { %9788 = vst [vmem:[#allocation53_spill] sm:$0xff] %v8389_v15 }
 0x8e3   : > { %v8391_v19 = vpop.xlane.xlu0 %2935 }
 0x8e4   : > { %9789 = vst [vmem:[#allocation54_spill] sm:$0xff] %v8391_v19 }
 0x8e8   : > { %2489 = vadd.xlane.f32.xlu1 %v2488_v34  ;;  %2492 = vadd.xlane.f32.xlu0 %v2491_v58  ;;  %v2112_v34 = vadd.f32 %v8142_v50, %v8200_v46  ;;  %v8376_v58 = vpop.xlane.xlu1 %2869 }
 0x8e9   : > { %9782 = vst [vmem:[#allocation47_spill] sm:$0xff] %v8376_v58  ;;  %v8395_v58 = vpop.permute.xlu0 %2302 }
 0x8ea   : > { %7043 = vtanh.f32 %v2112_v34 }
 0x8ec   : > { %v8383_v40 = vpop.xlane.xlu1 %2875 }
 0x8ed   : > { %9785 = vst [vmem:[#allocation50_spill] sm:$0xff] %v8383_v40  ;;  %v8399_v42 = vpop.permute.xlu0 %2308  ;;  %v8403_v40 = vpop.eup %7037 }
 0x8ee   : > { %v2494_v23 = vsel %vm267_vm0, %v8403_v40, 0.0  ;;  %v8464_v20 = vpop.eup %7039 }
 0x8ef   : > { %v8466_v33 = vpop.eup %7041  ;;  %v2503_v1 = vsel %vm267_vm0, %v8464_v20, 0.0 }
 0x8f0   : > { %v8387_v22 = vpop.xlane.xlu1 %2881 }
 0x8f1   : > { %9787 = vst [vmem:[#allocation52_spill] sm:$0xff] %v8387_v22  ;;  %v8405_v11 = vpop.permute.xlu0 %2312 }
 0x8f4   : > { %v8393_v46 = vpop.xlane.xlu1 %2890 }
 0x8f5   : > { %9790 = vst [vmem:[#allocation55_spill] sm:$0xff] %v8393_v46  ;;  %v8413_v19 = vpop.xlane.xlu0 %2429 }
 0x8f8   : > { %v8397_v9 = vpop.xlane.xlu1 %2887 }
 0x8f9   : > { %2358 = vrot.lane.b32.xlu1 %v8368_v26, %s7248_s8  ;;  %9791 = vst [vmem:[#allocation56_spill] sm:$0xff] %v8397_v9  ;;  %v8417_v46 = vpop.xlane.xlu0 %2438 }
 0x8fc   : > { %v8407_v22 = vpop.xlane.xlu1 %2896 }
 0x8fd   : > { %9792 = vst [vmem:[#allocation57_spill] sm:$0xff] %v8407_v22  ;;  %v8421_v17 = vpop.permute.xlu0 %2316  ;;  %v8427_v22 = vadd.f32 %v8218_v30, %v8142_v50 }
 0x8fe   : > { %2352 = vrot.lane.b32.xlu0 %v2112_v34, %s7248_s8 }
 0x900   : > { %v8415_v15 = vpop.xlane.xlu1 %2902 }
 0x901   : > { %9793 = vst [vmem:[#allocation58_spill] sm:$0xff] %v8415_v15  ;;  %v8429_v28 = vpop.xlane.xlu0 %2435 }
 0x902   : > { %9796 = vst [vmem:[#allocation61_spill] sm:$0xff] %v8429_v28 }
 0x904   : > { %v8419_v9 = vpop.xlane.xlu1 %2908 }
 0x905   : > { %9794 = vst [vmem:[#allocation59_spill] sm:$0xff] %v8419_v9  ;;  %v8440_v9 = vpop.xlane.xlu0 %2444 }
 0x906   : > { %9799 = vst [vmem:[#allocation64_spill] sm:$0xff] %v8440_v9 }
 0x908   : > { %v8423_v49 = vpop.xlane.xlu1 %2914 }
 0x909   : > { %9795 = vst [vmem:[#allocation60_spill] sm:$0xff] %v8423_v49  ;;  %v8444_v30 = vpop.permute.xlu0 %2320 }
 0x90d   : > { %v8446_v3 = vpop.xlane.xlu0 %2450 }
 0x90e   : > { %9801 = vst [vmem:[#allocation66_spill] sm:$0xff] %v8446_v3 }
 0x91d   : > { %2495 = vadd.xlane.f32.xlu1 %v2494_v23  ;;  %2498 = vadd.xlane.f32.xlu0 %v2497_v47  ;;  %v8433_v23 = vpop.xlane.xlu1 %2920  ;;  %v2122_v47 = vadd.f32 %v8142_v50, %v8216_v44  ;;  %v8452_v44 = vpop.permute.xlu0 %2324 }
 0x91e   : > { %9797 = vst [vmem:[#allocation62_spill] sm:$0xff] %v8433_v23  ;;  %v2172_v23 = vmul.f32 1.442695, %v8160_v29  ;;  %v2180_v29 = vmul.f32 1.442695, %v8208_v7  ;;  %v8478_v50 = vpop.eup %7043 }
 0x920   : > { %7045 = vpow2.f32 %v2172_v23 }
 0x921   : > { %v8437_v15 = vpop.xlane.xlu1 %2926  ;;  %v8455_v21 = vpop.xlane.xlu0 %2456  ;;  %7047 = vtanh.f32 %v2122_v47 }
 0x922   : > { %9798 = vst [vmem:[#allocation63_spill] sm:$0xff] %v8437_v15  ;;  %9802 = vst [vmem:[#allocation67_spill] sm:$0xff] %v8455_v21  ;;  %v2506_v21 = vsel %vm267_vm0, %v8478_v50, 0.0 }
 0x925   : > { %v8442_v49 = vpop.xlane.xlu1 %2932  ;;  %v8469_v34 = vpop.permute.xlu0 %2328 }
 0x926   : > { %9800 = vst [vmem:[#allocation65_spill] sm:$0xff] %v8442_v49  ;;  %v2176_v49 = vmul.f32 1.442695, %v8202_v10  ;;  %v2500_v10 = vsel %vm267_vm0, %v8466_v33, 0.0 }
 0x928   : > { %7049 = vpow2.f32 %v2176_v49  ;;  %v2184_v49 = vmul.f32 1.442695, %v8228_v45 }
 0x929   : > { %v2301_v43 = vpop.permute.xlu1 %2300  ;;  %7051 = vtanh.f32 %v8462_v39  ;;  %v8481_v23 = vpop.xlane.xlu0 %2462 }
 0x92a   : > { %7053 = vpow2.f32 %v2180_v29  ;;  %9803 = vst [vmem:[#allocation68_spill] sm:$0xff] %v8481_v23  ;;  %v7151_v29 = vld [vmem:[%s7352_s30] sm:$0xff] }
 0x92b   : > { %7055 = vpow2.f32 %v2184_v49  ;;  %v2192_v49 = vmul.f32 1.442695, %v8253_v36 }
 0x92c   : > { %7057 = vpow2.f32 %v2188_v4 }
 0x92d   : > { %v8448_v52 = vpop.permute.xlu1 %2306  ;;  %v8491_v16 = vpop.permute.xlu0 %2332  ;;  %7059 = vpow2.f32 %v2192_v49  ;;  %v7154_v49 = vld [vmem:[%s7352_s30 + $0x30] sm:$0xff] }
 0x92e   : > { %2362 = vrot.lane.b32.xlu1 %v8427_v22, %s7248_s8 }
 0x931   : > { %v2305_v15 = vpop.permute.xlu1 %2304 }
 0x933   : > { %2356 = vrot.lane.b32.xlu0 %v2122_v47, %s7248_s8  ;;  %v7046_v47 = vpop.eup %7045 }
 0x934   : > { %v8487_v13 = vpop.eup %7047  ;;  %v2236_v3 = vmul.f32 %v7151_v29, %v7046_v47  ;;  %v8501_v47 = vpop.xlane.xlu0 %2468 }
 0x935   : > { %v8458_v35 = vpop.permute.xlu1 %2310  ;;  %v7050_v45 = vpop.eup %7049  ;;  %v2512_v23 = vsel %vm267_vm0, %v8487_v13, 0.0 }
 0x936   : > { %v8497_v63 = vpop.eup %7051 }
 0x937   : > { %v7054_v9 = vpop.eup %7053 }
 0x938   : > { %v2240_v4 = vmul.f32 %v7153_v25, %v7054_v9  ;;  %v7056_v36 = vpop.eup %7055 }
 0x939   : > { %v8471_v2 = vpop.permute.xlu1 %2314  ;;  %v7058_v25 = vpop.eup %7057 }
 0x93d   : > { %v8483_v7 = vpop.xlane.xlu1 %2432 }
 0x952   : > { %2501 = vadd.xlane.f32.xlu1 %v2500_v10  ;;  %2504 = vadd.xlane.f32.xlu0 %v2503_v1  ;;  %v2396_v10 = vadd.f32 %v2301_v43, %v2236_v3  ;;  %v8493_v1 = vpop.permute.xlu1 %2318  ;;  %v2518_v43 = vsel %vm267_vm0, %v8497_v63, 0.0  ;;  %v2196_v3 = vmul.f32 1.442695, %v8267_v32  ;;  %v2242_v32 = vmul.f32 %v7154_v49, %v7056_v36 }
 0x954   : > { %v2556_v29 = vmul.f32 %v2396_v10, %v2396_v10  ;;  %7061 = vpow2.f32 %v2196_v3  ;;  %v8512_v10 = vpop.permute.xlu0 %2336 }
 0x956   : > { %2507 = vadd.xlane.f32.xlu1 %v2506_v21  ;;  %v2238_v21 = vmul.f32 %v7152_v38, %v7050_v45  ;;  %v8507_v28 = vpop.permute.xlu1 %2322  ;;  %v2400_v45 = vadd.f32 %v8399_v42, %v2240_v4  ;;  %v2588_v38 = vsel %vm267_vm0, %v2556_v29, 0.0  ;;  %v2204_v42 = vmul.f32 1.442695, %v8295_v51  ;;  %v7060_v4 = vpop.eup %7059 }
 0x957   : > { %v2208_v51 = vmul.f32 1.442695, %v8312_v61  ;;  %v7157_v61 = vld [vmem:[%s7352_s30 + $0x60] sm:$0xff] }
 0x958   : > { %v2398_v6 = vadd.f32 %v2305_v15, %v2238_v21  ;;  %v2200_v15 = vmul.f32 1.442695, %v8281_v18  ;;  %v2560_v9 = vmul.f32 %v2400_v45, %v2400_v45  ;;  %v8520_v29 = vpop.xlane.xlu0 %2474  ;;  %v7155_v18 = vld [vmem:[%s7352_s30 + $0x40] sm:$0xff] }
 0x959   : > { %v2244_v3 = vmul.f32 %v7155_v18, %v7058_v25 }
 0x95a   : > { %2513 = vadd.xlane.f32.xlu1 %v2512_v23  ;;  %v2558_v23 = vmul.f32 %v2398_v6, %v2398_v6  ;;  %v8515_v21 = vpop.xlane.xlu1 %2441  ;;  %7063 = vpow2.f32 %v2200_v15 }
 0x95b   : > { %v2404_v45 = vadd.f32 %v8421_v17, %v2244_v3  ;;  %7065 = vpow2.f32 %v2204_v42 }
 0x95c   : > { %v2594_v6 = vsel %vm267_vm0, %v2558_v23, 0.0  ;;  %v7156_v23 = vld [vmem:[%s7352_s30 + $0x50] sm:$0xff]  ;;  %7067 = vpow2.f32 %v2208_v51 }
 0x95d   : > { %v2246_v15 = vmul.f32 %v7156_v23, %v7060_v4  ;;  %v2564_v25 = vmul.f32 %v2404_v45, %v2404_v45 }
 0x95e   : > { %2519 = vadd.xlane.f32.xlu1 %v2518_v43  ;;  %v2402_v43 = vadd.f32 %v8405_v11, %v2242_v32  ;;  %v2600_v11 = vsel %vm267_vm0, %v2560_v9, 0.0  ;;  %v7062_v49 = vpop.eup %7061  ;;  %v8531_v32 = vpop.permute.xlu0 %2340 }
 0x95f   : > { %v2248_v9 = vmul.f32 %v7157_v61, %v7062_v49  ;;  %v2612_v45 = vsel %vm267_vm0, %v2564_v25, 0.0 }
 0x960   : > { %v2562_v36 = vmul.f32 %v2402_v43, %v2402_v43 }
 0x961   : > { %v2408_v4 = vadd.f32 %v8452_v44, %v2248_v9 }
 0x962   : > { %2589 = vadd.xlane.f32.xlu1 %v2588_v38  ;;  %v8526_v38 = vpop.permute.xlu1 %2326  ;;  %v2606_v17 = vsel %vm267_vm0, %v2562_v36, 0.0  ;;  %v8539_v18 = vpop.xlane.xlu0 %2480 }
 0x963   : > { %v2568_v23 = vmul.f32 %v2408_v4, %v2408_v4  ;;  %v7160_v4 = vld [vmem:[%s7352_s30 + $0x90] sm:$0xff] }
 0x964   : > { %v7064_v42 = vpop.eup %7063 }
 0x965   : > { %v7066_v51 = vpop.eup %7065 }
 0x966   : > { %2595 = vadd.xlane.f32.xlu1 %v2594_v6  ;;  %v8534_v43 = vpop.xlane.xlu1 %2447  ;;  %v2212_v6 = vmul.f32 1.442695, %v8346_v27  ;;  %v7158_v27 = vld [vmem:[%s7352_s30 + $0x70] sm:$0xff]  ;;  %v2345_v44 = vpop.permute.xlu0 %2344 }
 0x967   : > { %v7068_v61 = vpop.eup %7067 }
 0x968   : > { %2360 = vrot.lane.b32.xlu0 %v8462_v39, %s7248_s8  ;;  %v2406_v39 = vadd.f32 %v8444_v30, %v2246_v15  ;;  %v2216_v30 = vmul.f32 1.442695, %v8403_v40  ;;  %7069 = vpow2.f32 %v2212_v6  ;;  %v2174_v40 = vmul.f32 1.442695, %v8164_v60 }
 0x969   : > { %v2178_v60 = vmul.f32 1.442695, %v8168_v31 }
 0x96a   : > { %2601 = vadd.xlane.f32.xlu1 %v2600_v11  ;;  %v2566_v3 = vmul.f32 %v2406_v39, %v2406_v39  ;;  %v8544_v36 = vpop.permute.xlu1 %2330  ;;  %v2250_v11 = vmul.f32 %v7158_v27, %v7064_v42  ;;  %v2220_v39 = vmul.f32 1.442695, %v8466_v33  ;;  %7071 = vpow2.f32 %v2216_v30 }
 0x96b   : > { %7073 = vtanh.f32 %v8324_v57  ;;  %v2624_v42 = vsel %vm267_vm0, %v2568_v23, 0.0  ;;  %v2224_v33 = vmul.f32 1.442695, %v8478_v50 }
 0x96c   : > { %v2410_v15 = vadd.f32 %v8469_v34, %v2250_v11  ;;  %v2618_v49 = vsel %vm267_vm0, %v2566_v3, 0.0  ;;  %v8558_v3 = vpop.xlane.xlu0 %2486  ;;  %7075 = vpow2.f32 %v2220_v39  ;;  %v2182_v11 = vmul.f32 1.442695, %v8204_v48  ;;  %v7162_v48 = vld [vmem:[%s7352_s30 + $0xb0] sm:$0xff] }
 0x96d   : > { %7077 = vpow2.f32 %v2174_v40 }
 0x96e   : > { %2607 = vadd.xlane.f32.xlu1 %v2606_v17  ;;  %v8551_v25 = vpop.xlane.xlu1 %2453  ;;  %v7159_v17 = vld [vmem:[%s7352_s30 + $0x80] sm:$0xff]  ;;  %v2570_v9 = vmul.f32 %v2410_v15, %v2410_v15  ;;  %7079 = vtanh.f32 %v8368_v26 }
 0x96f   : > { %v2252_v6 = vmul.f32 %v7159_v17, %v7066_v51  ;;  %7081 = vpow2.f32 %v2224_v33  ;;  %v7161_v51 = vld [vmem:[%s7352_s30 + $0xa0] sm:$0xff]  ;;  %v2186_v17 = vmul.f32 1.442695, %v8226_v62  ;;  %v7249_v33 = vmov 0  }
 0x970   : > { %v2630_v50 = vsel %vm267_vm0, %v2570_v9, 0.0  ;;  %7083 = vpow2.f32 %v2178_v60  ;;  %v2349_v15 = vpop.permute.xlu0 %2348  ;;  %6734 = vset.pattern.permute.xlu1 %v7249_v33  ;;  %6733 = vset.pattern.permute.xlu0 %v7249_v33 }
 0x971   : > { %v2412_v34 = vadd.f32 %v8491_v16, %v2252_v6  ;;  %7085 = vtanh.f32 %v8427_v22 }
 0x972   : > { %2613 = vadd.xlane.f32.xlu1 %v2612_v45  ;;  %v2254_v45 = vmul.f32 %v7160_v4, %v7068_v61  ;;  %v7070_v30 = vpop.eup %7069  ;;  %v8563_v57 = vpop.permute.xlu1 %2334  ;;  %7087 = vpow2.f32 %v2182_v11  ;;  %v2190_v4 = vmul.f32 1.442695, %v8238_v37 }
 0x973   : > { %v2572_v16 = vmul.f32 %v2412_v34, %v2412_v34  ;;  %v2256_v31 = vmul.f32 %v7161_v51, %v7070_v30  ;;  %7089 = vpow2.f32 %v2186_v17  ;;  %v7163_v30 = vld [vmem:[%s7352_s30 + $0xc0] sm:$0xff]  ;;  %v2194_v17 = vmul.f32 1.442695, %v8251_v54 }
 0x974   : > { %v2414_v27 = vadd.f32 %v8512_v10, %v2254_v45  ;;  %v7072_v23 = vpop.eup %7071  ;;  %7091 = vpow2.f32 %v2190_v4  ;;  %v2198_v4 = vmul.f32 1.442695, %v8265_v14  ;;  %v7168_v14 = vld [vmem:[%s7352_s30 + $0x38] sm:$0xff] }
 0x975   : > { %v2416_v39 = vadd.f32 %v8531_v32, %v2256_v31  ;;  %v2636_v10 = vsel %vm267_vm0, %v2572_v16, 0.0  ;;  %v8574_v40 = vpop.eup %7073  ;;  %v2258_v6 = vmul.f32 %v7162_v48, %v7072_v23  ;;  %v8578_v9 = vpop.xlane.xlu0 %2492  ;;  %7093 = vpow2.f32 %v2194_v17 }
 0x976   : > { %2619 = vadd.xlane.f32.xlu1 %v2618_v49  ;;  %v8570_v26 = vpop.xlane.xlu1 %2459  ;;  %v2574_v49 = vmul.f32 %v2414_v27, %v2414_v27  ;;  %v7076_v61 = vpop.eup %7075  ;;  %v2509_v60 = vsel %vm267_vm0, %v8574_v40, 0.0  ;;  %v7164_v27 = vld [vmem:[%s7352_s30 + $0x8] sm:$0xff]  ;;  %7095 = vpow2.f32 %v2198_v4 }
 0x977   : > { %v7078_v22 = vpop.eup %7077  ;;  %v2576_v34 = vmul.f32 %v2416_v39, %v2416_v39  ;;  %v2260_v16 = vmul.f32 %v7163_v30, %v7076_v61  ;;  %v7167_v30 = vld [vmem:[%s7352_s30 + $0x28] sm:$0xff] }
 0x978   : > { %v2642_v32 = vsel %vm267_vm0, %v2574_v49, 0.0  ;;  %v8583_v62 = vpop.eup %7079 }
 0x979   : > { %v2420_v31 = vadd.f32 %v2349_v15, %v2260_v16  ;;  %v2648_v23 = vsel %vm267_vm0, %v2576_v34, 0.0  ;;  %v2353_v39 = vpop.permute.xlu0 %2352  ;;  %v2515_v37 = vsel %vm267_vm0, %v8583_v62, 0.0  ;;  %v7166_v15 = vld [vmem:[%s7352_s30 + $0x18] sm:$0xff] }
 0x97a   : > { %2625 = vadd.xlane.f32.xlu1 %v2624_v42  ;;  %v2418_v42 = vadd.f32 %v2345_v44, %v2258_v6  ;;  %v8586_v45 = vpop.permute.xlu1 %2338  ;;  %v7082_v44 = vpop.eup %7081  ;;  %v7165_v6 = vld [vmem:[%s7352_s30 + $0xd0] sm:$0xff] }
 0x97b   : > { %v7084_v11 = vpop.eup %7083  ;;  %v2262_v61 = vmul.f32 %v7165_v6, %v7082_v44 }
 0x97c   : > { %v2578_v51 = vmul.f32 %v2418_v42, %v2418_v42 }
 0x97d   : > { %v2422_v42 = vadd.f32 %v2353_v39, %v2262_v61 }
 0x97e   : > { %2631 = vadd.xlane.f32.xlu1 %v2630_v50  ;;  %v2237_v50 = vmul.f32 %v7164_v27, %v7078_v22  ;;  %v8597_v48 = vpop.xlane.xlu1 %2465  ;;  %v2239_v22 = vmul.f32 %v7166_v15, %v7084_v11  ;;  %v2206_v15 = vmul.f32 1.442695, %v8293_v53 }
 0x980   : > { %v2397_v49 = vadd.f32 %v8395_v58, %v2237_v50  ;;  %v2580_v58 = vmul.f32 %v2420_v31, %v2420_v31  ;;  %v2582_v50 = vmul.f32 %v2422_v42, %v2422_v42 }
 0x982   : > { %2637 = vadd.xlane.f32.xlu1 %v2636_v10  ;;  %v8594_v10 = vpop.eup %7085  ;;  %v2557_v33 = vmul.f32 %v2397_v49, %v2397_v49  ;;  %v8607_v27 = vpop.permute.xlu1 %2342  ;;  %v2660_v11 = vsel %vm267_vm0, %v2580_v58, 0.0  ;;  %v2666_v17 = vsel %vm267_vm0, %v2582_v50, 0.0 }
 0x983   : > { %v7088_v34 = vpop.eup %7087  ;;  %v2521_v54 = vsel %vm267_vm0, %v8594_v10, 0.0 }
 0x984   : > { %v2241_v16 = vmul.f32 %v7167_v30, %v7088_v34  ;;  %v7090_v44 = vpop.eup %7089  ;;  %v2591_v31 = vsel %vm267_vm0, %v2557_v33, 0.0 }
 0x985   : > { %v2243_v49 = vmul.f32 %v7168_v14, %v7090_v44  ;;  %v7092_v39 = vpop.eup %7091  ;;  %v2214_v44 = vmul.f32 1.442695, %v8344_v24 }
 0x986   : > { %2643 = vadd.xlane.f32.xlu1 %v2642_v32  ;;  %v2654_v32 = vsel %vm267_vm0, %v2578_v51, 0.0  ;;  %v7094_v34 = vpop.eup %7093 }
 0x987   : > { %2510 = vadd.xlane.f32.xlu0 %v2509_v60  ;;  %v2399_v60 = vadd.f32 %v8448_v52, %v2239_v22  ;;  %v2401_v52 = vadd.f32 %v8458_v35, %v2241_v16  ;;  %v2403_v61 = vadd.f32 %v8471_v2, %v2243_v49  ;;  %v2210_v2 = vmul.f32 1.442695, %v8310_v41  ;;  %v7096_v4 = vpop.eup %7095  ;;  %v7171_v41 = vld [vmem:[%s7352_s30 + $0x68] sm:$0xff] }
 0x989   : > { %v2559_v51 = vmul.f32 %v2399_v60, %v2399_v60  ;;  %v2561_v6 = vmul.f32 %v2401_v52, %v2401_v52  ;;  %v2563_v58 = vmul.f32 %v2403_v61, %v2403_v61  ;;  %v2228_v60 = vmul.f32 1.442695, %v8487_v13 }
 0x98a   : > { %2649 = vadd.xlane.f32.xlu1 %v2648_v23  ;;  %v2202_v23 = vmul.f32 1.442695, %v8279_v0  ;;  %v7169_v0 = vld [vmem:[%s7352_s30 + $0x48] sm:$0xff]  ;;  %v2222_v61 = vmul.f32 1.442695, %v8464_v20  ;;  %v7174_v20 = vld [vmem:[%s7352_s30 + $0x98] sm:$0xff] }
 0x98b   : > { %2516 = vadd.xlane.f32.xlu0 %v2515_v37  ;;  %v8614_v37 = vpop.xlane.xlu1 %2471  ;;  %v2597_v35 = vsel %vm267_vm0, %v2559_v51, 0.0  ;;  %v2245_v22 = vmul.f32 %v7169_v0, %v7092_v39 }
 0x98c   : > { %7097 = vpow2.f32 %v2202_v23  ;;  %v7172_v23 = vld [vmem:[%s7352_s30 + $0x78] sm:$0xff] }
 0x98d   : > { %v2405_v42 = vadd.f32 %v8493_v1, %v2245_v22  ;;  %7099 = vpow2.f32 %v2206_v15  ;;  %v2609_v1 = vsel %vm267_vm0, %v2563_v58, 0.0 }
 0x98e   : > { %2655 = vadd.xlane.f32.xlu1 %v2654_v32  ;;  %v2603_v32 = vsel %vm267_vm0, %v2561_v6, 0.0  ;;  %7101 = vpow2.f32 %v2210_v2 }
 0x98f   : > { %2522 = vadd.xlane.f32.xlu0 %v2521_v54  ;;  %v8624_v33 = vpop.permute.xlu1 %2346  ;;  %v7170_v54 = vld [vmem:[%s7352_s30 + $0x58] sm:$0xff]  ;;  %v2565_v30 = vmul.f32 %v2405_v42, %v2405_v42  ;;  %7103 = vpow2.f32 %v2228_v60  ;;  %v2226_v42 = vmul.f32 1.442695, %v8574_v40  ;;  %v7175_v60 = vld [vmem:[%s7352_s30 + $0xe0] sm:$0xff] }
 0x990   : > { %v2247_v53 = vmul.f32 %v7170_v54, %v7094_v34  ;;  %7105 = vpow2.f32 %v2214_v44  ;;  %v7176_v44 = vld [vmem:[%s7352_s30 + $0xa8] sm:$0xff] }
 0x992   : > { %2661 = vadd.xlane.f32.xlu1 %v2660_v11  ;;  %v2407_v16 = vadd.f32 %v8507_v28, %v2247_v53  ;;  %v2249_v11 = vmul.f32 %v7171_v41, %v7096_v4  ;;  %v2218_v28 = vmul.f32 1.442695, %v8401_v56 }
 0x993   : > { %2592 = vadd.xlane.f32.xlu0 %v2591_v31  ;;  %v8631_v50 = vpop.xlane.xlu1 %2477  ;;  %v2615_v31 = vsel %vm267_vm0, %v2565_v30, 0.0 }
 0x994   : > { %v2567_v13 = vmul.f32 %v2407_v16, %v2407_v16  ;;  %v2409_v52 = vadd.f32 %v8526_v38, %v2249_v11  ;;  %7107 = vpow2.f32 %v2218_v28  ;;  %v7173_v38 = vld [vmem:[%s7352_s30 + $0x88] sm:$0xff]  ;;  %v2230_v16 = vmul.f32 1.442695, %v8583_v62 }
 0x995   : > { %7109 = vpow2.f32 %v2222_v61 }
 0x996   : > { %2667 = vadd.xlane.f32.xlu1 %v2666_v17  ;;  %v7098_v51 = vpop.eup %7097  ;;  %v2569_v39 = vmul.f32 %v2409_v52, %v2409_v52  ;;  %v2621_v6 = vsel %vm267_vm0, %v2567_v13, 0.0  ;;  %7111 = vpow2.f32 %v2226_v42 }
 0x997   : > { %2598 = vadd.xlane.f32.xlu0 %v2597_v35  ;;  %v2251_v14 = vmul.f32 %v7172_v23, %v7098_v51  ;;  %v7100_v24 = vpop.eup %7099  ;;  %v2351_v49 = vpop.permute.xlu1 %2350  ;;  %7113 = vpow2.f32 %v2230_v16  ;;  %v7177_v23 = vld [vmem:[%s7352_s30 + $0xb8] sm:$0xff] }
 0x998   : > { %v2253_v35 = vmul.f32 %v7173_v38, %v7100_v24  ;;  %v7102_v15 = vpop.eup %7101 }
 0x999   : > { %v2411_v17 = vadd.f32 %v8544_v36, %v2251_v14  ;;  %v7104_v0 = vpop.eup %7103  ;;  %v2627_v36 = vsel %vm267_vm0, %v2569_v39, 0.0 }
 0x99a   : > { %v2413_v34 = vadd.f32 %v8563_v57, %v2253_v35  ;;  %v7106_v2 = vpop.eup %7105  ;;  %v2264_v54 = vmul.f32 %v7175_v60, %v7104_v0 }
 0x99b   : > { %2604 = vadd.xlane.f32.xlu0 %v2603_v32  ;;  %v8642_v56 = vpop.xlane.xlu1 %2483  ;;  %v2571_v22 = vmul.f32 %v2411_v17, %v2411_v17  ;;  %v2255_v32 = vmul.f32 %v7174_v20, %v7102_v15  ;;  %v2257_v41 = vmul.f32 %v7176_v44, %v7106_v2  ;;  %v7180_v2 = vld [vmem:[%s7352_s30 + $0xe8] sm:$0xff] }
 0x99c   : > { %v2573_v53 = vmul.f32 %v2413_v34, %v2413_v34 }
 0x99d   : > { %v2415_v4 = vadd.f32 %v8586_v45, %v2255_v32  ;;  %v2633_v57 = vsel %vm267_vm0, %v2571_v22, 0.0  ;;  %v2417_v52 = vadd.f32 %v8607_v27, %v2257_v41  ;;  %v7179_v22 = vld [vmem:[%s7352_s30 + $0xd8] sm:$0xff] }
 0x99e   : > { %v7108_v11 = vpop.eup %7107  ;;  %v2639_v45 = vsel %vm267_vm0, %v2573_v53, 0.0 }
 0x99f   : > { %2610 = vadd.xlane.f32.xlu0 %v2609_v1  ;;  %v2355_v1 = vpop.permute.xlu1 %2354  ;;  %v2575_v13 = vmul.f32 %v2415_v4, %v2415_v4  ;;  %v2259_v14 = vmul.f32 %v7177_v23, %v7108_v11  ;;  %v7110_v24 = vpop.eup %7109  ;;  %v2577_v39 = vmul.f32 %v2417_v52, %v2417_v52  ;;  %v2937_v52 = vsel %vm267_vm0, %v8350_v55, 0.0  ;;  %v7182_v23 = vld [vmem:[%s7352_s30 + $0xf0] sm:$0xff] }
 0x9a0   : > { %v7112_v61 = vpop.eup %7111  ;;  %v2524_v55 = vadd.f32 %v8413_v19, %v7765_v59  ;;  %v9808_v59 = vld [vmem:[#allocation7_spill] sm:$0xff] }
 0x9a1   : > { %v2419_v17 = vadd.f32 %v8624_v33, %v2259_v14  ;;  %v2645_v27 = vsel %vm267_vm0, %v2575_v13, 0.0  ;;  %v2651_v0 = vsel %vm267_vm0, %v2577_v39, 0.0  ;;  %v2263_v34 = vmul.f32 %v7179_v22, %v7112_v61  ;;  %v9805_v22 = vld [vmem:[#allocation6_spill] sm:$0xff] }
 0x9a2   : > { %v2232_v13 = vmul.f32 1.442695, %v8497_v63  ;;  %v9731_v61 = vlaneseq  ;;  %v8707_v19 = vadd.f32 %v8534_v43, %v9808_v59 }
 0x9a3   : > { %2616 = vadd.xlane.f32.xlu0 %v2615_v31  ;;  %v2234_v31 = vmul.f32 1.442695, %v8594_v10  ;;  %v8658_v28 = vpop.xlane.xlu1 %2489  ;;  %v2579_v35 = vmul.f32 %v2419_v17, %v2419_v17  ;;  %v2423_v20 = vadd.f32 %v2355_v1, %v2263_v34  ;;  %v8699_v34 = vadd.f32 %v8515_v21, %v9805_v22  ;;  %v9812_v21 = vld [vmem:[#allocation9_spill] sm:$0xff] }
 0x9a5   : > { %7115 = vpow2.f32 %v2234_v31  ;;  %v2657_v32 = vsel %vm267_vm0, %v2579_v35, 0.0  ;;  %v2583_v53 = vmul.f32 %v2423_v20, %v2423_v20  ;;  %v8693_v35 = vadd.f32 %v8417_v46, %v7767_v12 }
 0x9a6   : > { %7117 = vpow2.f32 %v2232_v13  ;;  %v7250_v12 = vmov 1966171168   ;;  %v9822_v13 = vld [vmem:[#allocation15_spill] sm:$0xff] }
 0x9a7   : > { %2622 = vadd.xlane.f32.xlu0 %v2621_v6  ;;  %v7178_v6 = vld [vmem:[%s7352_s30 + $0xc8] sm:$0xff]  ;;  %v2359_v38 = vpop.permute.xlu1 %2358  ;;  %v2669_v41 = vsel %vm267_vm0, %v2583_v53, 0.0  ;;  %v4129_v46 = vunpack.c.l.s4 %v7250_v12  ;;  %v9814_v53 = vld [vmem:[#allocation12_spill] sm:$0xff] }
 0x9a8   : > { %v2261_v10 = vmul.f32 %v7178_v6, %v7110_v24 }
 0x9aa   : > { %v8645_v58 = vpop.xlane.xlu0 %2498  ;;  %v2421_v15 = vadd.f32 %v2351_v49, %v2261_v10 }
 0x9ab   : > { %2628 = vadd.xlane.f32.xlu0 %v2627_v36  ;;  %v7114_v36 = vpop.eup %7113  ;;  %v8667_v42 = vpop.xlane.xlu1 %2495 }
 0x9ac   : > { %v2581_v33 = vmul.f32 %v2421_v15, %v2421_v15  ;;  %v2265_v60 = vmul.f32 %v7180_v2, %v7114_v36  ;;  %v9804_v15 = vld [vmem:[#allocation61_spill] sm:$0xff]  ;;  %v9811_v2 = vld [vmem:[#allocation10_spill] sm:$0xff] }
 0x9ad   : > { %v9806_v36 = vld [vmem:[#allocation5_spill] sm:$0xff] }
 0x9ae   : > { %v2357_v30 = vpop.permute.xlu0 %2356  ;;  %v2425_v4 = vadd.f32 %v2359_v38, %v2265_v60  ;;  %v2663_v49 = vsel %vm267_vm0, %v2581_v33, 0.0  ;;  %v8689_v38 = vadd.f32 %v8483_v7, %v7781_v5  ;;  %v9807_v33 = vld [vmem:[#allocation64_spill] sm:$0xff]  ;;  %v9810_v7 = vld [vmem:[#allocation66_spill] sm:$0xff]  ;;  %v9813_v60 = vld [vmem:[#allocation67_spill] sm:$0xff] }
 0x9af   : > { %v2424_v40 = vadd.f32 %v2357_v30, %v2264_v54  ;;  %2634 = vadd.xlane.f32.xlu0 %v2633_v57  ;;  %v7116_v54 = vpop.eup %7115  ;;  %v2363_v30 = vpop.permute.xlu1 %2362  ;;  %v7181_v57 = vld [vmem:[%s7352_s30 + $0xf8] sm:$0xff]  ;;  %v8703_v20 = vadd.f32 %v9807_v33, %v9806_v36  ;;  %s216_s30 = sand.u32 1, %s7237_s19  }
 0x9b0   : > { %v2267_v16 = vmul.f32 %v7181_v57, %v7116_v54  ;;  %v9809_v5 = vld [vmem:[#allocation8_spill] sm:$0xff]  ;;  %v8719_v54 = vadd.f32 %v9813_v60, %v9812_v21  ;;  %s6077_s8 = sshll.u32 %s216_s30, 1  ;;  %s6000_s26 = scalar_lea.sflag [#allocation3], %s216_s30 }
 0x9b1   : > { %v2584_v51 = vmul.f32 %v2424_v40, %v2424_v40  ;;  %v2585_v40 = vmul.f32 %v2425_v4, %v2425_v4  ;;  %v8723_v4 = vadd.f32 %v8570_v26, %v9814_v53  ;;  %v9817_v57 = vld [vmem:[#allocation68_spill] sm:$0xff]  ;;  %s218_s16 = scalar_lea.vmem [#allocation2], %s6077_s8 }
 0x9b2   : > { %v2427_v44 = vadd.f32 %v2363_v30, %v2267_v16  ;;  %v9816_v30 = vld [vmem:[#allocation11_spill] sm:$0xff]  ;;  %v9821_v26 = vld [vmem:[#allocation16_spill] sm:$0xff]  ;;  %s6014_s17 = sshll.u32 %s218_s16, 4  ;;  %s9683_s17 = int_to_ptr.vmem [resolvable:$true] %s6014_s17 }
 0x9b3   : > { %2640 = vadd.xlane.f32.xlu0 %v2639_v45  ;;  %v2672_v62 = vsel %vm267_vm0, %v2584_v51, 0.0  ;;  %v2675_v11 = vsel %vm267_vm0, %v2585_v40, 0.0  ;;  %v7118_v45 = vpop.eup %7117  ;;  %v8730_v16 = vadd.f32 %v9817_v57, %v9816_v30  ;;  %v9818_v40 = vld [vmem:[#allocation14_spill] sm:$0xff]  ;;  %v9831_v30 = vld [vmem:[#allocation23_spill] sm:$0xff]  ;;  %s7183_s6 = scalar_lea.vmem %s9683_s17, 32  ;;  %p7190_p0 = scmp.lt.s32.totalorder %s9683_s17, %s7188_s10 }
 0x9b4   : > { %2673 = vadd.xlane.f32.xlu1 %v2672_v62  ;;  %v2587_v1 = vmul.f32 %v2427_v44, %v2427_v44  ;;  %v2266_v14 = vmul.f32 %v7182_v23, %v7118_v45  ;;  %v9819_v44 = vld [vmem:[#allocation13_spill] sm:$0xff]  ;;  %v9823_v45 = vld [vmem:[#allocation18_spill] sm:$0xff]  ;;  %v8807_v57 = vadd.f32 %v8645_v58, %v9831_v30  ;;  %p7184_p11 = scmp.ne.s32.totalorder %s9683_s17, %s7183_s6  ;;  %p7191_p1 = scmp.lt.s32.totalorder %s7189_s11, %s7183_s6 }
 0x9b5   : > { %v8751_v23 = vadd.f32 %v8631_v50, %v9823_v45  ;;  %v9828_v50 = vld [vmem:[#allocation21_spill] sm:$0xff] }
 0x9b6   : > { %v2681_v51 = vsel %vm267_vm0, %v2587_v1, 0.0  ;;  %v9820_v1 = vld [vmem:[#allocation33_spill] sm:$0xff]  ;;  %v8771_v22 = vadd.f32 %v8578_v9, %v9828_v50  ;;  %p7185_p12 = pnand %p7184_p11, %p7317_p5  ;;  %p7192_p2 = por %p7191_p1, %p7190_p0 }
 0x9b7   : > { %2646 = vadd.xlane.f32.xlu0 %v2645_v27 }
 0x9b8   : > { %p7186_p13 = pneg %p7185_p12 }
 0x9ba   : > { %p7193_p3 = pnand %p7192_p2, %p7186_p13 }
 0x9bb   : > { %2652 = vadd.xlane.f32.xlu0 %v2651_v0  ;;  %v2526_v0 = vadd.f32 %v9804_v15, %v7777_v8  ;;  %v8715_v8 = vadd.f32 %v8551_v25, %v9811_v2  ;;  %v8734_v25 = vadd.f32 %v8597_v48, %v9818_v40  ;;  %v9824_v48 = vld [vmem:[#allocation17_spill] sm:$0xff]  ;;  %v9830_v2 = vld [vmem:[#allocation24_spill] sm:$0xff]  ;;  %v9832_v40 = vld [vmem:[#allocation26_spill] sm:$0xff] }
 0x9bc   : > { %v8800_v21 = vadd.f32 %v8667_v42, %v9830_v2 }
 0x9bf   : > { %2658 = vadd.xlane.f32.xlu0 %v2657_v32  ;;  %v8711_v32 = vadd.f32 %v9810_v7, %v9809_v5 }
 0x9c3   : > { %2664 = vadd.xlane.f32.xlu0 %v2663_v49  ;;  %v8726_v49 = vshrl.u32 %v9731_v61, 7 }
 0x9c5   : > { %9815 = vst [vmem:[#allocation61_spill] sm:$0xff] %v8726_v49  ;;  %v8774_v36 = vsub.s32 0, %v8726_v49  ;;  %v8781_v5 = vsub.s32 2, %v8726_v49  ;;  %v8787_v7 = vsub.s32 4, %v8726_v49  ;;  %v8790_v9 = vsub.s32 5, %v8726_v49 }
 0x9c6   : > { %v8793_v12 = vsub.s32 6, %v8726_v49 }
 0x9c7   : > { %2670 = vadd.xlane.f32.xlu0 %v2669_v41  ;;  %v8738_v41 = vadd.f32 %v8501_v47, %v9819_v44  ;;  %v9825_v47 = vld [vmem:[#allocation20_spill] sm:$0xff] }
 0x9cb   : > { %2676 = vadd.xlane.f32.xlu0 %v2675_v11 }
 0x9cf   : > { %2682 = vadd.xlane.f32.xlu0 %v2681_v51  ;;  %v8743_v51 = vadd.f32 %v8614_v37, %v9821_v26  ;;  %v9834_v26 = vld [vmem:[#allocation28_spill] sm:$0xff] }
 0x9d3   : > { %2938 = vadd.xlane.f32.xlu0 %v2937_v52  ;;  %v8747_v52 = vadd.f32 %v8520_v29, %v9822_v13  ;;  %v9827_v29 = vld [vmem:[#allocation22_spill] sm:$0xff] }
 0x9d4   : > { %v8767_v15 = vadd.f32 %v8658_v28, %v9827_v29  ;;  %v8784_v28 = vsub.s32 3, %v8726_v49 }
 0x9df   : > { %v2502_v31 = vpop.xlane.xlu1 %2501  ;;  %v2505_v62 = vpop.xlane.xlu0 %2504 }
 0x9e0   : > { %v8810_v44 = vadd.f32 %v2502_v31, %v9832_v40  ;;  %v9837_v40 = vld [vmem:[#allocation45_spill] sm:$0xff] }
 0x9e3   : > { %v2508_v24 = vpop.xlane.xlu1 %2507  ;;  %v2361_v39 = vpop.permute.xlu0 %2360 }
 0x9e4   : > { %v2426_v17 = vadd.f32 %v2361_v39, %v2266_v14  ;;  %v8755_v14 = vadd.f32 %v8539_v18, %v9824_v48  ;;  %v8759_v39 = vadd.f32 %v8642_v56, %v9825_v47  ;;  %v8777_v56 = vsub.s32 1, %v8726_v49 }
 0x9e5   : > { %v8816_v13 = vadd.f32 %v2508_v24, %v9834_v26 }
 0x9e6   : > { %v2586_v27 = vmul.f32 %v2426_v17, %v2426_v17  ;;  %v9826_v17 = vld [vmem:[#allocation19_spill] sm:$0xff] }
 0x9e7   : > { %v8680_v6 = vpop.xlane.xlu1 %2513  ;;  %v8763_v37 = vadd.f32 %v8558_v3, %v9826_v17  ;;  %v9829_v3 = vld [vmem:[#allocation35_spill] sm:$0xff] }
 0x9e8   : > { %v2678_v10 = vsel %vm267_vm0, %v2586_v27, 0.0  ;;  %vm5897_vm0 = vcmask 1048512  }
 0x9e9   : > { %2679 = vadd.xlane.f32.xlu1 %v2678_v10  ;;  %v4130_v10 = vunpack.c.0.s8 %v4129_v46  ;;  %v8796_v46 = vsub.s32 7, %v8726_v49 }
 0x9eb   : > { %v8683_v63 = vpop.xlane.xlu1 %2519 }
 0x9ef   : > { %v2590_v43 = vpop.xlane.xlu1 %2589 }
 0x9f0   : > { %v2940_v11 = vadd.f32 %v9820_v1, %v2590_v43  ;;  %v8803_v43 = vsub.s32 %v4130_v10, %v8726_v49  ;;  %v9833_v1 = vld [vmem:[#allocation25_spill] sm:$0xff] }
 0x9f2   : > { %v2972_v27 = vmul.f32 -0.5, %v2940_v11  ;;  %v8813_v11 = vadd.f32 %v2505_v62, %v9833_v1 }
 0x9f3   : > { %v2596_v18 = vpop.xlane.xlu1 %2595 }
 0x9f4   : > { %v6224_v33 = vadd.f32 -29.406033, %v2972_v27  ;;  %v2942_v59 = vadd.f32 %v9829_v3, %v2596_v18  ;;  %v9836_v18 = vld [vmem:[#allocation30_spill] sm:$0xff] }
 0x9f6   : > { %v3036_v60 = vadd.f32 %v6224_v33, %v2524_v55  ;;  %v2974_v53 = vmul.f32 -0.5, %v2942_v59  ;;  %v9835_v55 = vld [vmem:[#allocation43_spill] sm:$0xff]  ;;  %v8829_v33 = vadd.f32 %v8680_v6, %v9836_v18 }
 0x9f7   : > { %v2602_v42 = vpop.xlane.xlu1 %2601  ;;  %v9840_v18 = vld [vmem:[#allocation47_spill] sm:$0xff] }
 0x9f8   : > { %v6226_v45 = vadd.f32 -29.406033, %v2974_v53  ;;  %v2944_v48 = vadd.f32 %v9835_v55, %v2602_v42  ;;  %v3103_v47 = vrot.slane %v3036_v60, %v8774_v36  ;;  %v3107_v17 = vrot.slane %v3036_v60, %v8777_v56 }
 0x9f9   : > { %v3111_v58 = vrot.slane %v3036_v60, %v8781_v5  ;;  %v3115_v27 = vrot.slane %v3036_v60, %v8784_v28  ;;  %v3119_v31 = vrot.slane %v3036_v60, %v8787_v7  ;;  %v3123_v62 = vrot.slane %v3036_v60, %v8790_v9 }
 0x9fa   : > { %v3038_v10 = vadd.f32 %v6226_v45, %v2526_v0  ;;  %v2976_v29 = vmul.f32 -0.5, %v2944_v48  ;;  %v3127_v24 = vrot.slane %v3036_v60, %v8793_v12  ;;  %v3131_v50 = vrot.slane %v3036_v60, %v8796_v46 }
 0x9fb   : > { %v2608_v3 = vpop.xlane.xlu1 %2607  ;;  %v4124_v59 = vcombine.low %v3103_v47, %v3107_v17  ;;  %v4125_v2 = vcombine.low %v3111_v58, %v3115_v27  ;;  %v4126_v53 = vcombine.low %v3119_v31, %v3123_v62 }
 0x9fc   : > { %v6228_v30 = vadd.f32 -29.406033, %v2976_v29  ;;  %v2946_v1 = vadd.f32 %v9837_v40, %v2608_v3  ;;  %v4127_v26 = vcombine.low %v3127_v24, %v3131_v50  ;;  %v3167_v42 = vrot.slane %v3038_v10, %v8774_v36  ;;  %v9838_v24 = vld [vmem:[#allocation32_spill] sm:$0xff] }
 0x9fd   : > { %v4134_v0 = vrot.slane %v4124_v59, %v8803_v43  ;;  %v4141_v45 = vrot.slane %v4125_v2, %v8803_v43  ;;  %v4148_v60 = vrot.slane %v4126_v53, %v8803_v43  ;;  %v3171_v55 = vrot.slane %v3038_v10, %v8777_v56 }
 0x9fe   : > { %v3040_v6 = vadd.f32 %v6228_v30, %v8699_v34  ;;  %v2978_v48 = vmul.f32 -0.5, %v2946_v1  ;;  %v4155_v47 = vrot.slane %v4127_v26, %v8803_v43  ;;  %v3175_v17 = vrot.slane %v3038_v10, %v8781_v5 }
 0x9ff   : > { %v2614_v58 = vpop.xlane.xlu1 %2613  ;;  %v4156_v27 = vcombine.low %v4134_v0, %v4141_v45  ;;  %v3179_v31 = vrot.slane %v3038_v10, %v8784_v28  ;;  %v3183_v62 = vrot.slane %v3038_v10, %v8787_v7  ;;  %v3187_v29 = vrot.slane %v3038_v10, %v8790_v9 }
 0xa00   : > { %v8845_v50 = vadd.f32 %v8683_v63, %v9838_v24  ;;  %v2948_v3 = vadd.f32 %v9840_v18, %v2614_v58  ;;  %v4157_v34 = vcombine.low %v4148_v60, %v4155_v47  ;;  %v3191_v59 = vrot.slane %v3038_v10, %v8793_v12  ;;  %v9841_v24 = vld [vmem:[#allocation50_spill] sm:$0xff] }
 0xa01   : > { %v4164_v2 = vrot.slane %v4156_v27, %v8803_v43  ;;  %v3195_v53 = vrot.slane %v3038_v10, %v8796_v46  ;;  %v4222_v30 = vcombine.low %v3167_v42, %v3171_v55  ;;  %v4223_v40 = vcombine.low %v3175_v17, %v3179_v31 }
 0xa02   : > { %9839 = vst [vmem:[#allocation6_spill] sm:$0xff] %v8845_v50  ;;  %v6230_v1 = vadd.f32 -29.406033, %v2978_v48  ;;  %v2980_v26 = vmul.f32 -0.5, %v2948_v3  ;;  %v4171_v0 = vrot.slane %v4157_v34, %v8803_v43  ;;  %v4224_v45 = vcombine.low %v3183_v62, %v3187_v29 }
 0xa03   : > { %v2620_v61 = vpop.xlane.xlu1 %2619  ;;  %v4225_v49 = vcombine.low %v3191_v59, %v3195_v53  ;;  %v4232_v63 = vrot.slane %v4222_v30, %v8803_v43  ;;  %v4239_v58 = vrot.slane %v4223_v40, %v8803_v43  ;;  %v3231_v60 = vrot.slane %v3040_v6, %v8774_v36  ;;  %v9842_v30 = vld [vmem:[#allocation52_spill] sm:$0xff] }
 0xa04   : > { %v6232_v47 = vadd.f32 -29.406033, %v2980_v26  ;;  %v2950_v27 = vadd.f32 %v9841_v24, %v2620_v61  ;;  %v4172_v18 = vcombine.low %v4164_v2, %v4171_v0  ;;  %v4246_v10 = vrot.slane %v4224_v45, %v8803_v43 }
 0xa05   : > { %v4253_v42 = vrot.slane %v4225_v49, %v8803_v43  ;;  %v4254_v55 = vcombine.low %v4232_v63, %v4239_v58  ;;  %v3235_v48 = vrot.slane %v3040_v6, %v8777_v56  ;;  %v3239_v17 = vrot.slane %v3040_v6, %v8781_v5 }
 0xa06   : > { %v3042_v31 = vadd.f32 %v6230_v1, %v8707_v19  ;;  %v2982_v62 = vmul.f32 -0.5, %v2950_v27  ;;  %5693 = vperm.xlu1 %6734, %v4172_v18   ;;  %v3243_v29 = vrot.slane %v3040_v6, %v8784_v28  ;;  %v3247_v3 = vrot.slane %v3040_v6, %v8787_v7 }
 0xa07   : > { %v8864_v61 = vadd.f32 %v6232_v47, %v8715_v8  ;;  %v2626_v34 = vpop.xlane.xlu1 %2625  ;;  %v4255_v59 = vcombine.low %v4246_v10, %v4253_v42  ;;  %v3251_v49 = vrot.slane %v3040_v6, %v8790_v9  ;;  %v3255_v2 = vrot.slane %v3040_v6, %v8793_v12 }
 0xa08   : > { %v6234_v53 = vadd.f32 -29.406033, %v2982_v62  ;;  %v2952_v40 = vadd.f32 %v9842_v30, %v2626_v34  ;;  %v3259_v19 = vrot.slane %v3040_v6, %v8796_v46  ;;  %v4320_v1 = vcombine.low %v3231_v60, %v3235_v48 }
 0xa09   : > { %v4262_v26 = vrot.slane %v4254_v55, %v8803_v43  ;;  %v4269_v0 = vrot.slane %v4255_v59, %v8803_v43  ;;  %v4321_v45 = vcombine.low %v3239_v17, %v3243_v29  ;;  %v4322_v63 = vcombine.low %v3247_v3, %v3251_v49  ;;  %v9843_v55 = vld [vmem:[#allocation56_spill] sm:$0xff] }
 0xa0a   : > { %v2984_v8 = vmul.f32 -0.5, %v2952_v40  ;;  %v4323_v58 = vcombine.low %v3255_v2, %v3259_v19  ;;  %v4330_v47 = vrot.slane %v4320_v1, %v8803_v43  ;;  %v3295_v24 = vrot.slane %v3042_v31, %v8774_v36 }
 0xa0b   : > { %v3046_v27 = vadd.f32 %v6234_v53, %v8723_v4  ;;  %v2632_v18 = vpop.xlane.xlu1 %2631  ;;  %v4337_v10 = vrot.slane %v4321_v45, %v8803_v43  ;;  %v4344_v6 = vrot.slane %v4322_v63, %v8803_v43  ;;  %v3299_v60 = vrot.slane %v3042_v31, %v8777_v56 }
 0xa0c   : > { %v6236_v42 = vadd.f32 -29.406033, %v2984_v8  ;;  %v2954_v48 = vadd.f32 %v9843_v55, %v2632_v18  ;;  %v4351_v17 = vrot.slane %v4323_v58, %v8803_v43  ;;  %v3303_v62 = vrot.slane %v3042_v31, %v8781_v5  ;;  %v9844_v8 = vld [vmem:[#allocation42_spill] sm:$0xff] }
 0xa0d   : > { %v4352_v29 = vcombine.low %v4330_v47, %v4337_v10  ;;  %v3307_v3 = vrot.slane %v3042_v31, %v8784_v28  ;;  %v3311_v34 = vrot.slane %v3042_v31, %v8787_v7  ;;  %v3315_v4 = vrot.slane %v3042_v31, %v8790_v9 }
 0xa0e   : > { %v2986_v59 = vmul.f32 -0.5, %v2954_v48  ;;  %v8884_v49 = vcombine.low %v4262_v26, %v4269_v0  ;;  %v4353_v2 = vcombine.low %v4344_v6, %v4351_v17  ;;  %v3319_v53 = vrot.slane %v3042_v31, %v8793_v12 }
 0xa0f   : > { %v8888_v30 = vadd.f32 %v6236_v42, %v8734_v25  ;;  %v2638_v40 = vpop.xlane.xlu1 %2637  ;;  %v3323_v19 = vrot.slane %v3042_v31, %v8796_v46  ;;  %v4418_v1 = vcombine.low %v3295_v24, %v3299_v60  ;;  %v4419_v45 = vcombine.low %v3303_v62, %v3307_v3  ;;  %v9846_v3 = vld [vmem:[#allocation44_spill] sm:$0xff] }
 0xa10   : > { %v6238_v63 = vadd.f32 -29.406033, %v2986_v59  ;;  %v2956_v58 = vadd.f32 %v9844_v8, %v2638_v40  ;;  %v4360_v47 = vrot.slane %v4352_v29, %v8803_v43  ;;  %v4420_v18 = vcombine.low %v3311_v34, %v3315_v4 }
 0xa11   : > { %v4367_v26 = vrot.slane %v4353_v2, %v8803_v43  ;;  %v4421_v0 = vcombine.low %v3319_v53, %v3323_v19  ;;  %v4428_v10 = vrot.slane %v4418_v1, %v8803_v43  ;;  %v4435_v6 = vrot.slane %v4419_v45, %v8803_v43  ;;  %v9847_v2 = vld [vmem:[#allocation27_spill] sm:$0xff] }
 0xa12   : > { %v8897_v25 = vadd.f32 %v6238_v63, %v8743_v51  ;;  %v2988_v42 = vmul.f32 -0.5, %v2956_v58  ;;  %v4442_v31 = vrot.slane %v4420_v18, %v8803_v43  ;;  %v3423_v24 = vrot.slane %v3046_v27, %v8774_v36 }
 0xa13   : > { %v2644_v60 = vpop.xlane.xlu1 %2643  ;;  %v4449_v55 = vrot.slane %v4421_v0, %v8803_v43  ;;  %v4450_v48 = vcombine.low %v4428_v10, %v4435_v6  ;;  %v3427_v17 = vrot.slane %v3046_v27, %v8777_v56  ;;  %v3431_v62 = vrot.slane %v3046_v27, %v8781_v5 }
 0xa14   : > { %9845 = vst [vmem:[#allocation5_spill] sm:$0xff] %v8897_v25  ;;  %v6240_v29 = vadd.f32 -29.406033, %v2988_v42  ;;  %v2958_v34 = vadd.f32 %v9846_v3, %v2644_v60  ;;  %v2511_v4 = vpop.xlane.xlu0 %2510  ;;  %v3435_v51 = vrot.slane %v3046_v27, %v8784_v28  ;;  %v3439_v59 = vrot.slane %v3046_v27, %v8787_v7 }
 0xa15   : > { %v8908_v53 = vadd.f32 %v2511_v4, %v9847_v2  ;;  %v8910_v40 = vcombine.low %v4360_v47, %v4367_v26  ;;  %v4451_v19 = vcombine.low %v4442_v31, %v4449_v55  ;;  %v3443_v1 = vrot.slane %v3046_v27, %v8790_v9  ;;  %v9848_v26 = vld [vmem:[#allocation46_spill] sm:$0xff] }
 0xa16   : > { %v2990_v45 = vmul.f32 -0.5, %v2958_v34  ;;  %v4458_v63 = vrot.slane %v4450_v48, %v8803_v43  ;;  %v3447_v8 = vrot.slane %v3046_v27, %v8793_v12  ;;  %v3451_v58 = vrot.slane %v3046_v27, %v8796_v46  ;;  %v9849_v34 = vld [vmem:[#allocation29_spill] sm:$0xff] }
 0xa17   : > { %v2650_v18 = vpop.xlane.xlu1 %2649  ;;  %v4465_v0 = vrot.slane %v4451_v19, %v8803_v43  ;;  %v4614_v10 = vcombine.low %v3423_v24, %v3427_v17  ;;  %v4615_v6 = vcombine.low %v3431_v62, %v3435_v51  ;;  %v4616_v42 = vcombine.low %v3439_v59, %v3443_v1 }
 0xa18   : > { %v8918_v60 = vadd.f32 %v6240_v29, %v8751_v23  ;;  %v6242_v47 = vadd.f32 -29.406033, %v2990_v45  ;;  %v2960_v31 = vadd.f32 %v9848_v26, %v2650_v18  ;;  %v2517_v55 = vpop.xlane.xlu0 %2516  ;;  %v4617_v3 = vcombine.low %v3447_v8, %v3451_v58  ;;  %v9850_v8 = vld [vmem:[#allocation48_spill] sm:$0xff] }
 0xa19   : > { %v8922_v48 = vadd.f32 %v2517_v55, %v9849_v34  ;;  %v4624_v4 = vrot.slane %v4614_v10, %v8803_v43  ;;  %v4631_v27 = vrot.slane %v4615_v6, %v8803_v43  ;;  %v3359_v24 = vrot.slane %v8864_v61, %v8774_v36  ;;  %v9851_v6 = vld [vmem:[#allocation31_spill] sm:$0xff] }
 0xa1a   : > { %v2992_v17 = vmul.f32 -0.5, %v2960_v31  ;;  %v8928_v62 = vcombine.low %v4458_v63, %v4465_v0  ;;  %v4638_v23 = vrot.slane %v4616_v42, %v8803_v43  ;;  %v4645_v29 = vrot.slane %v4617_v3, %v8803_v43 }
 0xa1b   : > { %v2656_v51 = vpop.xlane.xlu1 %2655  ;;  %v4646_v59 = vcombine.low %v4624_v4, %v4631_v27  ;;  %v3363_v2 = vrot.slane %v8864_v61, %v8777_v56  ;;  %v3367_v19 = vrot.slane %v8864_v61, %v8781_v5  ;;  %v3371_v1 = vrot.slane %v8864_v61, %v8784_v28 }
 0xa1c   : > { %v6244_v45 = vadd.f32 -29.406033, %v2992_v17  ;;  %v2962_v58 = vadd.f32 %v9850_v8, %v2656_v51  ;;  %v2523_v63 = vpop.xlane.xlu0 %2522  ;;  %v4647_v18 = vcombine.low %v4638_v23, %v4645_v29  ;;  %v3375_v0 = vrot.slane %v8864_v61, %v8787_v7  ;;  %v9853_v51 = vld [vmem:[#allocation49_spill] sm:$0xff] }
 0xa1d   : > { %v8942_v10 = vadd.f32 %v6242_v47, %v8759_v39  ;;  %v8945_v42 = vadd.f32 %v2523_v63, %v9851_v6  ;;  %v3379_v26 = vrot.slane %v8864_v61, %v8790_v9  ;;  %v3383_v31 = vrot.slane %v8864_v61, %v8793_v12 }
 0xa1e   : > { %v2994_v55 = vmul.f32 -0.5, %v2962_v58  ;;  %v4654_v3 = vrot.slane %v4646_v59, %v8803_v43  ;;  %v4661_v34 = vrot.slane %v4647_v18, %v8803_v43  ;;  %v3387_v4 = vrot.slane %v8864_v61, %v8796_v46  ;;  %v9854_v58 = vld [vmem:[#allocation41_spill] sm:$0xff] }
 0xa1f   : > { %9852 = vst [vmem:[#allocation64_spill] sm:$0xff] %v8945_v42  ;;  %v8956_v39 = vadd.f32 %v6244_v45, %v8767_v15  ;;  %v2662_v47 = vpop.xlane.xlu1 %2661  ;;  %v4516_v27 = vcombine.low %v3359_v24, %v3363_v2  ;;  %v4517_v17 = vcombine.low %v3367_v19, %v3371_v1  ;;  %v4518_v23 = vcombine.low %v3375_v0, %v3379_v26 }
 0xa20   : > { %v6246_v29 = vadd.f32 -29.406033, %v2994_v55  ;;  %v2964_v8 = vadd.f32 %v9853_v51, %v2662_v47  ;;  %v2593_v63 = vpop.xlane.xlu0 %2592  ;;  %v4519_v6 = vcombine.low %v3383_v31, %v3387_v4  ;;  %v3487_v59 = vrot.slane %v8888_v30, %v8774_v36  ;;  %v9855_v47 = vld [vmem:[#allocation51_spill] sm:$0xff] }
 0xa21   : > { %v2941_v18 = vadd.f32 %v9854_v58, %v2593_v63  ;;  %v4526_v42 = vrot.slane %v4516_v27, %v8803_v43  ;;  %v4533_v61 = vrot.slane %v4517_v17, %v8803_v43  ;;  %v4540_v15 = vrot.slane %v4518_v23, %v8803_v43  ;;  %v9856_v23 = vld [vmem:[#allocation34_spill] sm:$0xff] }
 0xa22   : > { %v8966_v24 = vadd.f32 %v6246_v29, %v8800_v21  ;;  %v2996_v2 = vmul.f32 -0.5, %v2964_v8  ;;  %v8968_v19 = vcombine.low %v4654_v3, %v4661_v34  ;;  %v4547_v1 = vrot.slane %v4519_v6, %v8803_v43 }
 0xa23   : > { %v2973_v45 = vmul.f32 -0.5, %v2941_v18  ;;  %v2668_v0 = vpop.xlane.xlu1 %2667  ;;  %v4548_v26 = vcombine.low %v4526_v42, %v4533_v61  ;;  %v3491_v31 = vrot.slane %v8888_v30, %v8777_v56  ;;  %v3495_v55 = vrot.slane %v8888_v30, %v8781_v5 }
 0xa24   : > { %v6248_v4 = vadd.f32 -29.406033, %v2996_v2  ;;  %v2966_v27 = vadd.f32 %v9855_v47, %v2668_v0  ;;  %v2599_v17 = vpop.xlane.xlu0 %2598  ;;  %v4549_v21 = vcombine.low %v4540_v15, %v4547_v1  ;;  %v3499_v3 = vrot.slane %v8888_v30, %v8784_v28  ;;  %v9858_v47 = vld [vmem:[#allocation36_spill] sm:$0xff] }
 0xa25   : > { %v6225_v34 = vadd.f32 -29.406033, %v2973_v45  ;;  %v2943_v29 = vadd.f32 %v9856_v23, %v2599_v17  ;;  %v4556_v51 = vrot.slane %v4548_v26, %v8803_v43  ;;  %v3503_v42 = vrot.slane %v8888_v30, %v8787_v7 }
 0xa26   : > { %v8983_v8 = vadd.f32 %v6248_v4, %v8810_v44  ;;  %v2998_v63 = vmul.f32 -0.5, %v2966_v27  ;;  %v4563_v6 = vrot.slane %v4549_v21, %v8803_v43  ;;  %v3507_v58 = vrot.slane %v8888_v30, %v8790_v9 }
 0xa27   : > { %v3037_v18 = vadd.f32 %v6225_v34, %v8689_v38  ;;  %v2975_v61 = vmul.f32 -0.5, %v2943_v29  ;;  %v3511_v15 = vrot.slane %v8888_v30, %v8793_v12  ;;  %v3515_v2 = vrot.slane %v8888_v30, %v8796_v46 }
 0xa28   : > { %9857 = vst [vmem:[#allocation7_spill] sm:$0xff] %v8983_v8  ;;  %v6250_v1 = vadd.f32 -29.406033, %v2998_v63  ;;  %v2605_v45 = vpop.xlane.xlu0 %2604  ;;  %v8993_v0 = vcombine.low %v4556_v51, %v4563_v6  ;;  %v8995_v44 = vcombine.low %v3487_v59, %v3491_v31  ;;  %v8997_v26 = vcombine.low %v3495_v55, %v3499_v3 }
 0xa29   : > { %v6227_v4 = vadd.f32 -29.406033, %v2975_v61  ;;  %v2945_v27 = vadd.f32 %v9858_v47, %v2605_v45  ;;  %v3135_v38 = vrot.slane %v3037_v18, %v8774_v36  ;;  %v3139_v17 = vrot.slane %v3037_v18, %v8777_v56  ;;  %v9860_v47 = vld [vmem:[#allocation37_spill] sm:$0xff] }
 0xa2a   : > { %v3143_v21 = vrot.slane %v3037_v18, %v8781_v5  ;;  %v3147_v34 = vrot.slane %v3037_v18, %v8784_v28  ;;  %v3151_v30 = vrot.slane %v3037_v18, %v8787_v7  ;;  %v9005_v23 = vcombine.low %v3503_v42, %v3507_v58 }
 0xa2b   : > { %v3039_v59 = vadd.f32 %v6227_v4, %v8693_v35  ;;  %v2977_v31 = vmul.f32 -0.5, %v2945_v27  ;;  %v3155_v55 = vrot.slane %v3037_v18, %v8790_v9  ;;  %v3159_v3 = vrot.slane %v3037_v18, %v8793_v12 }
 0xa2c   : > { %v9011_v29 = vadd.f32 %v6250_v1, %v8816_v13  ;;  %v2611_v51 = vpop.xlane.xlu0 %2610  ;;  %v3163_v63 = vrot.slane %v3037_v18, %v8796_v46  ;;  %v4173_v6 = vcombine.low %v3135_v38, %v3139_v17  ;;  %v4174_v61 = vcombine.low %v3143_v21, %v3147_v34 }
 0xa2d   : > { %v6229_v45 = vadd.f32 -29.406033, %v2977_v31  ;;  %v2947_v50 = vadd.f32 %v9860_v47, %v2611_v51  ;;  %v4175_v42 = vcombine.low %v3151_v30, %v3155_v55  ;;  %v3199_v58 = vrot.slane %v3039_v59, %v8774_v36  ;;  %v9861_v55 = vld [vmem:[#allocation38_spill] sm:$0xff] }
 0xa2e   : > { %9859 = vst [vmem:[#allocation8_spill] sm:$0xff] %v9011_v29  ;;  %v4176_v35 = vcombine.low %v3159_v3, %v3163_v63  ;;  %v4183_v4 = vrot.slane %v4173_v6, %v8803_v43  ;;  %v4190_v27 = vrot.slane %v4174_v61, %v8803_v43  ;;  %v3203_v25 = vrot.slane %v3039_v59, %v8777_v56 }
 0xa2f   : > { %v3041_v13 = vadd.f32 %v6229_v45, %v8703_v20  ;;  %v2979_v1 = vmul.f32 -0.5, %v2947_v50  ;;  %v4197_v18 = vrot.slane %v4175_v42, %v8803_v43  ;;  %v3207_v38 = vrot.slane %v3039_v59, %v8781_v5 }
 0xa30   : > { %v2617_v17 = vpop.xlane.xlu0 %2616  ;;  %v4204_v21 = vrot.slane %v4176_v35, %v8803_v43  ;;  %v4205_v34 = vcombine.low %v4183_v4, %v4190_v27  ;;  %v3211_v30 = vrot.slane %v3039_v59, %v8784_v28  ;;  %v3215_v31 = vrot.slane %v3039_v59, %v8787_v7 }
 0xa31   : > { %v2949_v3 = vadd.f32 %v9861_v55, %v2617_v17  ;;  %v3219_v51 = vrot.slane %v3039_v59, %v8790_v9  ;;  %v3223_v63 = vrot.slane %v3039_v59, %v8793_v12  ;;  %v9028_v20 = vcombine.low %v3511_v15, %v3515_v2  ;;  %v9862_v2 = vld [vmem:[#allocation39_spill] sm:$0xff] }
 0xa32   : > { %v4206_v50 = vcombine.low %v4197_v18, %v4204_v21  ;;  %v4213_v6 = vrot.slane %v4205_v34, %v8803_v43  ;;  %v3227_v61 = vrot.slane %v3039_v59, %v8796_v46  ;;  %v4271_v45 = vcombine.low %v3199_v58, %v3203_v25 }
 0xa33   : > { %v6231_v47 = vadd.f32 -29.406033, %v2979_v1  ;;  %v2981_v42 = vmul.f32 -0.5, %v2949_v3  ;;  %v4272_v35 = vcombine.low %v3207_v38, %v3211_v30  ;;  %v4273_v4 = vcombine.low %v3215_v31, %v3219_v51 }
 0xa34   : > { %v2623_v27 = vpop.xlane.xlu0 %2622  ;;  %v4220_v29 = vrot.slane %v4206_v50, %v8803_v43  ;;  %v4274_v17 = vcombine.low %v3223_v63, %v3227_v61  ;;  %v4281_v55 = vrot.slane %v4271_v45, %v8803_v43  ;;  %v3263_v8 = vrot.slane %v3041_v13, %v8774_v36  ;;  %v9863_v45 = vld [vmem:[#allocation40_spill] sm:$0xff] }
 0xa35   : > { %v6233_v15 = vadd.f32 -29.406033, %v2981_v42  ;;  %v2951_v18 = vadd.f32 %v9862_v2, %v2623_v27  ;;  %v4288_v21 = vrot.slane %v4272_v35, %v8803_v43  ;;  %v4295_v59 = vrot.slane %v4273_v4, %v8803_v43 }
 0xa36   : > { %v4221_v25 = vcombine.low %v4213_v6, %v4220_v29  ;;  %v4302_v58 = vrot.slane %v4274_v17, %v8803_v43  ;;  %v3267_v1 = vrot.slane %v3041_v13, %v8777_v56  ;;  %v3271_v38 = vrot.slane %v3041_v13, %v8781_v5 }
 0xa37   : > { %v3043_v34 = vadd.f32 %v6231_v47, %v8711_v32  ;;  %v2983_v30 = vmul.f32 -0.5, %v2951_v18  ;;  %v4303_v31 = vcombine.low %v4281_v55, %v4288_v21  ;;  %v3275_v3 = vrot.slane %v3041_v13, %v8784_v28 }
 0xa38   : > { %5696 = vperm.xlu0 %6733, %v4221_v25   ;;  %v2629_v51 = vpop.xlane.xlu0 %2628  ;;  %v4304_v63 = vcombine.low %v4295_v59, %v4302_v58  ;;  %v3279_v50 = vrot.slane %v3041_v13, %v8787_v7  ;;  %v3283_v61 = vrot.slane %v3041_v13, %v8790_v9  ;;  %v3287_v29 = vrot.slane %v3041_v13, %v8793_v12 }
 0xa39   : > { %v9047_v6 = vadd.f32 %v6233_v15, %v8719_v54  ;;  %v2953_v42 = vadd.f32 %v9863_v45, %v2629_v51  ;;  %v4311_v32 = vrot.slane %v4303_v31, %v8803_v43  ;;  %v3291_v47 = vrot.slane %v3041_v13, %v8796_v46  ;;  %v9864_v13 = vld [vmem:[#allocation55_spill] sm:$0xff] }
 0xa3a   : > { %v4318_v35 = vrot.slane %v4304_v63, %v8803_v43  ;;  %v4369_v4 = vcombine.low %v3263_v8, %v3267_v1  ;;  %v4370_v27 = vcombine.low %v3271_v38, %v3275_v3  ;;  %v4371_v17 = vcombine.low %v3279_v50, %v3283_v61 }
 0xa3b   : > { %v6235_v55 = vadd.f32 -29.406033, %v2983_v30  ;;  %v2985_v2 = vmul.f32 -0.5, %v2953_v42  ;;  %v4372_v18 = vcombine.low %v3287_v29, %v3291_v47  ;;  %v3327_v21 = vrot.slane %v3043_v34, %v8774_v36 }
 0xa3c   : > { %v4319_v59 = vcombine.low %v4311_v32, %v4318_v35  ;;  %v2635_v25 = vpop.xlane.xlu0 %2634  ;;  %v4379_v54 = vrot.slane %v4369_v4, %v8803_v43  ;;  %v4386_v15 = vrot.slane %v4370_v27, %v8803_v43  ;;  %v4393_v58 = vrot.slane %v4371_v17, %v8803_v43  ;;  %v9865_v17 = vld [vmem:[#allocation57_spill] sm:$0xff] }
 0xa3d   : > { %v6237_v31 = vadd.f32 -29.406033, %v2985_v2  ;;  %v2955_v51 = vadd.f32 %v9864_v13, %v2635_v25  ;;  %v4400_v8 = vrot.slane %v4372_v18, %v8803_v43  ;;  %v3331_v1 = vrot.slane %v3043_v34, %v8777_v56 }
 0xa3e   : > { %5702 = vperm.xlu1 %6734, %v4319_v59   ;;  %v4401_v38 = vcombine.low %v4379_v54, %v4386_v15  ;;  %v3335_v30 = vrot.slane %v3043_v34, %v8781_v5  ;;  %v3339_v3 = vrot.slane %v3043_v34, %v8784_v28  ;;  %v3343_v63 = vrot.slane %v3043_v34, %v8787_v7  ;;  %v9866_v59 = vld [vmem:[#allocation53_spill] sm:$0xff] }
 0xa3f   : > { %v3047_v50 = vadd.f32 %v6235_v55, %v8730_v16  ;;  %v2987_v61 = vmul.f32 -0.5, %v2955_v51  ;;  %v4402_v29 = vcombine.low %v4393_v58, %v4400_v8  ;;  %v3347_v45 = vrot.slane %v3043_v34, %v8790_v9 }
 0xa40   : > { %v2641_v42 = vpop.xlane.xlu0 %2640  ;;  %v4409_v32 = vrot.slane %v4401_v38, %v8803_v43  ;;  %v3351_v47 = vrot.slane %v3043_v34, %v8793_v12  ;;  %v3355_v35 = vrot.slane %v3043_v34, %v8796_v46  ;;  %v4467_v4 = vcombine.low %v3327_v21, %v3331_v1 }
 0xa41   : > { %v9069_v27 = vadd.f32 %v6237_v31, %v8738_v41  ;;  %v2957_v2 = vadd.f32 %v9865_v17, %v2641_v42  ;;  %v2674_v18 = vpop.xlane.xlu1 %2673  ;;  %v4416_v16 = vrot.slane %v4402_v29, %v8803_v43  ;;  %v4468_v55 = vcombine.low %v3335_v30, %v3339_v3  ;;  %v9867_v30 = vld [vmem:[#allocation58_spill] sm:$0xff] }
 0xa42   : > { %5699 = vperm.xlu1 %6734, %v8884_v49   ;;  %v2968_v25 = vadd.f32 %v9866_v59, %v2674_v18  ;;  %v4469_v54 = vcombine.low %v3343_v63, %v3347_v45  ;;  %v4470_v15 = vcombine.low %v3351_v47, %v3355_v35  ;;  %v4477_v58 = vrot.slane %v4467_v4, %v8803_v43 }
 0xa43   : > { %v6239_v13 = vadd.f32 -29.406033, %v2987_v61  ;;  %v2989_v34 = vmul.f32 -0.5, %v2957_v2  ;;  %v4417_v21 = vcombine.low %v4409_v32, %v4416_v16  ;;  %v4484_v41 = vrot.slane %v4468_v55, %v8803_v43 }
 0xa44   : > { %v3000_v31 = vmul.f32 -0.5, %v2968_v25  ;;  %v2647_v51 = vpop.xlane.xlu0 %2646  ;;  %v4491_v8 = vrot.slane %v4469_v54, %v8803_v43  ;;  %v4498_v1 = vrot.slane %v4470_v15, %v8803_v43  ;;  %v3455_v38 = vrot.slane %v3047_v50, %v8774_v36  ;;  %v9868_v54 = vld [vmem:[#allocation59_spill] sm:$0xff] }
 0xa45   : > { %v6241_v49 = vadd.f32 -29.406033, %v2989_v34  ;;  %v2959_v3 = vadd.f32 %v9867_v30, %v2647_v51  ;;  %v4499_v63 = vcombine.low %v4477_v58, %v4484_v41  ;;  %v3459_v29 = vrot.slane %v3047_v50, %v8777_v56 }
 0xa46   : > { %v6252_v45 = vadd.f32 -29.406033, %v3000_v31  ;;  %5708 = vperm.xlu1 %6734, %v4417_v21   ;;  %v4500_v61 = vcombine.low %v4491_v8, %v4498_v1  ;;  %v3463_v42 = vrot.slane %v3047_v50, %v8781_v5  ;;  %v3467_v32 = vrot.slane %v3047_v50, %v8784_v28 }
 0xa47   : > { %v9085_v47 = vadd.f32 %v6239_v13, %v8747_v52  ;;  %v2991_v35 = vmul.f32 -0.5, %v2959_v3  ;;  %v4507_v4 = vrot.slane %v4499_v63, %v8803_v43  ;;  %v3471_v17 = vrot.slane %v3047_v50, %v8787_v7  ;;  %v9869_v3 = vld [vmem:[#allocation60_spill] sm:$0xff] }
 0xa48   : > { %v9090_v2 = vadd.f32 %v6241_v49, %v8755_v14  ;;  %v2653_v18 = vpop.xlane.xlu0 %2652  ;;  %v4514_v16 = vrot.slane %v4500_v61, %v8803_v43  ;;  %v3475_v55 = vrot.slane %v3047_v50, %v8790_v9  ;;  %v3479_v59 = vrot.slane %v3047_v50, %v8793_v12 }
 0xa49   : > { %v6243_v25 = vadd.f32 -29.406033, %v2991_v35  ;;  %v2961_v15 = vadd.f32 %v9868_v54, %v2653_v18  ;;  %v3483_v52 = vrot.slane %v3047_v50, %v8796_v46  ;;  %v4663_v58 = vcombine.low %v3455_v38, %v3459_v29 }
 0xa4a   : > { %v9098_v13 = vadd.f32 %v6252_v45, %v8829_v33  ;;  %5705 = vperm.xlu1 %6734, %v8910_v40   ;;  %v4515_v14 = vcombine.low %v4507_v4, %v4514_v16  ;;  %v4664_v34 = vcombine.low %v3463_v42, %v3467_v32  ;;  %v4665_v21 = vcombine.low %v3471_v17, %v3475_v55 }
 0xa4b   : > { %v2993_v41 = vmul.f32 -0.5, %v2961_v15  ;;  %v4666_v31 = vcombine.low %v3479_v59, %v3483_v52  ;;  %v4673_v51 = vrot.slane %v4663_v58, %v8803_v43  ;;  %v3391_v8 = vrot.slane %v9047_v6, %v8774_v36  ;;  %v9870_v52 = vld [vmem:[#allocation62_spill] sm:$0xff] }
 0xa4c   : > { %v4680_v1 = vrot.slane %v4664_v34, %v8803_v43  ;;  %v4687_v50 = vrot.slane %v4665_v21, %v8803_v43  ;;  %v2659_v38 = vpop.xlane.xlu0 %2658  ;;  %v3395_v33 = vrot.slane %v9047_v6, %v8777_v56  ;;  %v3399_v40 = vrot.slane %v9047_v6, %v8781_v5 }
 0xa4d   : > { %v9111_v49 = vadd.f32 %v6243_v25, %v8763_v37  ;;  %v4694_v30 = vrot.slane %v4666_v31, %v8803_v43  ;;  %v2963_v63 = vadd.f32 %v9869_v3, %v2659_v38  ;;  %v3403_v29 = vrot.slane %v9047_v6, %v8784_v28 }
 0xa4e   : > { %5714 = vperm.xlu1 %6734, %v4515_v14   ;;  %v4695_v45 = vcombine.low %v4673_v51, %v4680_v1  ;;  %v3407_v61 = vrot.slane %v9047_v6, %v8787_v7  ;;  %v3411_v42 = vrot.slane %v9047_v6, %v8790_v9  ;;  %v3415_v32 = vrot.slane %v9047_v6, %v8793_v12 }
 0xa4f   : > { %v6245_v37 = vadd.f32 -29.406033, %v2993_v41  ;;  %v4696_v35 = vcombine.low %v4687_v50, %v4694_v30  ;;  %v2995_v4 = vmul.f32 -0.5, %v2963_v63  ;;  %v3419_v17 = vrot.slane %v9047_v6, %v8796_v46 }
 0xa50   : > { %v4703_v18 = vrot.slane %v4695_v45, %v8803_v43  ;;  %v2665_v16 = vpop.xlane.xlu0 %2664  ;;  %v4565_v55 = vcombine.low %v3391_v8, %v3395_v33  ;;  %v4566_v59 = vcombine.low %v3399_v40, %v3403_v29  ;;  %v4567_v25 = vcombine.low %v3407_v61, %v3411_v42 }
 0xa51   : > { %v4710_v54 = vrot.slane %v4696_v35, %v8803_v43  ;;  %v6247_v15 = vadd.f32 -29.406033, %v2995_v4  ;;  %v2965_v58 = vadd.f32 %v9870_v52, %v2665_v16  ;;  %v4568_v14 = vcombine.low %v3415_v32, %v3419_v17 }
 0xa52   : > { %5711 = vperm.xlu1 %6734, %v8928_v62   ;;  %v4575_v34 = vrot.slane %v4565_v55, %v8803_v43  ;;  %v4582_v21 = vrot.slane %v4566_v59, %v8803_v43  ;;  %v4589_v6 = vrot.slane %v4567_v25, %v8803_v43  ;;  %v3519_v41 = vrot.slane %v9069_v27, %v8774_v36 }
 0xa53   : > { %v9135_v31 = vadd.f32 %v6245_v37, %v8771_v22  ;;  %v4711_v51 = vcombine.low %v4703_v18, %v4710_v54  ;;  %v2997_v8 = vmul.f32 -0.5, %v2965_v58  ;;  %v4596_v1 = vrot.slane %v4568_v14, %v8803_v43  ;;  %v9871_v18 = vld [vmem:[#allocation63_spill] sm:$0xff] }
 0xa54   : > { %v4597_v50 = vcombine.low %v4575_v34, %v4582_v21  ;;  %v3523_v62 = vrot.slane %v9069_v27, %v8777_v56  ;;  %v3527_v38 = vrot.slane %v9069_v27, %v8781_v5  ;;  %v3531_v33 = vrot.slane %v9069_v27, %v8784_v28  ;;  %v2671_v40 = vpop.xlane.xlu0 %2670  ;;  %v9872_v21 = vld [vmem:[#allocation65_spill] sm:$0xff] }
 0xa55   : > { %5726 = vperm.xlu0 %6733, %v4711_v51   ;;  %v9145_v30 = vadd.f32 %v6247_v15, %v8807_v57  ;;  %v4598_v22 = vcombine.low %v4589_v6, %v4596_v1  ;;  %v3535_v3 = vrot.slane %v9069_v27, %v8787_v7  ;;  %v3539_v63 = vrot.slane %v9069_v27, %v8790_v9 }
 0xa56   : > { %v4605_v29 = vrot.slane %v4597_v50, %v8803_v43  ;;  %v3543_v45 = vrot.slane %v9069_v27, %v8793_v12  ;;  %v3547_v61 = vrot.slane %v9069_v27, %v8796_v46  ;;  %v4761_v42 = vcombine.low %v3519_v41, %v3523_v62 }
 0xa57   : > { %v6249_v32 = vadd.f32 -29.406033, %v2997_v8  ;;  %v4612_v57 = vrot.slane %v4598_v22, %v8803_v43  ;;  %v4762_v37 = vcombine.low %v3527_v38, %v3531_v33  ;;  %v4763_v35 = vcombine.low %v3535_v3, %v3539_v63 }
 0xa58   : > { %v4764_v4 = vcombine.low %v3543_v45, %v3547_v61  ;;  %v4771_v17 = vrot.slane %v4761_v42, %v8803_v43  ;;  %v2967_v16 = vadd.f32 %v9871_v18, %v2671_v40  ;;  %v4722_v55 = vrot.slane %v8995_v44, %v8803_v43  ;;  %v2677_v59 = vpop.xlane.xlu0 %2676 }
 0xa59   : > { %5723 = vperm.xlu0 %6733, %v8968_v19   ;;  %v4613_v25 = vcombine.low %v4605_v29, %v4612_v57  ;;  %v4778_v27 = vrot.slane %v4762_v37, %v8803_v43  ;;  %v4785_v54 = vrot.slane %v4763_v35, %v8803_v43  ;;  %v4729_v15 = vrot.slane %v8997_v26, %v8803_v43 }
 0xa5a   : > { %v4792_v52 = vrot.slane %v4764_v4, %v8803_v43  ;;  %v2999_v58 = vmul.f32 -0.5, %v2967_v16  ;;  %v4736_v14 = vrot.slane %v9005_v23, %v8803_v43  ;;  %v4743_v44 = vrot.slane %v9028_v20, %v8803_v43 }
 0xa5b   : > { %5720 = vperm.xlu1 %6734, %v4613_v25   ;;  %v4793_v34 = vcombine.low %v4771_v17, %v4778_v27  ;;  %v4744_v19 = vcombine.low %v4722_v55, %v4729_v15  ;;  %v2969_v6 = vadd.f32 %v9872_v21, %v2677_v59  ;;  %v3615_v41 = vrot.slane %v8918_v60, %v8774_v36 }
 0xa5c   : > { %v4794_v51 = vcombine.low %v4785_v54, %v4792_v52  ;;  %v6251_v8 = vadd.f32 -29.406033, %v2999_v58  ;;  %v4745_v26 = vcombine.low %v4736_v14, %v4743_v44  ;;  %v3619_v1 = vrot.slane %v8918_v60, %v8777_v56 }
 0xa5d   : > { %v4801_v50 = vrot.slane %v4793_v34, %v8803_v43  ;;  %v4752_v23 = vrot.slane %v4744_v19, %v8803_v43  ;;  %v3001_v62 = vmul.f32 -0.5, %v2969_v6  ;;  %v3623_v20 = vrot.slane %v8918_v60, %v8781_v5 }
 0xa5e   : > { %v9181_v38 = vadd.f32 %v6249_v32, %v8813_v11  ;;  %v4808_v33 = vrot.slane %v4794_v51, %v8803_v43  ;;  %v4759_v40 = vrot.slane %v4745_v26, %v8803_v43  ;;  %v3627_v22 = vrot.slane %v8918_v60, %v8784_v28 }
 0xa5f   : > { %v9188_v3 = vadd.f32 %v6251_v8, %v8908_v53  ;;  %5717 = vperm.xlu1 %6734, %v8993_v0   ;;  %v3631_v63 = vrot.slane %v8918_v60, %v8787_v7  ;;  %v3635_v29 = vrot.slane %v8918_v60, %v8790_v9  ;;  %v3639_v11 = vrot.slane %v8918_v60, %v8793_v12 }
 0xa60   : > { %v4809_v45 = vcombine.low %v4801_v50, %v4808_v33  ;;  %v9197_v61 = vadd.f32 -29.406033, %v3001_v62  ;;  %v3643_v42 = vrot.slane %v8918_v60, %v8796_v46  ;;  %v4908_v32 = vcombine.low %v3615_v41, %v3619_v1 }
 0xa61   : > { %v4760_v53 = vcombine.low %v4752_v23, %v4759_v40  ;;  %v4909_v57 = vcombine.low %v3623_v20, %v3627_v22  ;;  %v4910_v37 = vcombine.low %v3631_v63, %v3635_v29  ;;  %v3647_v0 = vrot.slane %v9090_v2, %v8774_v36 }
 0xa62   : > { %5732 = vperm.xlu0 %6733, %v4809_v45   ;;  %v4911_v35 = vcombine.low %v3639_v11, %v3643_v42  ;;  %v4918_v4 = vrot.slane %v4908_v32, %v8803_v43  ;;  %v3651_v17 = vrot.slane %v9090_v2, %v8777_v56  ;;  %v3655_v18 = vrot.slane %v9090_v2, %v8781_v5 }
 0xa63   : > { %v4925_v16 = vrot.slane %v4909_v57, %v8803_v43  ;;  %v4932_v60 = vrot.slane %v4910_v37, %v8803_v43  ;;  %v3659_v55 = vrot.slane %v9090_v2, %v8784_v28  ;;  %v3663_v59 = vrot.slane %v9090_v2, %v8787_v7 }
 0xa64   : > { %v4939_v25 = vrot.slane %v4911_v35, %v8803_v43  ;;  %v3667_v27 = vrot.slane %v9090_v2, %v8790_v9  ;;  %v3671_v54 = vrot.slane %v9090_v2, %v8793_v12  ;;  %v3675_v15 = vrot.slane %v9090_v2, %v8796_v46  ;;  %v2683_v2 = vpop.xlane.xlu0 %2682 }
 0xa65   : > { %v4940_v52 = vcombine.low %v4918_v4, %v4925_v16  ;;  %v4957_v58 = vcombine.low %v3647_v0, %v3651_v17  ;;  %v4958_v14 = vcombine.low %v3655_v18, %v3659_v55  ;;  %v3679_v44 = vrot.slane %v8942_v10, %v8774_v36 }
 0xa66   : > { %5729 = vperm.xlu0 %6733, %v4760_v53   ;;  %v4941_v34 = vcombine.low %v4932_v60, %v4939_v25  ;;  %v4959_v19 = vcombine.low %v3663_v59, %v3667_v27  ;;  %v4960_v21 = vcombine.low %v3671_v54, %v3675_v15  ;;  %v3683_v6 = vrot.slane %v8942_v10, %v8777_v56 }
 0xa67   : > { %v4948_v41 = vrot.slane %v4940_v52, %v8803_v43  ;;  %v4967_v51 = vrot.slane %v4957_v58, %v8803_v43  ;;  %v4974_v8 = vrot.slane %v4958_v14, %v8803_v43  ;;  %v3687_v26 = vrot.slane %v8942_v10, %v8781_v5 }
 0xa68   : > { %v4955_v1 = vrot.slane %v4941_v34, %v8803_v43  ;;  %v4981_v50 = vrot.slane %v4959_v19, %v8803_v43  ;;  %v4988_v23 = vrot.slane %v4960_v21, %v8803_v43  ;;  %v3691_v62 = vrot.slane %v8942_v10, %v8784_v28  ;;  %v2939_v60 = vpop.xlane.xlu0 %2938 }
 0xa69   : > { %v4989_v20 = vcombine.low %v4967_v51, %v4974_v8  ;;  %v3695_v33 = vrot.slane %v8942_v10, %v8787_v7  ;;  %v3699_v40 = vrot.slane %v8942_v10, %v8790_v9  ;;  %v3703_v22 = vrot.slane %v8942_v10, %v8793_v12 }
 0xa6a   : > { %v4956_v63 = vcombine.low %v4948_v41, %v4955_v1  ;;  %v4990_v29 = vcombine.low %v4981_v50, %v4988_v23  ;;  %v3707_v11 = vrot.slane %v8942_v10, %v8796_v46  ;;  %v5006_v45 = vcombine.low %v3679_v44, %v3683_v6 }
 0xa6b   : > { %v4997_v42 = vrot.slane %v4989_v20, %v8803_v43  ;;  %v5007_v32 = vcombine.low %v3687_v26, %v3691_v62  ;;  %v5008_v53 = vcombine.low %v3695_v33, %v3699_v40  ;;  %v3711_v57 = vrot.slane %v9111_v49, %v8774_v36 }
 0xa6c   : > { %5741 = vperm.xlu0 %6733, %v4956_v63   ;;  %v5004_v37 = vrot.slane %v4990_v29, %v8803_v43  ;;  %v5009_v0 = vcombine.low %v3703_v22, %v3707_v11  ;;  %v5016_v35 = vrot.slane %v5006_v45, %v8803_v43  ;;  %v3715_v4 = vrot.slane %v9111_v49, %v8777_v56 }
 0xa6d   : > { %v5023_v17 = vrot.slane %v5007_v32, %v8803_v43  ;;  %v5030_v10 = vrot.slane %v5008_v53, %v8803_v43  ;;  %v3719_v18 = vrot.slane %v9111_v49, %v8781_v5  ;;  %v3723_v16 = vrot.slane %v9111_v49, %v8784_v28 }
 0xa6e   : > { %v5005_v55 = vcombine.low %v4997_v42, %v5004_v37  ;;  %v5037_v59 = vrot.slane %v5009_v0, %v8803_v43  ;;  %v3727_v25 = vrot.slane %v9111_v49, %v8787_v7  ;;  %v3731_v27 = vrot.slane %v9111_v49, %v8790_v9 }
 0xa6f   : > { %v5038_v54 = vcombine.low %v5016_v35, %v5023_v17  ;;  %v3735_v15 = vrot.slane %v9111_v49, %v8793_v12  ;;  %v3739_v52 = vrot.slane %v9111_v49, %v8796_v46  ;;  %v5055_v58 = vcombine.low %v3711_v57, %v3715_v4 }
 0xa70   : > { %5744 = vperm.xlu1 %6734, %v5005_v55   ;;  %v5039_v14 = vcombine.low %v5030_v10, %v5037_v59  ;;  %v5056_v44 = vcombine.low %v3719_v18, %v3723_v16  ;;  %v5057_v34 = vcombine.low %v3727_v25, %v3731_v27  ;;  %v2971_v19 = vadd.f32 %v2939_v60, %v2683_v2 }
 0xa71   : > { %v5046_v21 = vrot.slane %v5038_v54, %v8803_v43  ;;  %v5058_v6 = vcombine.low %v3735_v15, %v3739_v52  ;;  %v5065_v41 = vrot.slane %v5055_v58, %v8803_v43  ;;  %v3743_v51 = vrot.slane %v8956_v39, %v8774_v36 }
 0xa72   : > { %v5053_v8 = vrot.slane %v5039_v14, %v8803_v43  ;;  %v5072_v26 = vrot.slane %v5056_v44, %v8803_v43  ;;  %v5079_v49 = vrot.slane %v5057_v34, %v8803_v43  ;;  %v3003_v1 = vmul.f32 -0.5, %v2971_v19 }
 0xa73   : > { %v5086_v50 = vrot.slane %v5058_v6, %v8803_v43  ;;  %v3747_v2 = vrot.slane %v8956_v39, %v8777_v56  ;;  %v3751_v23 = vrot.slane %v8956_v39, %v8781_v5  ;;  %v3755_v62 = vrot.slane %v8956_v39, %v8784_v28 }
 0xa74   : > { %v9281_v20 = vadd.f32 %v9197_v61, %v8922_v48  ;;  %v5054_v33 = vcombine.low %v5046_v21, %v5053_v8  ;;  %v5087_v40 = vcombine.low %v5065_v41, %v5072_v26  ;;  %v3759_v22 = vrot.slane %v8956_v39, %v8787_v7 }
 0xa75   : > { %v5088_v63 = vcombine.low %v5079_v49, %v5086_v50  ;;  %v3763_v29 = vrot.slane %v8956_v39, %v8790_v9  ;;  %v3767_v11 = vrot.slane %v8956_v39, %v8793_v12  ;;  %v3771_v45 = vrot.slane %v8956_v39, %v8796_v46 }
 0xa76   : > { %5747 = vperm.xlu0 %6733, %v5054_v33   ;;  %v5095_v42 = vrot.slane %v5087_v40, %v8803_v43  ;;  %v9292_v48 = vadd.f32 -29.406033, %v3003_v1  ;;  %v5104_v61 = vcombine.low %v3743_v51, %v3747_v2  ;;  %v5105_v32 = vcombine.low %v3751_v23, %v3755_v62 }
 0xa77   : > { %v5102_v53 = vrot.slane %v5088_v63, %v8803_v43  ;;  %v5106_v57 = vcombine.low %v3759_v22, %v3763_v29  ;;  %v5107_v37 = vcombine.low %v3767_v11, %v3771_v45  ;;  %v3775_v0 = vrot.slane %v9135_v31, %v8774_v36 }
 0xa78   : > { %v5114_v35 = vrot.slane %v5104_v61, %v8803_v43  ;;  %v5121_v4 = vrot.slane %v5105_v32, %v8803_v43  ;;  %v3779_v39 = vrot.slane %v9135_v31, %v8777_v56  ;;  %v3783_v17 = vrot.slane %v9135_v31, %v8781_v5 }
 0xa79   : > { %v5103_v10 = vcombine.low %v5095_v42, %v5102_v53  ;;  %v5128_v18 = vrot.slane %v5106_v57, %v8803_v43  ;;  %v5135_v16 = vrot.slane %v5107_v37, %v8803_v43  ;;  %v3787_v60 = vrot.slane %v9135_v31, %v8784_v28 }
 0xa7a   : > { %v5136_v55 = vcombine.low %v5114_v35, %v5121_v4  ;;  %v3791_v59 = vrot.slane %v9135_v31, %v8787_v7  ;;  %v3795_v25 = vrot.slane %v9135_v31, %v8790_v9  ;;  %v3799_v27 = vrot.slane %v9135_v31, %v8793_v12 }
 0xa7b   : > { %5750 = vperm.xlu1 %6734, %v5103_v10   ;;  %v5137_v54 = vcombine.low %v5128_v18, %v5135_v16  ;;  %v3803_v15 = vrot.slane %v9135_v31, %v8796_v46  ;;  %v5153_v52 = vcombine.low %v3775_v0, %v3779_v39  ;;  %v5154_v58 = vcombine.low %v3783_v17, %v3787_v60 }
 0xa7c   : > { %v5144_v14 = vrot.slane %v5136_v55, %v8803_v43  ;;  %v5155_v44 = vcombine.low %v3791_v59, %v3795_v25  ;;  %v3807_v34 = vrot.slane %v8966_v24, %v8774_v36  ;;  %v3811_v19 = vrot.slane %v8966_v24, %v8777_v56 }
 0xa7d   : > { %v5151_v21 = vrot.slane %v5137_v54, %v8803_v43  ;;  %v5156_v6 = vcombine.low %v3799_v27, %v3803_v15  ;;  %v5163_v41 = vrot.slane %v5153_v52, %v8803_v43  ;;  %v5170_v51 = vrot.slane %v5154_v58, %v8803_v43  ;;  %v9873_v52 = vld [vmem:[#allocation7_spill] sm:$0xff] }
 0xa7e   : > { %v5177_v31 = vrot.slane %v5155_v44, %v8803_v43  ;;  %v3815_v8 = vrot.slane %v8966_v24, %v8781_v5  ;;  %v3819_v26 = vrot.slane %v8966_v24, %v8784_v28  ;;  %v3823_v49 = vrot.slane %v8966_v24, %v8787_v7 }
 0xa7f   : > { %v5152_v1 = vcombine.low %v5144_v14, %v5151_v21  ;;  %v5184_v50 = vrot.slane %v5156_v6, %v8803_v43  ;;  %v5185_v2 = vcombine.low %v5163_v41, %v5170_v51  ;;  %v3827_v23 = vrot.slane %v8966_v24, %v8790_v9 }
 0xa80   : > { %v3831_v62 = vrot.slane %v8966_v24, %v8793_v12  ;;  %v3835_v33 = vrot.slane %v8966_v24, %v8796_v46  ;;  %v5202_v40 = vcombine.low %v3807_v34, %v3811_v19  ;;  %v5203_v22 = vcombine.low %v3815_v8, %v3819_v26 }
 0xa81   : > { %5753 = vperm.xlu0 %6733, %v5152_v1   ;;  %v5186_v63 = vcombine.low %v5177_v31, %v5184_v50  ;;  %v5193_v29 = vrot.slane %v5185_v2, %v8803_v43  ;;  %v5204_v11 = vcombine.low %v3823_v49, %v3827_v23  ;;  %v3839_v45 = vrot.slane %v9145_v30, %v8774_v36 }
 0xa82   : > { %v5205_v42 = vcombine.low %v3831_v62, %v3835_v33  ;;  %v5212_v61 = vrot.slane %v5202_v40, %v8803_v43  ;;  %v5219_v32 = vrot.slane %v5203_v22, %v8803_v43  ;;  %v3843_v53 = vrot.slane %v9145_v30, %v8777_v56 }
 0xa83   : > { %v5200_v24 = vrot.slane %v5186_v63, %v8803_v43  ;;  %v5226_v57 = vrot.slane %v5204_v11, %v8803_v43  ;;  %v3847_v37 = vrot.slane %v9145_v30, %v8781_v5  ;;  %v3851_v0 = vrot.slane %v9145_v30, %v8784_v28 }
 0xa84   : > { %v5233_v35 = vrot.slane %v5205_v42, %v8803_v43  ;;  %v5234_v4 = vcombine.low %v5212_v61, %v5219_v32  ;;  %v3855_v39 = vrot.slane %v9145_v30, %v8787_v7  ;;  %v3859_v17 = vrot.slane %v9145_v30, %v8790_v9 }
 0xa85   : > { %v5201_v10 = vcombine.low %v5193_v29, %v5200_v24  ;;  %v3863_v18 = vrot.slane %v9145_v30, %v8793_v12  ;;  %v3867_v16 = vrot.slane %v9145_v30, %v8796_v46  ;;  %v5251_v60 = vcombine.low %v3839_v45, %v3843_v53 }
 0xa86   : > { %v5235_v55 = vcombine.low %v5226_v57, %v5233_v35  ;;  %v5242_v59 = vrot.slane %v5234_v4, %v8803_v43  ;;  %v5252_v25 = vcombine.low %v3847_v37, %v3851_v0  ;;  %v5253_v27 = vcombine.low %v3855_v39, %v3859_v17 }
 0xa87   : > { %5756 = vperm.xlu1 %6734, %v5201_v10   ;;  %v5254_v54 = vcombine.low %v3863_v18, %v3867_v16  ;;  %v5261_v15 = vrot.slane %v5251_v60, %v8803_v43  ;;  %v3871_v58 = vrot.slane %v9873_v52, %v8774_v36  ;;  %v3875_v14 = vrot.slane %v9873_v52, %v8777_v56  ;;  %v9874_v16 = vld [vmem:[#allocation5_spill] sm:$0xff] }
 0xa88   : > { %v5249_v44 = vrot.slane %v5235_v55, %v8803_v43  ;;  %v5268_v30 = vrot.slane %v5252_v25, %v8803_v43  ;;  %v5275_v34 = vrot.slane %v5253_v27, %v8803_v43  ;;  %v3879_v19 = vrot.slane %v9873_v52, %v8781_v5 }
 0xa89   : > { %v5282_v21 = vrot.slane %v5254_v54, %v8803_v43  ;;  %v3883_v6 = vrot.slane %v9873_v52, %v8784_v28  ;;  %v3887_v41 = vrot.slane %v9873_v52, %v8787_v7  ;;  %v3891_v51 = vrot.slane %v9873_v52, %v8790_v9 }
 0xa8a   : > { %v5250_v31 = vcombine.low %v5242_v59, %v5249_v44  ;;  %v5283_v8 = vcombine.low %v5261_v15, %v5268_v30  ;;  %v3895_v26 = vrot.slane %v9873_v52, %v8793_v12  ;;  %v3899_v49 = vrot.slane %v9873_v52, %v8796_v46 }
 0xa8b   : > { %v5284_v1 = vcombine.low %v5275_v34, %v5282_v21  ;;  %v5300_v50 = vcombine.low %v3871_v58, %v3875_v14  ;;  %v5301_v2 = vcombine.low %v3879_v19, %v3883_v6  ;;  %v5302_v23 = vcombine.low %v3887_v41, %v3891_v51 }
 0xa8c   : > { %5759 = vperm.xlu0 %6733, %v5250_v31   ;;  %v5291_v62 = vrot.slane %v5283_v8, %v8803_v43  ;;  %v5303_v33 = vcombine.low %v3895_v26, %v3899_v49  ;;  %v3903_v40 = vrot.slane %v9181_v38, %v8774_v36  ;;  %v3907_v22 = vrot.slane %v9181_v38, %v8777_v56 }
 0xa8d   : > { %v5298_v63 = vrot.slane %v5284_v1, %v8803_v43  ;;  %v5310_v29 = vrot.slane %v5300_v50, %v8803_v43  ;;  %v5317_v11 = vrot.slane %v5301_v2, %v8803_v43  ;;  %v5324_v45 = vrot.slane %v5302_v23, %v8803_v43 }
 0xa8e   : > { %v5331_v42 = vrot.slane %v5303_v33, %v8803_v43  ;;  %v3911_v61 = vrot.slane %v9181_v38, %v8781_v5  ;;  %v3915_v32 = vrot.slane %v9181_v38, %v8784_v28  ;;  %v3919_v53 = vrot.slane %v9181_v38, %v8787_v7 }
 0xa8f   : > { %v5299_v24 = vcombine.low %v5291_v62, %v5298_v63  ;;  %v5332_v57 = vcombine.low %v5310_v29, %v5317_v11  ;;  %v3923_v37 = vrot.slane %v9181_v38, %v8790_v9  ;;  %v3927_v0 = vrot.slane %v9181_v38, %v8793_v12 }
 0xa90   : > { %v5333_v35 = vcombine.low %v5324_v45, %v5331_v42  ;;  %v3931_v4 = vrot.slane %v9181_v38, %v8796_v46  ;;  %v5349_v39 = vcombine.low %v3903_v40, %v3907_v22  ;;  %v5350_v17 = vcombine.low %v3911_v61, %v3915_v32 }
 0xa91   : > { %5762 = vperm.xlu1 %6734, %v5299_v24   ;;  %v5340_v10 = vrot.slane %v5332_v57, %v8803_v43  ;;  %v5351_v18 = vcombine.low %v3919_v53, %v3923_v37  ;;  %v3551_v60 = vrot.slane %v9874_v16, %v8774_v36  ;;  %v3555_v55 = vrot.slane %v9874_v16, %v8777_v56 }
 0xa92   : > { %v5347_v59 = vrot.slane %v5333_v35, %v8803_v43  ;;  %v5352_v25 = vcombine.low %v3927_v0, %v3931_v4  ;;  %v5359_v27 = vrot.slane %v5349_v39, %v8803_v43  ;;  %v5366_v54 = vrot.slane %v5350_v17, %v8803_v43 }
 0xa93   : > { %v5373_v38 = vrot.slane %v5351_v18, %v8803_v43  ;;  %v3559_v15 = vrot.slane %v9874_v16, %v8781_v5  ;;  %v3563_v52 = vrot.slane %v9874_v16, %v8784_v28  ;;  %v3567_v58 = vrot.slane %v9874_v16, %v8787_v7 }
 0xa94   : > { %v5348_v14 = vcombine.low %v5340_v10, %v5347_v59  ;;  %v5380_v44 = vrot.slane %v5352_v25, %v8803_v43  ;;  %v5381_v30 = vcombine.low %v5359_v27, %v5366_v54  ;;  %v3571_v34 = vrot.slane %v9874_v16, %v8790_v9 }
 0xa95   : > { %v3575_v19 = vrot.slane %v9874_v16, %v8793_v12  ;;  %v3579_v21 = vrot.slane %v9874_v16, %v8796_v46  ;;  %v4810_v6 = vcombine.low %v3551_v60, %v3555_v55  ;;  %v4811_v41 = vcombine.low %v3559_v15, %v3563_v52 }
 0xa96   : > { %5765 = vperm.xlu0 %6733, %v5348_v14   ;;  %v5382_v51 = vcombine.low %v5373_v38, %v5380_v44  ;;  %v5389_v31 = vrot.slane %v5381_v30, %v8803_v43  ;;  %v4812_v8 = vcombine.low %v3567_v58, %v3571_v34  ;;  %v3967_v26 = vrot.slane %v9188_v3, %v8774_v36  ;;  %v9875_v34 = vld [vmem:[#allocation8_spill] sm:$0xff] }
 0xa97   : > { %v4813_v49 = vcombine.low %v3575_v19, %v3579_v21  ;;  %v4820_v1 = vrot.slane %v4810_v6, %v8803_v43  ;;  %v4827_v50 = vrot.slane %v4811_v41, %v8803_v43  ;;  %v3971_v2 = vrot.slane %v9188_v3, %v8777_v56 }
 0xa98   : > { %v5396_v23 = vrot.slane %v5382_v51, %v8803_v43  ;;  %v4834_v62 = vrot.slane %v4812_v8, %v8803_v43  ;;  %v3975_v33 = vrot.slane %v9188_v3, %v8781_v5  ;;  %v3979_v40 = vrot.slane %v9188_v3, %v8784_v28 }
 0xa99   : > { %v4841_v22 = vrot.slane %v4813_v49, %v8803_v43  ;;  %v4842_v63 = vcombine.low %v4820_v1, %v4827_v50  ;;  %v3983_v29 = vrot.slane %v9188_v3, %v8787_v7  ;;  %v3987_v11 = vrot.slane %v9188_v3, %v8790_v9 }
 0xa9a   : > { %v5397_v45 = vcombine.low %v5389_v31, %v5396_v23  ;;  %v3991_v42 = vrot.slane %v9188_v3, %v8793_v12  ;;  %v3995_v61 = vrot.slane %v9188_v3, %v8796_v46  ;;  %v5447_v32 = vcombine.low %v3967_v26, %v3971_v2 }
 0xa9b   : > { %v4843_v53 = vcombine.low %v4834_v62, %v4841_v22  ;;  %v4850_v24 = vrot.slane %v4842_v63, %v8803_v43  ;;  %v5448_v57 = vcombine.low %v3975_v33, %v3979_v40  ;;  %v5449_v37 = vcombine.low %v3983_v29, %v3987_v11 }
 0xa9c   : > { %5768 = vperm.xlu1 %6734, %v5397_v45   ;;  %v5450_v0 = vcombine.low %v3991_v42, %v3995_v61  ;;  %v5457_v35 = vrot.slane %v5447_v32, %v8803_v43  ;;  %v3583_v4 = vrot.slane %v9085_v47, %v8774_v36  ;;  %v3587_v39 = vrot.slane %v9085_v47, %v8777_v56 }
 0xa9d   : > { %v4857_v17 = vrot.slane %v4843_v53, %v8803_v43  ;;  %v5464_v3 = vrot.slane %v5448_v57, %v8803_v43  ;;  %v5471_v10 = vrot.slane %v5449_v37, %v8803_v43  ;;  %v3591_v18 = vrot.slane %v9085_v47, %v8781_v5 }
 0xa9e   : > { %v5478_v16 = vrot.slane %v5450_v0, %v8803_v43  ;;  %v3595_v60 = vrot.slane %v9085_v47, %v8784_v28  ;;  %v3599_v55 = vrot.slane %v9085_v47, %v8787_v7  ;;  %v3603_v59 = vrot.slane %v9085_v47, %v8790_v9 }
 0xa9f   : > { %v4858_v25 = vcombine.low %v4850_v24, %v4857_v17  ;;  %v5479_v27 = vcombine.low %v5457_v35, %v5464_v3  ;;  %v3607_v54 = vrot.slane %v9085_v47, %v8793_v12  ;;  %v3611_v38 = vrot.slane %v9085_v47, %v8796_v46  ;;  %v2680_v35 = vpop.xlane.xlu1 %2679 }
 0xaa0   : > { %v5480_v15 = vcombine.low %v5471_v10, %v5478_v16  ;;  %v4859_v52 = vcombine.low %v3583_v4, %v3587_v39  ;;  %v4860_v58 = vcombine.low %v3591_v18, %v3595_v60  ;;  %v4861_v14 = vcombine.low %v3599_v55, %v3603_v59 }
 0xaa1   : > { %5735 = vperm.xlu0 %6733, %v4858_v25   ;;  %v5487_v44 = vrot.slane %v5479_v27, %v8803_v43  ;;  %v4862_v30 = vcombine.low %v3607_v54, %v3611_v38  ;;  %v3935_v19 = vrot.slane %v9875_v34, %v8774_v36  ;;  %v3939_v21 = vrot.slane %v9875_v34, %v8777_v56  ;;  %v9876_v27 = vld [vmem:[#allocation54_spill] sm:$0xff] }
 0xaa2   : > { %v5494_v6 = vrot.slane %v5480_v15, %v8803_v43  ;;  %v4869_v41 = vrot.slane %v4859_v52, %v8803_v43  ;;  %v4876_v47 = vrot.slane %v4860_v58, %v8803_v43  ;;  %v4883_v51 = vrot.slane %v4861_v14, %v8803_v43 }
 0xaa3   : > { %v4890_v31 = vrot.slane %v4862_v30, %v8803_v43  ;;  %v3943_v8 = vrot.slane %v9875_v34, %v8781_v5  ;;  %v3947_v26 = vrot.slane %v9875_v34, %v8784_v28  ;;  %v3951_v49 = vrot.slane %v9875_v34, %v8787_v7 }
 0xaa4   : > { %v5495_v1 = vcombine.low %v5487_v44, %v5494_v6  ;;  %v4891_v50 = vcombine.low %v4869_v41, %v4876_v47  ;;  %v3955_v2 = vrot.slane %v9875_v34, %v8790_v9  ;;  %v3959_v23 = vrot.slane %v9875_v34, %v8793_v12 }
 0xaa5   : > { %v4892_v62 = vcombine.low %v4883_v51, %v4890_v31  ;;  %v3963_v33 = vrot.slane %v9875_v34, %v8796_v46  ;;  %v5398_v40 = vcombine.low %v3935_v19, %v3939_v21  ;;  %v5399_v22 = vcombine.low %v3943_v8, %v3947_v26 }
 0xaa6   : > { %5774 = vperm.xlu1 %6734, %v5495_v1   ;;  %v4899_v63 = vrot.slane %v4891_v50, %v8803_v43  ;;  %v5400_v29 = vcombine.low %v3951_v49, %v3955_v2  ;;  %v4031_v11 = vrot.slane %v9281_v20, %v8774_v36  ;;  %v4035_v45 = vrot.slane %v9281_v20, %v8777_v56  ;;  %v9877_v50 = vld [vmem:[#allocation6_spill] sm:$0xff] }
 0xaa7   : > { %v4906_v42 = vrot.slane %v4892_v62, %v8803_v43  ;;  %v5401_v61 = vcombine.low %v3959_v23, %v3963_v33  ;;  %v5408_v32 = vrot.slane %v5398_v40, %v8803_v43  ;;  %v5415_v53 = vrot.slane %v5399_v22, %v8803_v43  ;;  %v9878_v40 = vld [vmem:[#allocation64_spill] sm:$0xff] }
 0xaa8   : > { %v5422_v24 = vrot.slane %v5400_v29, %v8803_v43  ;;  %v4039_v57 = vrot.slane %v9281_v20, %v8781_v5  ;;  %v4043_v37 = vrot.slane %v9281_v20, %v8784_v28  ;;  %v4047_v0 = vrot.slane %v9281_v20, %v8787_v7 }
 0xaa9   : > { %v4907_v4 = vcombine.low %v4899_v63, %v4906_v42  ;;  %v5429_v39 = vrot.slane %v5401_v61, %v8803_v43  ;;  %v5430_v17 = vcombine.low %v5408_v32, %v5415_v53  ;;  %v4051_v3 = vrot.slane %v9281_v20, %v8790_v9 }
 0xaaa   : > { %v4055_v10 = vrot.slane %v9281_v20, %v8793_v12  ;;  %v4059_v18 = vrot.slane %v9281_v20, %v8796_v46  ;;  %v5545_v16 = vcombine.low %v4031_v11, %v4035_v45  ;;  %v5546_v60 = vcombine.low %v4039_v57, %v4043_v37 }
 0xaab   : > { %5738 = vperm.xlu0 %6733, %v4907_v4   ;;  %v5431_v55 = vcombine.low %v5422_v24, %v5429_v39  ;;  %v5438_v59 = vrot.slane %v5430_v17, %v8803_v43  ;;  %v5547_v25 = vcombine.low %v4047_v0, %v4051_v3  ;;  %v2970_v54 = vadd.f32 %v9876_v27, %v2680_v35 }
 0xaac   : > { %v5548_v38 = vcombine.low %v4055_v10, %v4059_v18  ;;  %v5555_v15 = vrot.slane %v5545_v16, %v8803_v43  ;;  %v5562_v52 = vrot.slane %v5546_v60, %v8803_v43  ;;  %v3999_v58 = vrot.slane %v9098_v13, %v8774_v36 }
 0xaad   : > { %v5445_v14 = vrot.slane %v5431_v55, %v8803_v43  ;;  %v5569_v20 = vrot.slane %v5547_v25, %v8803_v43  ;;  %v3002_v44 = vmul.f32 -0.5, %v2970_v54  ;;  %v4003_v30 = vrot.slane %v9098_v13, %v8777_v56 }
 0xaae   : > { %v5576_v34 = vrot.slane %v5548_v38, %v8803_v43  ;;  %v5577_v19 = vcombine.low %v5555_v15, %v5562_v52  ;;  %v4007_v21 = vrot.slane %v9098_v13, %v8781_v5  ;;  %v4011_v6 = vrot.slane %v9098_v13, %v8784_v28 }
 0xaaf   : > { %v5446_v41 = vcombine.low %v5438_v59, %v5445_v14  ;;  %v6254_v47 = vadd.f32 -29.406033, %v3002_v44  ;;  %v4015_v51 = vrot.slane %v9098_v13, %v8787_v7  ;;  %v4019_v31 = vrot.slane %v9098_v13, %v8790_v9 }
 0xab0   : > { %v5578_v8 = vcombine.low %v5569_v20, %v5576_v34  ;;  %v5585_v26 = vrot.slane %v5577_v19, %v8803_v43  ;;  %v4023_v49 = vrot.slane %v9098_v13, %v8793_v12  ;;  %v4027_v1 = vrot.slane %v9098_v13, %v8796_v46 }
 0xab1   : > { %5771 = vperm.xlu1 %6734, %v5446_v41   ;;  %v3066_v2 = vadd.f32 %v6254_v47, %v9877_v50  ;;  %v5496_v23 = vcombine.low %v3999_v58, %v4003_v30  ;;  %v5497_v62 = vcombine.low %v4007_v21, %v4011_v6  ;;  %v5498_v33 = vcombine.low %v4015_v51, %v4019_v31 }
 0xab2   : > { %v3067_v22 = vadd.f32 %v9292_v48, %v9878_v40  ;;  %v5592_v63 = vrot.slane %v5578_v8, %v8803_v43  ;;  %v5499_v29 = vcombine.low %v4023_v49, %v4027_v1  ;;  %v5694_v49 = vpop.permute.xlu1 %5693 }
 0xab3   : > { %v5506_v11 = vrot.slane %v5496_v23, %v8803_v43  ;;  %v5513_v45 = vrot.slane %v5497_v62, %v8803_v43  ;;  %v5520_v42 = vrot.slane %v5498_v33, %v8803_v43  ;;  %v4063_v13 = vrot.slane %v3066_v2, %v8774_v36 }
 0xab4   : > { %v5593_v61 = vcombine.low %v5585_v26, %v5592_v63  ;;  %v5527_v32 = vrot.slane %v5499_v29, %v8803_v43  ;;  %v4067_v53 = vrot.slane %v3066_v2, %v8777_v56  ;;  %v4071_v57 = vrot.slane %v3066_v2, %v8781_v5 }
 0xab5   : > { %v5528_v24 = vcombine.low %v5506_v11, %v5513_v45  ;;  %v4075_v48 = vrot.slane %v3066_v2, %v8784_v28  ;;  %v4079_v37 = vrot.slane %v3066_v2, %v8787_v7  ;;  %v4083_v35 = vrot.slane %v3066_v2, %v8790_v9 }
 0xab6   : > { %5780 = vperm.xlu1 %6734, %v5593_v61   ;;  %v5529_v0 = vcombine.low %v5520_v42, %v5527_v32  ;;  %v4087_v4 = vrot.slane %v3066_v2, %v8793_v12  ;;  %v4095_v39 = vrot.slane %v3067_v22, %v8774_v36  ;;  %v4091_v3 = vrot.slane %v3066_v2, %v8796_v46 }
 0xab7   : > { %v5536_v17 = vrot.slane %v5528_v24, %v8803_v43  ;;  %v5594_v10 = vcombine.low %v4063_v13, %v4067_v53  ;;  %v5595_v18 = vcombine.low %v4071_v57, %v4075_v48  ;;  %v5596_v60 = vcombine.low %v4079_v37, %v4083_v35  ;;  %v5697_v40 = vpop.permute.xlu0 %5696  ;;  %v9880_v35 = vld [vmem:[#allocation61_spill] sm:$0xff] }
 0xab8   : > { %v5543_v16 = vrot.slane %v5529_v0, %v8803_v43  ;;  %v4099_v55 = vrot.slane %v3067_v22, %v8777_v56  ;;  %v4103_v59 = vrot.slane %v3067_v22, %v8781_v5  ;;  %v5597_v25 = vcombine.low %v4087_v4, %v4091_v3 }
 0xab9   : > { %v5604_v27 = vrot.slane %v5594_v10, %v8803_v43  ;;  %v5611_v54 = vrot.slane %v5595_v18, %v8803_v43  ;;  %v4107_v36 = vrot.slane %v3067_v22, %v8784_v28  ;;  %v5618_v15 = vrot.slane %v5596_v60, %v8803_v43 }
 0xaba   : > { %v5544_v38 = vcombine.low %v5536_v17, %v5543_v16  ;;  %v4111_v52 = vrot.slane %v3067_v22, %v8787_v7  ;;  %v4115_v58 = vrot.slane %v3067_v22, %v8790_v9  ;;  %v5625_v14 = vrot.slane %v5597_v25, %v8803_v43 }
 0xabb   : > { %v5626_v20 = vcombine.low %v5604_v27, %v5611_v54  ;;  %v4119_v56 = vrot.slane %v3067_v22, %v8793_v12  ;;  %v4123_v5 = vrot.slane %v3067_v22, %v8796_v46  ;;  %v5643_v44 = vcombine.low %v4095_v39, %v4099_v55 }
 0xabc   : > { %5777 = vperm.xlu1 %6734, %v5544_v38   ;;  %v5644_v30 = vcombine.low %v4103_v59, %v4107_v36  ;;  %v5645_v34 = vcombine.low %v4111_v52, %v4115_v58  ;;  %v5627_v19 = vcombine.low %v5618_v15, %v5625_v14  ;;  %v9879_v53 = vlaneseq }
 0xabd   : > { %v5634_v28 = vrot.slane %v5626_v20, %v8803_v43  ;;  %v5646_v21 = vcombine.low %v4119_v56, %v4123_v5  ;;  %v5653_v6 = vrot.slane %v5643_v44, %v8803_v43  ;;  %v5703_v1 = vpop.permute.xlu1 %5702 }
 0xabe   : > { %v5660_v7 = vrot.slane %v5644_v30, %v8803_v43  ;;  %v5667_v9 = vrot.slane %v5645_v34, %v8803_v43  ;;  %v5641_v41 = vrot.slane %v5627_v19, %v8803_v43  ;;  %v9596_v24 = vand.u32 127, %v9879_v53 }
 0xabf   : > { %v5674_v12 = vrot.slane %v5646_v21, %v8803_v43  ;;  %vm5996_vm1 = vcmp.lt.s32.totalorder %v9879_v53, 256 }
 0xac0   : > { %v5675_v47 = vcombine.low %v5653_v6, %v5660_v7  ;;  %v5642_v46 = vcombine.low %v5634_v28, %v5641_v41  ;;  %v5794_v48 = vadd.s32 4294967288, %v9596_v24  ;;  %v5801_v0 = vadd.s32 4294967280, %v9596_v24 }
 0xac1   : > { %v5676_v51 = vcombine.low %v5667_v9, %v5674_v12  ;;  %v5700_v50 = vpop.permute.xlu1 %5699  ;;  %v5792_v17 = vsub.s32 %v9596_v24, %v9880_v35  ;;  %v5815_v10 = vadd.s32 4294967264, %v9596_v24  ;;  %v5808_v18 = vadd.s32 4294967272, %v9596_v24 }
 0xac2   : > { %v5683_v31 = vrot.slane %v5675_v47, %v8803_v43  ;;  %5783 = vperm.xlu1 %6734, %v5642_v46   ;;  %v5797_v4 = vsub.s32 %v5794_v48, %v9880_v35  ;;  %v5804_v3 = vsub.s32 %v5801_v0, %v9880_v35  ;;  %v5829_v27 = vadd.s32 4294967248, %v9596_v24 }
 0xac3   : > { %v5690_v8 = vrot.slane %v5676_v51, %v8803_v43  ;;  %v5793_v55 = vrot.slane %v5694_v49, %v5792_v17  ;;  %v5818_v25 = vsub.s32 %v5815_v10, %v9880_v35  ;;  %v5811_v54 = vsub.s32 %v5808_v18, %v9880_v35 }
 0xac4   : > { %v5798_v60 = vrot.slane %v5697_v40, %v5797_v4  ;;  %v5805_v59 = vrot.slane %v5700_v50, %v5804_v3  ;;  %v5822_v36 = vadd.s32 4294967256, %v9596_v24  ;;  %v5843_v52 = vadd.s32 4294967232, %v9596_v24 }
 0xac5   : > { %v5691_v26 = vcombine.low %v5683_v31, %v5690_v8  ;;  %v9575_v2 = vpop.permute.xlu1 %5708  ;;  %v5832_v44 = vsub.s32 %v5829_v27, %v9880_v35  ;;  %v5812_v34 = vrot.slane %v5703_v1, %v5811_v54  ;;  %v5836_v28 = vadd.s32 4294967240, %v9596_v24 }
 0xac6   : > { %v5800_v15 = vsel %vm5799_vm2, %v5798_v60, %v5793_v55  ;;  %v5825_v19 = vsub.s32 %v5822_v36, %v9880_v35  ;;  %v5846_v6 = vsub.s32 %v5843_v52, %v9880_v35  ;;  %v5857_v1 = vadd.s32 4294967216, %v9596_v24 }
 0xac7   : > { %5786 = vperm.xlu1 %6734, %v5691_v26   ;;  %v5807_v56 = vsel %vm5806_vm3, %v5805_v59, %v5800_v15  ;;  %v5839_v8 = vsub.s32 %v5836_v28, %v9880_v35  ;;  %v5850_v26 = vadd.s32 4294967224, %v9596_v24  ;;  %v5878_v59 = vadd.s32 4294967192, %v9596_v24 }
 0xac8   : > { %v5814_v21 = vsel %vm5813_vm4, %v5812_v34, %v5807_v56  ;;  %v5826_v31 = vrot.slane %v9575_v2, %v5825_v19  ;;  %v5885_v15 = vadd.s32 4294967184, %v9596_v24 }
 0xac9   : > { %v5706_v23 = vpop.permute.xlu1 %5705  ;;  %v5853_v48 = vsub.s32 %v5850_v26, %v9880_v35 }
 0xaca   : > { %v5819_v5 = vrot.slane %v5706_v23, %v5818_v25 }
 0xacc   : > { %v5821_v12 = vsel %vm5820_vm5, %v5819_v5, %v5814_v21 }
 0xacd   : > { %v9577_v62 = vpop.permute.xlu1 %5714  ;;  %v5828_v50 = vsel %vm5827_vm6, %v5826_v31, %v5821_v12 }
 0xad1   : > { %v9579_v33 = vpop.permute.xlu1 %5711 }
 0xad2   : > { %v5833_v47 = vrot.slane %v9579_v33, %v5832_v44 }
 0xad4   : > { %v9583_v63 = vpop.permute.xlu0 %5726  ;;  %v5835_v40 = vsel %vm5834_vm7, %v5833_v47, %v5828_v50 }
 0xad8   : > { %v9587_v11 = vpop.permute.xlu0 %5723 }
 0xada   : > { %v9581_v22 = vpop.permute.xlu1 %5720 }
 0xadb   : > { %v5854_v60 = vrot.slane %v9581_v22, %v5853_v48 }
 0xade   : > { %v9585_v29 = vpop.permute.xlu1 %5717 }
 0xae1   : > { %v9589_v42 = vpop.permute.xlu0 %5732 }
 0xae5   : > { %v9591_v61 = vpop.permute.xlu0 %5729 }
 0xaeb   : > { %v5742_v57 = vpop.permute.xlu0 %5741 }
 0xaec   : > { %v5902_v14 = vrot.slane %v5742_v57, %v5792_v17  ;;  %v5840_v57 = vrot.slane %v9577_v62, %v5839_v8 }
 0xaef   : > { %v5745_v45 = vpop.permute.xlu1 %5744 }
 0xaf0   : > { %v5906_v58 = vrot.slane %v5745_v45, %v5797_v4  ;;  %v5847_v45 = vrot.slane %v9585_v29, %v5846_v6  ;;  %v5864_v4 = vadd.s32 4294967208, %v9596_v24 }
 0xaf2   : > { %v5907_v7 = vsel %vm5799_vm2, %v5906_v58, %v5902_v14  ;;  %v5867_v55 = vsub.s32 %v5864_v4, %v9880_v35  ;;  %v5892_v58 = vadd.s32 4294967176, %v9596_v24 }
 0xaf4   : > { %v5895_v21 = vsub.s32 %v5892_v58, %v9880_v35 }
 0xaf5   : > { %v5748_v39 = vpop.permute.xlu0 %5747 }
 0xaf6   : > { %v5911_v30 = vrot.slane %v5748_v39, %v5804_v3  ;;  %v5860_v39 = vsub.s32 %v5857_v1, %v9880_v35 }
 0xaf8   : > { %v5912_v46 = vsel %vm5806_vm3, %v5911_v30, %v5907_v7  ;;  %v5861_v36 = vrot.slane %v9587_v11, %v5860_v39  ;;  %v5881_v11 = vsub.s32 %v5878_v59, %v9880_v35  ;;  %v5888_v30 = vsub.s32 %v5885_v15, %v9880_v35 }
 0xafa   : > { %v5751_v13 = vpop.permute.xlu1 %5750 }
 0xafb   : > { %v5916_v9 = vrot.slane %v5751_v13, %v5811_v54 }
 0xafd   : > { %v5917_v33 = vsel %vm5813_vm4, %v5916_v9, %v5912_v46 }
 0xb00   : > { %v5754_v38 = vpop.permute.xlu0 %5753 }
 0xb01   : > { %v5921_v51 = vrot.slane %v5754_v38, %v5818_v25  ;;  %v5871_v25 = vadd.s32 4294967200, %v9596_v24 }
 0xb03   : > { %v5922_v2 = vsel %vm5820_vm5, %v5921_v51, %v5917_v33  ;;  %v5874_v5 = vsub.s32 %v5871_v25, %v9880_v35  ;;  %v5882_v51 = vrot.slane %v9589_v42, %v5881_v11 }
 0xb06   : > { %v9593_v32 = vpop.permute.xlu1 %5756 }
 0xb07   : > { %v5926_v23 = vrot.slane %v9593_v32, %v5825_v19  ;;  %v5842_v32 = vsel %vm5841_vm8, %v5840_v57, %v5835_v40 }
 0xb08   : > { %v5849_v10 = vsel %vm5848_vm9, %v5847_v45, %v5842_v32 }
 0xb09   : > { %v5927_v3 = vsel %vm5827_vm6, %v5926_v23, %v5922_v2  ;;  %v5856_v27 = vsel %vm5855_vm10, %v5854_v60, %v5849_v10 }
 0xb0a   : > { %v5863_v56 = vsel %vm5862_vm11, %v5861_v36, %v5856_v27 }
 0xb0b   : > { %v5760_v41 = vpop.permute.xlu0 %5759 }
 0xb0c   : > { %v5931_v13 = vrot.slane %v5760_v41, %v5832_v44 }
 0xb0e   : > { %v5932_v62 = vsel %vm5834_vm7, %v5931_v13, %v5927_v3 }
 0xb10   : > { %v9599_v37 = vpop.permute.xlu1 %5762 }
 0xb11   : > { %v5936_v17 = vrot.slane %v9599_v37, %v5839_v8 }
 0xb13   : > { %v5937_v54 = vsel %vm5841_vm8, %v5936_v17, %v5932_v62 }
 0xb15   : > { %v5766_v0 = vpop.permute.xlu0 %5765 }
 0xb16   : > { %v5941_v18 = vrot.slane %v5766_v0, %v5846_v6  ;;  %v5875_v6 = vrot.slane %v9591_v61, %v5874_v5 }
 0xb18   : > { %v5942_v38 = vsel %vm5848_vm9, %v5941_v18, %v5937_v54 }
 0xb1b   : > { %v9608_v16 = vpop.permute.xlu1 %5768 }
 0xb1c   : > { %v5946_v37 = vrot.slane %v9608_v16, %v5853_v48  ;;  %v5868_v16 = vrot.slane %v9583_v63, %v5867_v55 }
 0xb1e   : > { %v5947_v44 = vsel %vm5855_vm10, %v5946_v37, %v5942_v38  ;;  %v5870_v24 = vsel %vm5869_vm12, %v5868_v16, %v5863_v56 }
 0xb1f   : > { %v5877_v41 = vsel %vm5876_vm13, %v5875_v6, %v5870_v24 }
 0xb20   : > { %v5736_v22 = vpop.permute.xlu0 %5735  ;;  %v5884_v35 = vsel %vm5883_vm14, %v5882_v51, %v5877_v41 }
 0xb21   : > { %v5889_v12 = vrot.slane %v5736_v22, %v5888_v30 }
 0xb25   : > { %v9616_v20 = vpop.permute.xlu1 %5774 }
 0xb26   : > { %v5956_v28 = vrot.slane %v9616_v20, %v5867_v55 }
 0xb2a   : > { %v5739_v63 = vpop.permute.xlu0 %5738 }
 0xb2b   : > { %v5896_v31 = vrot.slane %v5739_v63, %v5895_v21 }
 0xb30   : > { %v5772_v49 = vpop.permute.xlu1 %5771 }
 0xb31   : > { %v5951_v52 = vrot.slane %v5772_v49, %v5860_v39  ;;  %v5891_v49 = vsel %vm5890_vm15, %v5889_v12, %v5884_v35 }
 0xb32   : > { %v5898_v50 = vsel %vm5897_vm0, %v5896_v31, %v5891_v49 }
 0xb33   : > { %v5952_v34 = vsel %vm5862_vm11, %v5951_v52, %v5947_v44 }
 0xb34   : > { %v5957_v9 = vsel %vm5869_vm12, %v5956_v28, %v5952_v34 }
 0xb35   : > { %v5781_v29 = vpop.permute.xlu1 %5780 }
 0xb36   : > { %v5966_v20 = vrot.slane %v5781_v29, %v5881_v11 }
 0xb3b   : > { %v5778_v14 = vpop.permute.xlu1 %5777 }
 0xb3c   : > { %v5961_v19 = vrot.slane %v5778_v14, %v5874_v5 }
 0xb3e   : > { %v5962_v47 = vsel %vm5876_vm13, %v5961_v19, %v5957_v9 }
 0xb3f   : > { %v5967_v8 = vsel %vm5883_vm14, %v5966_v20, %v5962_v47 }
 0xb41   : > { %v5784_v7 = vpop.permute.xlu1 %5783 }
 0xb42   : > { %v5971_v46 = vrot.slane %v5784_v7, %v5888_v30 }
 0xb44   : > { %v5972_v1 = vsel %vm5890_vm15, %v5971_v46, %v5967_v8 }
 0xb46   : > { %v5787_v61 = vpop.permute.xlu1 %5786 }
 0xb47   : > { %v5976_v26 = vrot.slane %v5787_v61, %v5895_v21 }
 0xb49   : > { %v5977_v23 = vsel %vm5897_vm0, %v5976_v26, %v5972_v1 }
 0xb4a   : > { %v5978_v33 = vcombine.low %v5898_v50, %v5977_v23 }
 0xb4c   : > { %v5985_v42 = vrot.slane %v5978_v33, %v8803_v43 }
 0xb4e   : > { %v5992_v40 = vrot.slane %v5985_v42, %v8803_v43 }
 0xb50   : > { %5998 = vst.msk [vmem:[%s218_s16] sm:$0x3] %vm5996_vm1, %v5992_v40 }
 0xb51   : > { %7196 = shalt.err (!%p7193_p3)
}
 0xb52   : > { %s7197_s9 = scalar_lea.hbm %s9681_s25, 32  ;;  %s7201_s14 = scalar_lea.hbm %s9730_s5, 64 }
 0xb53   : > { %p7198_p4 = scmp.ne.s32.totalorder %s9681_s25, %s7197_s9  ;;  %p7202_p9 = scmp.lt.u32.totalorder %s9681_s25, %s9730_s5 }
 0xb54   : > { %p7203_p10 = scmp.lt.u32.totalorder %s7201_s14, %s7197_s9  ;;  %p7205_p12 = scmp.lt.u32.totalorder %s7197_s9, %s9681_s25 }
 0xb55   : > { %p7199_p7 = pnand %p7198_p4, %p7317_p5 }
 0xb56   : > { %p7204_p11 = por %p7203_p10, %p7202_p9 }
 0xb57   : > { %p7200_p8 = pneg %p7199_p7 }
 0xb58   : > { %p7206_p13 = por %p7205_p12, %p7204_p11 }
 0xb5a   : > { %p7207_p0 = pnand %p7206_p13, %p7200_p8 }
 0xb5c   : > { %7210 = shalt.err (!%p7207_p0)
}
 0xb5d   : > { %6690 = dma.vmem_to_hbm [thread:$0]  (%p7317_p5), %s9683_s17, 32, %s9681_s25, %s6000_s26  }
 0xb5e PF: > { %p6696_p1 = scmp.ge.s32.totalorder %s7245_s21, 2  ;;  %s6026_s8 = sand.u32 1, %s7233_s18  }
 0xb5f   : > { %s6027_s16 = scalar_lea.sflag [#allocation3], %s6026_s8 }
 0xb60   : > { %p6693_p2 = pnand %p6696_p1, %p7321_p6 }
 0xb62   : > { %7228 = dma.done.wait (!%p6693_p2), %s6027_s16, 32  }
 0xb63   : > { %7230 = vsyncadd (!%p6693_p2), %s6027_s16, 4294967264  ;;  %p15_p3 = scmp.ge.s32.totalorder %s7305_s24, 4   ;;  %s9881_s18 = smov %s7237_s19 }
 0xb64   : > { %s9882_s19 = smov %s7241_s20  ;;  %s9883_s20 = smov %s7315_s27 }
 0xb65   : > { %s9884_s21 = smov %s7305_s24  ;;  %17 = sbr.rel (!%p15_p3) target bundleno = 3 (0x3), region = 79 }
 0xb6c   :  { %6032 = vsyncpa [#allocation3], 1 }
 0xb6d   :  { %6034 = vsyncpa [#allocation3 + $0x1], 1 }

</bundles_post_ra>
